<compile_context>
chip_gen: v6e
topology: v6e:2x2x1
jax: 0.10.0
libtpu: 0.0.40
codegen_flags: <defaults>
</compile_context>

<pallas_src>
import functools

import jax
import jax.numpy as jnp
from jax import lax
from jax.experimental import pallas as pl
from jax.experimental.pallas import tpu as pltpu


def _round_up(x, m):
    return ((x + m - 1) // m) * m


def _choose_tile_h(h, w, max_rows=512):
    """Largest H-tile whose row count (tile_h*w) is <= max_rows, divides H,
    keeps the output tile sublane-aligned, and (if possible) gives >=2 tiles."""
    cands = []
    for th in range(1, h + 1):
        if h % th:
            continue
        rows = th * w
        if rows > max_rows and th != 1:
            continue
        if rows % 8 and th != h:
            continue
        cands.append(th)
    if not cands:
        return h
    multi = [t for t in cands if h // t >= 2]
    return max(multi) if multi else max(cands)


# ----------------------------------------------------------------------------
# Pallas kernel: 3x3 "same" conv tile + bias + activation.
#   x_ref: (1, H+2, W+2, Cin_p)  bf16  -- whole padded image (resident)
#   w_ref: (9*Cin_p, TC)         bf16  -- taps flattened into contraction dim
#   b_ref: (1, TC)               f32
#   o_ref: (1, tile_h*W, TC)
# ----------------------------------------------------------------------------
def _conv3x3_kernel(x_ref, w_ref, b_ref, o_ref, *, tile_h, out_w, act):
    cin = x_ref.shape[-1]
    i = pl.program_id(1)                               # H-tile index
    row0 = pl.multiple_of(i * tile_h, tile_h)
    # Row window incl. 1-row halo on each side (input is already spatially padded).
    win = x_ref[0, pl.ds(row0, tile_h + 2), :, :]      # (tile_h+2, W+2, Cin_p)

    rows = tile_h * out_w
    taps = []
    for dy in range(3):
        for dx in range(3):
            tap = win[dy:dy + tile_h, dx:dx + out_w, :]    # (tile_h, W, Cin_p)
            taps.append(tap.reshape(rows, cin))
    lhs = jnp.concatenate(taps, axis=-1)                   # (rows, 9*Cin_p) bf16

    acc = jnp.dot(lhs, w_ref[...], preferred_element_type=jnp.float32)
    acc = acc + b_ref[...]                                 # (1, TC) broadcasts
    if act == "relu":
        acc = jnp.maximum(acc, 0.0)
    else:  # sigmoid
        acc = jax.nn.sigmoid(acc)
    o_ref[0] = acc.astype(o_ref.dtype)


def conv3x3_same(x_nhwc, w, bias, act, out_dtype=jnp.bfloat16):
    """3x3 'same' conv + activation.

    x_nhwc: (B, H, W, Cin_in) -- Cin_in may already be lane-padded; any channels
            beyond the weight's Cin must be zero.
    w:      (3, 3, Cin_w, Cout), bias: (Cout,)
    Returns (B, H*W, Cout_pad) in `out_dtype` (Cout zero-padded to a multiple of 128).
    """
    B, H, W, cin_in = x_nhwc.shape
    _, _, cin_w, cout = w.shape
    cin_p = _round_up(max(cin_in, cin_w), 128)
    cout_p = _round_up(cout, 128)

    # Glue (plain JAX): spatial 'same' pad + channel pad + bf16 cast.
    xp = jnp.pad(x_nhwc, ((0, 0), (1, 1), (1, 1), (0, cin_p - cin_in)))
    xp = xp.astype(jnp.bfloat16)
    wp = jnp.pad(w, ((0, 0), (0, 0), (0, cin_p - cin_w), (0, cout_p - cout)))
    w2 = wp.reshape(9 * cin_p, cout_p).astype(jnp.bfloat16)   # tap-major rows
    b2 = jnp.pad(bias, (0, cout_p - cout)).reshape(1, cout_p).astype(jnp.float32)

    tc = 256 if cout_p % 256 == 0 else 128                    # lane-dense Cout tile
    th = _choose_tile_h(H, W)
    rows = th * W
    grid = (B, H // th, cout_p // tc)

    kernel = functools.partial(_conv3x3_kernel, tile_h=th, out_w=W, act=act)
    out = pl.pallas_call(
        kernel,
        out_shape=jax.ShapeDtypeStruct((B, H * W, cout_p), out_dtype),
        grid_spec=pltpu.PrefetchScalarGridSpec(
            num_scalar_prefetch=0,
            grid=grid,
            in_specs=[
                # Whole padded image; block index constant over (i, j) so it is
                # fetched once per image and stays VMEM-resident.
                pl.BlockSpec((1, H + 2, W + 2, cin_p), lambda b, i, j: (b, 0, 0, 0)),
                pl.BlockSpec((9 * cin_p, tc), lambda b, i, j: (0, j)),
                pl.BlockSpec((1, tc), lambda b, i, j: (0, j)),
            ],
            out_specs=pl.BlockSpec((1, rows, tc), lambda b, i, j: (b, i, j)),
        ),
        compiler_params=pltpu.CompilerParams(
            dimension_semantics=("parallel", "parallel", "parallel")
        ),
    )(xp, w2, b2)
    return out  # (B, H*W, cout_p)


# ----------------------------------------------------------------------------
# ClassificationModel forward
# ----------------------------------------------------------------------------
def classification_model_forward(x_nchw, params, num_anchors, num_classes):
    x = jnp.transpose(x_nchw, (0, 2, 3, 1)).astype(jnp.float32)   # NCHW -> NHWC
    B, H, W, _ = x.shape

    y = conv3x3_same(x, params["w1"], params["b1"], "relu")
    y = conv3x3_same(y.reshape(B, H, W, -1), params["w2"], params["b2"], "relu")
    y = conv3x3_same(y.reshape(B, H, W, -1), params["w3"], params["b3"], "relu")
    y = conv3x3_same(y.reshape(B, H, W, -1), params["w4"], params["b4"], "relu")
    out = conv3x3_same(y.reshape(B, H, W, -1), params["wo"], params["bo"],
                       "sigmoid", out_dtype=jnp.float32)           # (B, H*W, 768)

    nc_real = num_anchors * num_classes
    out = out[:, :, :nc_real]          # drop zero-padded output channels (720 real)
    # PyTorch: permute(0,2,3,1) -> view(B,H,W,A,C) -> view(B,-1,C).
    # NHWC output is already in that memory order.
    return out.reshape(B, H * W * num_anchors, num_classes)


# ----------------------------------------------------------------------------
# Pure-JAX reference (f32 lax conv) for the correctness check
# ----------------------------------------------------------------------------
def _ref_conv(x_nhwc, w, bias, act):
    y = lax.conv_general_dilated(
        x_nhwc, w, window_strides=(1, 1), padding="SAME",
        dimension_numbers=("NHWC", "HWIO", "NHWC"),
    ) + bias[None, None, None, :]
    if act == "relu":
        y = jnp.maximum(y, 0.0)
    else:
        y = jax.nn.sigmoid(y)
    return y


def _ref_forward(x_nchw, params, num_anchors, num_classes):
    x = jnp.transpose(x_nchw, (0, 2, 3, 1))
    out = _ref_conv(x, params["w1"], params["b1"], "relu")
    out = _ref_conv(out, params["w2"], params["b2"], "relu")
    out = _ref_conv(out, params["w3"], params["b3"], "relu")
    out = _ref_conv(out, params["w4"], params["b4"], "relu")
    out = _ref_conv(out, params["wo"], params["bo"], "sigmoid")
    b, h, w, _ = out.shape
    return out.reshape(b, h * w * num_anchors, num_classes)


# ----------------------------------------------------------------------------
# Deterministic parameter init (synthetic, not a checkpoint)
# ----------------------------------------------------------------------------
def init_params(key, num_features_in, feature_size, num_anchors, num_classes):
    dims = [
        (num_features_in, feature_size),             # conv1
        (feature_size, feature_size),                # conv2
        (feature_size, feature_size),                # conv3
        (feature_size, feature_size),                # conv4
        (feature_size, num_anchors * num_classes),   # output
    ]
    names = ["1", "2", "3", "4", "o"]
    params = {}
    for (cin, cout), n in zip(dims, names):
        key, kw, kb = jax.random.split(key, 3)
        params["w" + n] = jax.random.normal(kw, (3, 3, cin, cout), jnp.float32) * 0.05
        params["b" + n] = jax.random.normal(kb, (cout,), jnp.float32) * 0.01
    return params


if __name__ == "__main__":
    B, Cin, H, W = 2, 4, 16, 16
    feature_size = 32
    num_anchors, num_classes = 9, 80

    key = jax.random.PRNGKey(0)
    key, kx = jax.random.split(key)
    x = jax.random.normal(kx, (B, Cin, H, W), jnp.float32)   # NCHW, like PyTorch
    params = init_params(key, Cin, feature_size, num_anchors, num_classes)

    fwd = jax.jit(
        functools.partial(
            classification_model_forward,
            num_anchors=num_anchors,
            num_classes=num_classes,
        )
    )
    out = fwd(x, params)
    out = jax.block_until_ready(out)

    assert out.shape == (B, H * W * num_anchors, num_classes), out.shape

    ref = _ref_forward(x, params, num_anchors, num_classes)
    # bf16 matmuls with f32 accumulation vs an all-f32 reference -> loose tol.
    assert jnp.allclose(out, ref, rtol=2e-2, atol=2e-2), (
        float(jnp.max(jnp.abs(out - ref)))
    )

    print("KERNEL_OK")
</pallas_src>

<mosaic_0001>
module attributes {stable_mosaic.version = 11 : i64} {
  func.func @_conv3x3_kernel(%arg0: i32, %arg1: i32, %arg2: i32, %arg3: memref<1x18x18x128xbf16, #tpu.memory_space<vmem>>, %arg4: memref<1152x256xbf16, #tpu.memory_space<vmem>>, %arg5: memref<1x256xf32, #tpu.memory_space<vmem>>, %arg6: memref<1x128x256xf32, #tpu.memory_space<vmem>>) attributes {dimension_semantics = [#tpu.dimension_semantics<parallel>, #tpu.dimension_semantics<parallel>, #tpu.dimension_semantics<parallel>], iteration_bounds = array<i64: 2, 2, 3>, scalar_prefetch = 0 : i64, scratch_operands = 0 : i64, tpu.core_type = #tpu.core_type<tc>, window_params = [{transform_indices = @transform_0, window_bounds = array<i64: 1, 18, 18, 128>}, {transform_indices = @transform_1, window_bounds = array<i64: 1152, 256>}, {transform_indices = @transform_2, window_bounds = array<i64: 1, 256>}, {transform_indices = @transform_3, window_bounds = array<i64: 1, 128, 256>}]} {
    %c8_i32 = arith.constant 8 : i32
    %0 = arith.muli %arg1, %c8_i32 : i32
    %1 = tpu.assume_multiple %0, 8 : i32
    %c0 = arith.constant 0 : index
    %2 = arith.index_cast %1 : i32 to index
    %c0_0 = arith.constant 0 : index
    %c0_1 = arith.constant 0 : index
    %3 = vector.load %arg3[%c0, %2, %c0_0, %c0_1] : memref<1x18x18x128xbf16, #tpu.memory_space<vmem>>, vector<1x10x18x128xbf16>
    %4 = vector.shape_cast %3 : vector<1x10x18x128xbf16> to vector<10x18x128xbf16>
    %5 = vector.extract_strided_slice %4 {offsets = [0, 0, 0], sizes = [8, 16, 128], strides = [1, 1, 1]} : vector<10x18x128xbf16> to vector<8x16x128xbf16>
    %6 = vector.shape_cast %5 : vector<8x16x128xbf16> to vector<128x128xbf16>
    %7 = vector.extract_strided_slice %4 {offsets = [0, 1, 0], sizes = [8, 16, 128], strides = [1, 1, 1]} : vector<10x18x128xbf16> to vector<8x16x128xbf16>
    %8 = vector.shape_cast %7 : vector<8x16x128xbf16> to vector<128x128xbf16>
    %9 = vector.extract_strided_slice %4 {offsets = [0, 2, 0], sizes = [8, 16, 128], strides = [1, 1, 1]} : vector<10x18x128xbf16> to vector<8x16x128xbf16>
    %10 = vector.shape_cast %9 : vector<8x16x128xbf16> to vector<128x128xbf16>
    %11 = vector.extract_strided_slice %4 {offsets = [1, 0, 0], sizes = [8, 16, 128], strides = [1, 1, 1]} : vector<10x18x128xbf16> to vector<8x16x128xbf16>
    %12 = vector.shape_cast %11 : vector<8x16x128xbf16> to vector<128x128xbf16>
    %13 = vector.extract_strided_slice %4 {offsets = [1, 1, 0], sizes = [8, 16, 128], strides = [1, 1, 1]} : vector<10x18x128xbf16> to vector<8x16x128xbf16>
    %14 = vector.shape_cast %13 : vector<8x16x128xbf16> to vector<128x128xbf16>
    %15 = vector.extract_strided_slice %4 {offsets = [1, 2, 0], sizes = [8, 16, 128], strides = [1, 1, 1]} : vector<10x18x128xbf16> to vector<8x16x128xbf16>
    %16 = vector.shape_cast %15 : vector<8x16x128xbf16> to vector<128x128xbf16>
    %17 = vector.extract_strided_slice %4 {offsets = [2, 0, 0], sizes = [8, 16, 128], strides = [1, 1, 1]} : vector<10x18x128xbf16> to vector<8x16x128xbf16>
    %18 = vector.shape_cast %17 : vector<8x16x128xbf16> to vector<128x128xbf16>
    %19 = vector.extract_strided_slice %4 {offsets = [2, 1, 0], sizes = [8, 16, 128], strides = [1, 1, 1]} : vector<10x18x128xbf16> to vector<8x16x128xbf16>
    %20 = vector.shape_cast %19 : vector<8x16x128xbf16> to vector<128x128xbf16>
    %21 = vector.extract_strided_slice %4 {offsets = [2, 2, 0], sizes = [8, 16, 128], strides = [1, 1, 1]} : vector<10x18x128xbf16> to vector<8x16x128xbf16>
    %22 = vector.shape_cast %21 : vector<8x16x128xbf16> to vector<128x128xbf16>
    %23 = tpu.concatenate %6, %8, %10, %12, %14, %16, %18, %20, %22 in 1 : vector<128x128xbf16>, vector<128x128xbf16>, vector<128x128xbf16>, vector<128x128xbf16>, vector<128x128xbf16>, vector<128x128xbf16>, vector<128x128xbf16>, vector<128x128xbf16>, vector<128x128xbf16> -> vector<128x1152xbf16>
    %c0_2 = arith.constant 0 : index
    %c0_3 = arith.constant 0 : index
    %24 = vector.load %arg4[%c0_2, %c0_3] : memref<1152x256xbf16, #tpu.memory_space<vmem>>, vector<1152x256xbf16>
    %cst = arith.constant dense<0.000000e+00> : vector<128x256xf32>
    %25 = tpu.matmul %23, %24, %cst {dimension_numbers = #tpu.dot_dimension_numbers<[1], [0], [0], [1], [0, 0, 1, 1], [], []>} : vector<128x1152xbf16>, vector<1152x256xbf16>, vector<128x256xf32> -> vector<128x256xf32>
    %c0_4 = arith.constant 0 : index
    %c0_5 = arith.constant 0 : index
    %26 = vector.load %arg5[%c0_4, %c0_5] : memref<1x256xf32, #tpu.memory_space<vmem>>, vector<1x256xf32>
    %27 = vector.broadcast %26 : vector<1x256xf32> to vector<128x256xf32>
    %28 = arith.addf %25, %27 : vector<128x256xf32>
    %29 = arith.negf %28 : vector<128x256xf32>
    %30 = math.exp %29 : vector<128x256xf32>
    %cst_6 = arith.constant 1.000000e+00 : f32
    %31 = vector.broadcast %cst_6 : f32 to vector<128x256xf32>
    %32 = arith.addf %31, %30 : vector<128x256xf32>
    %33 = arith.divf %31, %32 : vector<128x256xf32>
    %c0_7 = arith.constant 0 : index
    %c0_8 = arith.constant 0 : index
    %c0_9 = arith.constant 0 : index
    %34 = vector.load %arg6[%c0_7, %c0_8, %c0_9] : memref<1x128x256xf32, #tpu.memory_space<vmem>>, vector<1x128x256xf32>
    %35 = vector.shape_cast %34 : vector<1x128x256xf32> to vector<128x256xf32>
    %36 = vector.shape_cast %33 : vector<128x256xf32> to vector<1x128x256xf32>
    tpu.vector_store %arg6[%c0_7, %c0_8, %c0_9], %36 {strides = array<i32>} : memref<1x128x256xf32, #tpu.memory_space<vmem>>, vector<1x128x256xf32>,
    return
  }
  func.func @transform_0(%arg0: i32, %arg1: i32, %arg2: i32) -> (i32, i32, i32, i32) {
    %c0_i32 = arith.constant 0 : i32
    %c0_i32_0 = arith.constant 0 : i32
    %c0_i32_1 = arith.constant 0 : i32
    %c0_i32_2 = arith.constant 0 : i32
    return %arg0, %c0_i32, %c0_i32_0, %c0_i32_1 : i32, i32, i32, i32
  }
  func.func @transform_1(%arg0: i32, %arg1: i32, %arg2: i32) -> (i32, i32) {
    %c0_i32 = arith.constant 0 : i32
    %c0_i32_0 = arith.constant 0 : i32
    return %c0_i32, %arg2 : i32, i32
  }
  func.func @transform_2(%arg0: i32, %arg1: i32, %arg2: i32) -> (i32, i32) {
    %c0_i32 = arith.constant 0 : i32
    %c0_i32_0 = arith.constant 0 : i32
    return %c0_i32, %arg2 : i32, i32
  }
  func.func @transform_3(%arg0: i32, %arg1: i32, %arg2: i32) -> (i32, i32, i32) {
    %c0_i32 = arith.constant 0 : i32
    return %arg0, %arg1, %arg2 : i32, i32, i32
  }
}

module attributes {stable_mosaic.version = 11 : i64} {
  func.func @_conv3x3_kernel(%arg0: i32, %arg1: i32, %arg2: i32, %arg3: memref<1x18x18x128xbf16, #tpu.memory_space<vmem>>, %arg4: memref<1152x128xbf16, #tpu.memory_space<vmem>>, %arg5: memref<1x128xf32, #tpu.memory_space<vmem>>, %arg6: memref<1x128x128xbf16, #tpu.memory_space<vmem>>) attributes {dimension_semantics = [#tpu.dimension_semantics<parallel>, #tpu.dimension_semantics<parallel>, #tpu.dimension_semantics<parallel>], iteration_bounds = array<i64: 2, 2, 1>, scalar_prefetch = 0 : i64, scratch_operands = 0 : i64, tpu.core_type = #tpu.core_type<tc>, window_params = [{transform_indices = @transform_0, window_bounds = array<i64: 1, 18, 18, 128>}, {transform_indices = @transform_1, window_bounds = array<i64: 1152, 128>}, {transform_indices = @transform_2, window_bounds = array<i64: 1, 128>}, {transform_indices = @transform_3, window_bounds = array<i64: 1, 128, 128>}]} {
    %c8_i32 = arith.constant 8 : i32
    %0 = arith.muli %arg1, %c8_i32 : i32
    %1 = tpu.assume_multiple %0, 8 : i32
    %c0 = arith.constant 0 : index
    %2 = arith.index_cast %1 : i32 to index
    %c0_0 = arith.constant 0 : index
    %c0_1 = arith.constant 0 : index
    %3 = vector.load %arg3[%c0, %2, %c0_0, %c0_1] : memref<1x18x18x128xbf16, #tpu.memory_space<vmem>>, vector<1x10x18x128xbf16>
    %4 = vector.shape_cast %3 : vector<1x10x18x128xbf16> to vector<10x18x128xbf16>
    %5 = vector.extract_strided_slice %4 {offsets = [0, 0, 0], sizes = [8, 16, 128], strides = [1, 1, 1]} : vector<10x18x128xbf16> to vector<8x16x128xbf16>
    %6 = vector.shape_cast %5 : vector<8x16x128xbf16> to vector<128x128xbf16>
    %7 = vector.extract_strided_slice %4 {offsets = [0, 1, 0], sizes = [8, 16, 128], strides = [1, 1, 1]} : vector<10x18x128xbf16> to vector<8x16x128xbf16>
    %8 = vector.shape_cast %7 : vector<8x16x128xbf16> to vector<128x128xbf16>
    %9 = vector.extract_strided_slice %4 {offsets = [0, 2, 0], sizes = [8, 16, 128], strides = [1, 1, 1]} : vector<10x18x128xbf16> to vector<8x16x128xbf16>
    %10 = vector.shape_cast %9 : vector<8x16x128xbf16> to vector<128x128xbf16>
    %11 = vector.extract_strided_slice %4 {offsets = [1, 0, 0], sizes = [8, 16, 128], strides = [1, 1, 1]} : vector<10x18x128xbf16> to vector<8x16x128xbf16>
    %12 = vector.shape_cast %11 : vector<8x16x128xbf16> to vector<128x128xbf16>
    %13 = vector.extract_strided_slice %4 {offsets = [1, 1, 0], sizes = [8, 16, 128], strides = [1, 1, 1]} : vector<10x18x128xbf16> to vector<8x16x128xbf16>
    %14 = vector.shape_cast %13 : vector<8x16x128xbf16> to vector<128x128xbf16>
    %15 = vector.extract_strided_slice %4 {offsets = [1, 2, 0], sizes = [8, 16, 128], strides = [1, 1, 1]} : vector<10x18x128xbf16> to vector<8x16x128xbf16>
    %16 = vector.shape_cast %15 : vector<8x16x128xbf16> to vector<128x128xbf16>
    %17 = vector.extract_strided_slice %4 {offsets = [2, 0, 0], sizes = [8, 16, 128], strides = [1, 1, 1]} : vector<10x18x128xbf16> to vector<8x16x128xbf16>
    %18 = vector.shape_cast %17 : vector<8x16x128xbf16> to vector<128x128xbf16>
    %19 = vector.extract_strided_slice %4 {offsets = [2, 1, 0], sizes = [8, 16, 128], strides = [1, 1, 1]} : vector<10x18x128xbf16> to vector<8x16x128xbf16>
    %20 = vector.shape_cast %19 : vector<8x16x128xbf16> to vector<128x128xbf16>
    %21 = vector.extract_strided_slice %4 {offsets = [2, 2, 0], sizes = [8, 16, 128], strides = [1, 1, 1]} : vector<10x18x128xbf16> to vector<8x16x128xbf16>
    %22 = vector.shape_cast %21 : vector<8x16x128xbf16> to vector<128x128xbf16>
    %23 = tpu.concatenate %6, %8, %10, %12, %14, %16, %18, %20, %22 in 1 : vector<128x128xbf16>, vector<128x128xbf16>, vector<128x128xbf16>, vector<128x128xbf16>, vector<128x128xbf16>, vector<128x128xbf16>, vector<128x128xbf16>, vector<128x128xbf16>, vector<128x128xbf16> -> vector<128x1152xbf16>
    %c0_2 = arith.constant 0 : index
    %c0_3 = arith.constant 0 : index
    %24 = vector.load %arg4[%c0_2, %c0_3] : memref<1152x128xbf16, #tpu.memory_space<vmem>>, vector<1152x128xbf16>
    %cst = arith.constant dense<0.000000e+00> : vector<128x128xf32>
    %25 = tpu.matmul %23, %24, %cst {dimension_numbers = #tpu.dot_dimension_numbers<[1], [0], [0], [1], [0, 0, 1, 1], [], []>} : vector<128x1152xbf16>, vector<1152x128xbf16>, vector<128x128xf32> -> vector<128x128xf32>
    %c0_4 = arith.constant 0 : index
    %c0_5 = arith.constant 0 : index
    %26 = vector.load %arg5[%c0_4, %c0_5] : memref<1x128xf32, #tpu.memory_space<vmem>>, vector<1x128xf32>
    %27 = vector.broadcast %26 : vector<1x128xf32> to vector<128x128xf32>
    %28 = arith.addf %25, %27 : vector<128x128xf32>
    %cst_6 = arith.constant 0.000000e+00 : f32
    %29 = vector.broadcast %cst_6 : f32 to vector<128x128xf32>
    %30 = arith.maximumf %28, %29 : vector<128x128xf32>
    %31 = arith.truncf %30 : vector<128x128xf32> to vector<128x128xbf16>
    %c0_7 = arith.constant 0 : index
    %c0_8 = arith.constant 0 : index
    %c0_9 = arith.constant 0 : index
    %32 = vector.load %arg6[%c0_7, %c0_8, %c0_9] : memref<1x128x128xbf16, #tpu.memory_space<vmem>>, vector<1x128x128xbf16>
    %33 = vector.shape_cast %32 : vector<1x128x128xbf16> to vector<128x128xbf16>
    %34 = vector.shape_cast %31 : vector<128x128xbf16> to vector<1x128x128xbf16>
    tpu.vector_store %arg6[%c0_7, %c0_8, %c0_9], %34 {strides = array<i32>} : memref<1x128x128xbf16, #tpu.memory_space<vmem>>, vector<1x128x128xbf16>,
    return
  }
  func.func @transform_0(%arg0: i32, %arg1: i32, %arg2: i32) -> (i32, i32, i32, i32) {
    %c0_i32 = arith.constant 0 : i32
    %c0_i32_0 = arith.constant 0 : i32
    %c0_i32_1 = arith.constant 0 : i32
    %c0_i32_2 = arith.constant 0 : i32
    return %arg0, %c0_i32, %c0_i32_0, %c0_i32_1 : i32, i32, i32, i32
  }
  func.func @transform_1(%arg0: i32, %arg1: i32, %arg2: i32) -> (i32, i32) {
    %c0_i32 = arith.constant 0 : i32
    %c0_i32_0 = arith.constant 0 : i32
    return %c0_i32, %arg2 : i32, i32
  }
  func.func @transform_2(%arg0: i32, %arg1: i32, %arg2: i32) -> (i32, i32) {
    %c0_i32 = arith.constant 0 : i32
    %c0_i32_0 = arith.constant 0 : i32
    return %c0_i32, %arg2 : i32, i32
  }
  func.func @transform_3(%arg0: i32, %arg1: i32, %arg2: i32) -> (i32, i32, i32) {
    %c0_i32 = arith.constant 0 : i32
    return %arg0, %arg1, %arg2 : i32, i32, i32
  }
}

</mosaic_0001>

<bundles_post_ra>
// kernel: classification_model_forward.5
= control target key start
LH: loop header
LB: loop body
LE: loop exit
PB: predicated region body
PF: predicated region fallthrough
CT: control target
= control target key end

     0   :  { %s2743_s12 = smov 0   ;;  %s2745_s13 = smov 0   ;;  %s3525_s0 = inlined_call_operand.vmem [shape: bf16[2,18,18,128], index: 0, kind: input, shape index: {}]   ;;  %s3526_s1 = inlined_call_operand.vmem [shape: bf16[1152,128], index: 1, kind: input, shape index: {}]   ;;  %s3527_s2 = inlined_call_operand.vmem [shape: f32[1,128], index: 2, kind: input, shape index: {}]   ;;  %s3528_s3 = inlined_call_operand.vmem [shape: bf16[2,256,128], index: 3, kind: output, shape index: {}]  }
   0x1   :  { %s2747_s14 = smov 0   ;;  %s2749_s15 = smov 0  }
   0x2   :  { %s2751_s16 = smov 0  }
   0x3 LB: > { %s28_s17 = sadd.s32 1, %s2713_s14  ;;  %s32_s18 = sadd.s32 1, %s2717_s15  ;;  %s2721_s16 = sphi %s2751_s16, %s13_s16   ;;  %s2717_s15 = sphi %s2749_s15, %s3565_s15   ;;  %s2713_s14 = sphi %s2747_s14, %s3564_s14   ;;  %s2709_s13 = sphi %s2745_s13, %s3563_s13   ;;  %s2705_s12 = sphi %s2743_s12, %s3562_s12  }
   0x4   : > { %p30_p0 = scmp.ge.s32.totalorder %s28_s17, 2  ;;  %p2037_p1 = scmp.ge.s32.totalorder %s2721_s16, 1 }
   0x5   : > { %p177_p2 = scmp.lt.s32.totalorder %s2721_s16, 5 }
   0x6   : > { %s3567_s17 = smov (%p30_p0, %s28_s17), 0  ;;  %s3569_s18 = smov (!%p30_p0, %s32_s18), %s2717_s15 }
   0x7   : > { %p178_p3 = pnand %p2037_p1, %p177_p2  ;;  %p34_p4 = scmp.ge.s32.totalorder %s3569_s18, 2 }
   0x9   : > { %s3571_s18 = smov (%p34_p4, %s3569_s18), 0  ;;  %181 = sbr.rel (%p178_p3) target bundleno = 391 (0x187), region = 32 }
   0xe   : > { %v2601_v0 = vld [vmem:[%s3526_s1 + $0x78] sm:$0xff]   ;;  %v2605_v4 = vld [vmem:[%s3526_s1 + $0x70] sm:$0xff]   ;;  %v2609_v8 = vld [vmem:[%s3526_s1 + $0x68] sm:$0xff]   ;;  %p215_p5 = scmp.lt.s32.totalorder %s2709_s13, 1  ;;  %s2176_s5 = smul.u32 96, %s2705_s12  ;;  %vm494_vm0 = vcmask 1042432  }
   0xf   : > { %v2602_v1 = vld [vmem:[%s3526_s1 + $0xf8] sm:$0xff]   ;;  %2240 = vmatprep.subr.bf16.mxu0 %v2601_v0  ;;  %v2606_v5 = vld [vmem:[%s3526_s1 + $0xf0] sm:$0xff]   ;;  %v2610_v9 = vld [vmem:[%s3526_s1 + $0xe8] sm:$0xff]   ;;  %vm495_vm1 = vcmask 1046532   ;;  %vm275_vm2 = vsmask.f32 3328 }
  0x10   : > { %v2603_v2 = vld [vmem:[%s3526_s1 + $0x38] sm:$0xff]   ;;  %2304 = vmatprep.subr.bf16.mxu1 %v2602_v1  ;;  %v2607_v6 = vld [vmem:[%s3526_s1 + $0x30] sm:$0xff]   ;;  %v2611_v10 = vld [vmem:[%s3526_s1 + $0x28] sm:$0xff]   ;;  %s3573_s13 = smov (!%p215_p5, %s2709_s13), 1  ;;  %vm276_vm3 = vsmask.f32 7440 }
  0x11   : > { %v2604_v3 = vld [vmem:[%s3526_s1 + $0xb8] sm:$0xff]   ;;  %2241 = vmatpush3.bf16.msra.mxu0 %v2603_v2  ;;  %v2608_v7 = vld [vmem:[%s3526_s1 + $0xb0] sm:$0xff]   ;;  %v2612_v11 = vld [vmem:[%s3526_s1 + $0xa8] sm:$0xff]   ;;  %s2560_s25 = smul.u32 216, %s3573_s13  ;;  %s2039_s7 = sshll.u32 %s2705_s12, 4 }
  0x12   : > { %2305 = vmatpush3.bf16.msra.mxu1 %v2604_v3  ;;  %2242 = vmatprep.subr.bf16.mxu0 %v2605_v4  ;;  %v2613_v12 = vld [vmem:[%s3526_s1 + $0x60] sm:$0xff]   ;;  %v2617_v16 = vld [vmem:[%s3526_s1 + $0x58] sm:$0xff]   ;;  %v2621_v20 = vld [vmem:[%s3526_s1 + $0x50] sm:$0xff]   ;;  %p3449_p6 = scmp.lt.s32.totalorder %s2039_s7, 31  ;;  %s2040_s9 = sshll.u32 %s3573_s13, 5 }
  0x13   : > { %2306 = vmatprep.subr.bf16.mxu1 %v2606_v5  ;;  %v2614_v13 = vld [vmem:[%s3526_s1 + $0xe0] sm:$0xff]   ;;  %v2618_v17 = vld [vmem:[%s3526_s1 + $0xd8] sm:$0xff]   ;;  %v2622_v21 = vld [vmem:[%s3526_s1 + $0xd0] sm:$0xff]   ;;  %s219_s10 = scalar_lea.vmem %s3525_s0, %s2560_s25 }
  0x14   : > { %v2615_v14 = vld [vmem:[%s3526_s1 + $0x20] sm:$0xff]   ;;  %v2619_v18 = vld [vmem:[%s3526_s1 + $0x18] sm:$0xff]   ;;  %v2623_v22 = vld [vmem:[%s3526_s1 + $0x10] sm:$0xff]   ;;  %s2876_s24 = scalar_lea.vmem %s219_s10, %s2176_s5  ;;  %s3575_s7 = smov (!%p3449_p6, %s2039_s7), 31 }
  0x15   : > { %2243 = vmatpush3.bf16.msra.mxu0 %v2607_v6  ;;  %v2616_v15 = vld [vmem:[%s3526_s1 + $0xa0] sm:$0xff]   ;;  %v2620_v19 = vld [vmem:[%s3526_s1 + $0x98] sm:$0xff]   ;;  %v2624_v23 = vld [vmem:[%s3526_s1 + $0x90] sm:$0xff]   ;;  %s3480_s12 = sadd.s32 %s2040_s9, %s3575_s7 }
  0x16   : > { %2307 = vmatpush3.bf16.msra.mxu1 %v2608_v7  ;;  %2244 = vmatprep.subr.bf16.mxu0 %v2609_v8  ;;  %v2625_v24 = vld [vmem:[%s3526_s1 + $0x48] sm:$0xff]   ;;  %v2629_v28 = vld [vmem:[%s3526_s1 + $0x40] sm:$0xff]   ;;  %v2899_v43 = vld [vmem:[%s2876_s24 + $0x10] sm:$0xf]  ;;  %s2041_s13 = sshll.u32 %s3480_s12, 2 }
  0x17   : > { %2308 = vmatprep.subr.bf16.mxu1 %v2610_v9  ;;  %v2626_v25 = vld [vmem:[%s3526_s1 + $0xc8] sm:$0xff]   ;;  %v2630_v29 = vld [vmem:[%s3526_s1 + $0xc0] sm:$0xff]   ;;  %v312_v49 = vshll.u32 %v2899_v43, 16  ;;  %vm2906_vm4 = vmor %vm494_vm0, %vm495_vm1  ;;  %v316_v55 = vshrl.u32 %v2899_v43, 16  ;;  %s3495_s19 = scalar_lea.vmem %s3528_s3, %s2041_s13 }
  0x18   : > { %v2627_v26 = vld [vmem:[%s3526_s1 + $0x8] sm:$0xff]   ;;  %v2631_v30 = vld [vmem:[%s3526_s1] sm:$0xff]   ;;  %vm2912_vm5 = vmor %vm275_vm2, %vm276_vm3 }
  0x19   : > { %2245 = vmatpush3.bf16.msra.mxu0 %v2611_v10  ;;  %v2628_v27 = vld [vmem:[%s3526_s1 + $0x88] sm:$0xff]   ;;  %v2632_v31 = vld [vmem:[%s3526_s1 + $0x80] sm:$0xff]   ;;  %v2635_v56 = vld [vmem:[%s3526_s1 + $0x178] sm:$0xff]   ;;  %v318_v2 = vrot.slane %v316_v55, 4 }
  0x1a   : > { %2309 = vmatpush3.bf16.msra.mxu1 %v2612_v11  ;;  %2246 = vmatprep.subr.bf16.mxu0 %v2613_v12  ;;  %v2885_v32 = vld [vmem:[%s2876_s24] sm:$0xf]  ;;  %v2888_v33 = vld [vmem:[%s2876_s24 + $0x4] sm:$0xf]  ;;  %v247_v34 = vld [vmem:[%s2876_s24 + $0x8] sm:$0x1] }
  0x1b   : > { %2310 = vmatprep.subr.bf16.mxu1 %v2614_v13  ;;  %v279_v35 = vshrl.u32 %v2885_v32, 16  ;;  %v282_v36 = vshll.u32 %v2885_v32, 16  ;;  %v288_v37 = vshll.u32 %v2888_v33, 16  ;;  %v292_v38 = vshrl.u32 %v2888_v33, 16  ;;  %v2896_v40 = vld [vmem:[%s2876_s24 + $0xc] sm:$0xf] }
  0x1c   : > { %v298_v39 = vshll.u32 %v247_v34, 16  ;;  %v303_v44 = vshrl.u32 %v2896_v40, 16  ;;  %v306_v45 = vshll.u32 %v2896_v40, 16  ;;  %v2922_v58 = vcombine.low %v2896_v40, %v2899_v43  ;;  %v2636_v60 = vld [vmem:[%s3526_s1 + $0x1f8] sm:$0xff]   ;;  %v250_v8 = vld [vmem:[%s2876_s24 + $0x14] sm:$0x1] }
  0x1d   : > { %2247 = vmatpush3.bf16.msra.mxu0 %v2615_v14  ;;  %v281_v41 = vrot.slane %v279_v35, 4  ;;  %v284_v42 = vrot.slane %v282_v36, 5  ;;  %v290_v46 = vrot.slane %v288_v37, 5  ;;  %v294_v47 = vrot.slane %v292_v38, 4  ;;  %v2637_v6 = vld [vmem:[%s3526_s1 + $0x138] sm:$0xff]  }
  0x1e   : > { %2311 = vmatpush3.bf16.msra.mxu1 %v2616_v15  ;;  %2248 = vmatprep.subr.bf16.mxu0 %v2617_v16  ;;  %v300_v48 = vrot.slane %v298_v39, 5  ;;  %v305_v53 = vrot.slane %v303_v44, 4  ;;  %v308_v54 = vrot.slane %v306_v45, 5  ;;  %v2045_v59 = vrot.slane %v2885_v32, 9  ;;  %v2638_v7 = vld [vmem:[%s3526_s1 + $0x1b8] sm:$0xff]  }
  0x1f   : > { %2312 = vmatprep.subr.bf16.mxu1 %v2618_v17  ;;  %v285_v52 = vor.u32 %v284_v42, %v281_v41  ;;  %v295_v57 = vor.u32 %v294_v47, %v290_v46  ;;  %v502_v62 = vrot.slane %v247_v34, 5  ;;  %v499_v63 = vrot.slane %v2888_v33, 5  ;;  %1453 = vmatprep.mubr.bf16.mxu1 %v2922_v58  ;;  %v2946_v14 = vld [vmem:[%s2876_s24 + $0x18] sm:$0xf]  ;;  %v2949_v15 = vld [vmem:[%s2876_s24 + $0x1c] sm:$0xf] }
  0x20   : > { %v309_v0 = vor.u32 %v308_v54, %v305_v53  ;;  %v2055_v11 = vcombine.low %v2885_v32, %v2888_v33  ;;  %v314_v12 = vrot.slane %v312_v49, 5  ;;  %v322_v13 = vshll.u32 %v250_v8, 16  ;;  %v2642_v32 = vld [vmem:[%s3526_s1 + $0x130] sm:$0xff]   ;;  %v253_v38 = vld [vmem:[%s2876_s24 + $0x20] sm:$0x1]  ;;  %v2645_v42 = vld [vmem:[%s3526_s1 + $0x168] sm:$0xff]  }
  0x21   : > { %2249 = vmatpush3.bf16.msra.mxu0 %v2619_v18  ;;  %v286_v61 = vrot.slane %v285_v52, 4  ;;  %v296_v1 = vrot.slane %v295_v57, 4  ;;  %v500_v4 = vsel %vm2906_vm4, %v2045_v59, %v499_v63  ;;  %v501_v5 = vrot.slane %v499_v63, 4  ;;  %v2643_v33 = vld [vmem:[%s3526_s1 + $0x1b0] sm:$0xff]   ;;  %v2994_v47 = vld [vmem:[%s2876_s24 + $0x28] sm:$0xf] }
  0x22   : > { %2313 = vmatpush3.bf16.msra.mxu1 %v2620_v19  ;;  %2250 = vmatprep.subr.bf16.mxu0 %v2621_v20  ;;  %v310_v9 = vrot.slane %v309_v0, 4  ;;  %v327_v18 = vshrl.u32 %v2946_v14, 16  ;;  %v330_v19 = vshll.u32 %v2946_v14, 16  ;;  %v346_v45 = vshll.u32 %v253_v38, 16 }
  0x23   : > { %2314 = vmatprep.subr.bf16.mxu1 %v2622_v21  ;;  %v291_v3 = vsel %vm2912_vm5, %v286_v61, %v290_v46  ;;  %v301_v10 = vsel %vm2912_vm5, %v296_v1, %v300_v48  ;;  %v503_v17 = vsel %vm2906_vm4, %v501_v5, %v502_v62  ;;  %v319_v21 = vor.u32 %v318_v2, %v314_v12  ;;  %v2991_v46 = vld [vmem:[%s2876_s24 + $0x24] sm:$0xf]  ;;  %v2647_v1 = vld [vmem:[%s3526_s1 + $0x128] sm:$0xff]  }
  0x24   : > { %v2063_v16 = vcombine.low %v291_v3, %v301_v10  ;;  %v2071_v20 = vcombine.low %v500_v4, %v503_v17  ;;  %v329_v36 = vrot.slane %v327_v18, 4  ;;  %v332_v39 = vrot.slane %v330_v19, 5 }
  0x25   : > { %2251 = vmatpush3.bf16.msra.mxu0 %v2623_v22  ;;  %v324_v22 = vrot.slane %v322_v13, 5  ;;  %v2047_v48 = vrot.slane %v2946_v14, 9  ;;  %v351_v54 = vshrl.u32 %v2991_v46, 16  ;;  %v348_v55 = vrot.slane %v346_v45, 5 }
  0x26   : > { %2315 = vmatpush3.bf16.msra.mxu1 %v2624_v23  ;;  %2252 = vmatprep.subr.bf16.mxu0 %v2625_v24  ;;  %v2640_v23 = vld [vmem:[%s3526_s1 + $0x170] sm:$0xff]   ;;  %v340_v24 = vshrl.u32 %v2949_v15, 16  ;;  %v333_v52 = vor.u32 %v332_v39, %v329_v36  ;;  %v364_v57 = vshrl.u32 %v2994_v47, 16  ;;  %v3005_v59 = vcombine.low %v2991_v46, %v2994_v47  ;;  %v2655_v39 = vld [vmem:[%s3526_s1 + $0x158] sm:$0xff]  }
  0x27   : > { %2316 = vmatprep.subr.bf16.mxu1 %v2626_v25  ;;  %1356 = vmatprep.mubr.bf16.mxu0 %v2063_v16  ;;  %v2961_v25 = vcombine.low %v2946_v14, %v2949_v15  ;;  %v513_v63 = vrot.slane %v2949_v15, 5  ;;  %v516_v0 = vrot.slane %v253_v38, 5  ;;  %v360_v10 = vshll.u32 %v2994_v47, 16  ;;  %v3037_v16 = vld [vmem:[%s2876_s24 + $0x34] sm:$0xf]  ;;  %v2653_v38 = vld [vmem:[%s3526_s1 + $0x1a0] sm:$0xff]  }
  0x28   : > { %v342_v41 = vrot.slane %v340_v24, 4  ;;  %v334_v61 = vrot.slane %v333_v52, 4  ;;  %v2048_v17 = vrot.slane %v2991_v46, 9  ;;  %v3079_v52 = vld [vmem:[%s2876_s24 + $0x3c] sm:$0xf] }
  0x29   : > { %2253 = vmatpush3.bf16.msra.mxu0 %v2627_v26  ;;  %v2046_v26 = vrot.slane %v2896_v40, 9  ;;  %v336_v40 = vshll.u32 %v2949_v15, 16  ;;  %v514_v4 = vsel %vm2906_vm4, %v2047_v48, %v513_v63  ;;  %v515_v5 = vrot.slane %v513_v63, 4  ;;  %v3034_v15 = vld [vmem:[%s2876_s24 + $0x30] sm:$0xf] }
  0x2a   : > { %2317 = vmatpush3.bf16.msra.mxu1 %v2628_v27  ;;  %2254 = vmatprep.subr.bf16.mxu0 %v2629_v28  ;;  %v506_v27 = vrot.slane %v2899_v43, 5  ;;  %v2641_v28 = vld [vmem:[%s3526_s1 + $0x1f0] sm:$0xff]   ;;  %v375_v24 = vshrl.u32 %v3034_v15, 16  ;;  %v402_v63 = vshll.u32 %v3079_v52, 16 }
  0x2b   : > { %2318 = vmatprep.subr.bf16.mxu1 %v2630_v29  ;;  %v315_v29 = vsel %vm2912_vm5, %v310_v9, %v314_v12  ;;  %v338_v53 = vrot.slane %v336_v40, 5  ;;  %v517_v13 = vsel %vm2906_vm4, %v515_v5, %v516_v0  ;;  %v259_v40 = vld [vmem:[%s2876_s24 + $0x38] sm:$0x1] }
  0x2c   : > { %v507_v34 = vsel %vm2906_vm4, %v2046_v26, %v506_v27  ;;  %v508_v35 = vrot.slane %v506_v27, 4  ;;  %v3042_v19 = vcombine.low %v514_v4, %v517_v13  ;;  %v378_v26 = vshll.u32 %v3034_v15, 16 }
  0x2d   : > { %2255 = vmatpush3.bf16.msra.mxu0 %v2631_v30  ;;  %v320_v30 = vrot.slane %v319_v21, 4  ;;  %v343_v62 = vor.u32 %v342_v41, %v338_v53  ;;  %v339_v2 = vsel %vm2912_vm5, %v334_v61, %v338_v53  ;;  %v362_v21 = vrot.slane %v360_v10, 5  ;;  %v3082_v53 = vld [vmem:[%s2876_s24 + $0x40] sm:$0xf]  ;;  %v2658_v10 = vld [vmem:[%s3526_s1 + $0x198] sm:$0xff]  }
  0x2e   : > { %2319 = vmatpush3.bf16.msra.mxu1 %v2632_v31  ;;  %2368 = vmatprep.subr.bf16.mxu0 %v2635_v56  ;;  %v509_v31 = vrot.slane %v250_v8, 5  ;;  %v354_v56 = vshll.u32 %v2991_v46, 16  ;;  %v353_v8 = vrot.slane %v351_v54, 4  ;;  %v388_v27 = vshrl.u32 %v3037_v16, 16 }
  0x2f   : > { %2432 = vmatprep.subr.bf16.mxu1 %v2636_v60  ;;  %v325_v37 = vsel %vm2912_vm5, %v320_v30, %v324_v22  ;;  %v2646_v60 = vld [vmem:[%s3526_s1 + $0x1e8] sm:$0xff]   ;;  %v344_v3 = vrot.slane %v343_v62, 4  ;;  %v2651_v22 = vld [vmem:[%s3526_s1 + $0x1e0] sm:$0xff]   ;;  %v3053_v30 = vcombine.low %v3034_v15, %v3037_v16  ;;  %v377_v41 = vrot.slane %v375_v24, 4 }
  0x30   : > { %1357 = vmatmul.mubr.bf16.vlgmr.msra.gmra.mxu0 %v2055_v11  ;;  %v2986_v43 = vcombine.low %v315_v29, %v325_v37  ;;  %v510_v44 = vsel %vm2906_vm4, %v508_v35, %v509_v31  ;;  %v356_v9 = vrot.slane %v354_v56, 5  ;;  %v366_v11 = vrot.slane %v364_v57, 4 }
  0x31   : > { %1454 = vmatmul.mubr.bf16.vlgmr.msra.gmra.mxu1 %v2071_v20  ;;  %2369 = vmatpush3.bf16.msra.mxu0 %v2637_v6  ;;  %v2997_v49 = vcombine.low %v507_v34, %v510_v44  ;;  %v2648_v6 = vld [vmem:[%s3526_s1 + $0x1a8] sm:$0xff]   ;;  %v349_v12 = vsel %vm2912_vm5, %v344_v3, %v348_v55  ;;  %v520_v31 = vrot.slane %v2994_v47, 5  ;;  %v384_v44 = vshll.u32 %v3037_v16, 16 }
  0x32   : > { %2433 = vmatpush3.bf16.msra.mxu1 %v2638_v7  ;;  %1461 = vmatprep.mubr.bf16.mxu1 %v2961_v25  ;;  %v256_v7 = vld [vmem:[%s2876_s24 + $0x2c] sm:$0x1]  ;;  %v3040_v18 = vcombine.low %v339_v2, %v349_v12  ;;  %v357_v20 = vor.u32 %v356_v9, %v353_v8  ;;  %v367_v29 = vor.u32 %v366_v11, %v362_v21  ;;  %v390_v45 = vrot.slane %v388_v27, 4  ;;  %v2660_v11 = vld [vmem:[%s3526_s1 + $0x150] sm:$0xff]   ;;  %v262_v12 = vld [vmem:[%s2876_s24 + $0x44] sm:$0x1] }
  0x33   : > { %2370 = vmatprep.subr.bf16.mxu0 %v2640_v23  ;;  %2434 = vmatprep.subr.bf16.mxu1 %v2641_v28  ;;  %v370_v14 = vshll.u32 %v256_v7, 16  ;;  %v521_v36 = vsel %vm2906_vm4, %v2048_v17, %v520_v31  ;;  %v522_v37 = vrot.slane %v520_v31, 4  ;;  %v394_v48 = vshll.u32 %v259_v40, 16  ;;  %v2661_v31 = vld [vmem:[%s3526_s1 + $0x1d0] sm:$0xff]  }
  0x34   : > { %1364 = vmatprep.mubr.bf16.mxu0 %v2986_v43  ;;  %v358_v28 = vrot.slane %v357_v20, 4  ;;  %v368_v35 = vrot.slane %v367_v29, 4  ;;  %v2049_v54 = vrot.slane %v3034_v15, 9  ;;  %v386_v57 = vrot.slane %v384_v44, 5 }
  0x35   : > { %2371 = vmatpush3.bf16.msra.mxu0 %v2642_v32  ;;  %v372_v23 = vrot.slane %v370_v14, 5  ;;  %v523_v32 = vrot.slane %v256_v7, 5  ;;  %v396_v61 = vrot.slane %v394_v48, 5  ;;  %v399_v62 = vshrl.u32 %v3079_v52, 16  ;;  %v2665_v48 = vld [vmem:[%s3526_s1 + $0x148] sm:$0xff]  }
  0x36   : > { %2435 = vmatpush3.bf16.msra.mxu1 %v2643_v33  ;;  %2372 = vmatprep.subr.bf16.mxu0 %v2645_v42  ;;  %v2652_v33 = vld [vmem:[%s3526_s1 + $0x120] sm:$0xff]   ;;  %v363_v34 = vsel %vm2912_vm5, %v358_v28, %v362_v21  ;;  %v380_v42 = vrot.slane %v378_v26, 5  ;;  %v412_v0 = vshrl.u32 %v3082_v53, 16  ;;  %v391_v3 = vor.u32 %v390_v45, %v386_v57 }
  0x37   : > { %2436 = vmatprep.subr.bf16.mxu1 %v2646_v60  ;;  %v373_v46 = vsel %vm2912_vm5, %v368_v35, %v372_v23  ;;  %v524_v47 = vsel %vm2906_vm4, %v522_v37, %v523_v32  ;;  %v2656_v60 = vld [vmem:[%s3526_s1 + $0x1d8] sm:$0xff]   ;;  %v527_v4 = vrot.slane %v3037_v16, 5  ;;  %v3099_v5 = vcombine.low %v3079_v52, %v3082_v53  ;;  %v3124_v23 = vld [vmem:[%s2876_s24 + $0x4c] sm:$0xf] }
  0x38   : > { %1365 = vmatmul.mubr.bf16.gmra.mxu0 %v2922_v58  ;;  %v2650_v58 = vld [vmem:[%s3526_s1 + $0x160] sm:$0xff]   ;;  %v3085_v55 = vcombine.low %v363_v34, %v373_v46  ;;  %v381_v56 = vor.u32 %v380_v42, %v377_v41  ;;  %v392_v8 = vrot.slane %v391_v3, 4  ;;  %v401_v13 = vrot.slane %v399_v62, 4  ;;  %v2662_v41 = vld [vmem:[%s3526_s1 + $0x110] sm:$0xff]  }
  0x39   : > { %1462 = vmatmul.mubr.bf16.gmra.mxu1 %v2997_v49  ;;  %2373 = vmatpush3.bf16.msra.mxu0 %v2647_v1  ;;  %v3094_v1 = vcombine.low %v521_v36, %v524_v47  ;;  %v529_v9 = vrot.slane %v527_v4, 4  ;;  %v404_v14 = vrot.slane %v402_v63, 5  ;;  %v408_v15 = vshll.u32 %v3082_v53, 16  ;;  %v2663_v47 = vld [vmem:[%s3526_s1 + $0x190] sm:$0xff]  }
  0x3a   : > { %1469 = vmatprep.mubr.bf16.mxu1 %v3005_v59  ;;  %2437 = vmatpush3.bf16.msra.mxu1 %v2648_v6  ;;  %v382_v2 = vrot.slane %v381_v56, 4  ;;  %v530_v6 = vrot.slane %v259_v40, 5  ;;  %v414_v16 = vrot.slane %v412_v0, 4  ;;  %v397_v17 = vsel %vm2912_vm5, %v392_v8, %v396_v61  ;;  %v3167_v63 = vld [vmem:[%s2876_s24 + $0x54] sm:$0xf] }
  0x3b   : > { %2374 = vmatprep.subr.bf16.mxu0 %v2650_v58  ;;  %1372 = vmatprep.mubr.bf16.mxu0 %v3040_v18  ;;  %v2657_v58 = vld [vmem:[%s3526_s1 + $0x118] sm:$0xff]   ;;  %v528_v20 = vsel %vm2906_vm4, %v2049_v54, %v527_v4  ;;  %v418_v21 = vshll.u32 %v262_v12, 16  ;;  %v2050_v24 = vrot.slane %v3079_v52, 9  ;;  %v405_v28 = vor.u32 %v404_v14, %v401_v13  ;;  %v3158_v52 = vld [vmem:[%s2876_s24 + $0x50] sm:$0x1] }
  0x3c   : > { %2438 = vmatprep.subr.bf16.mxu1 %v2651_v22  ;;  %v387_v7 = vsel %vm2912_vm5, %v382_v2, %v386_v57  ;;  %v3121_v22 = vld [vmem:[%s2876_s24 + $0x48] sm:$0xf]  ;;  %v531_v27 = vsel %vm2906_vm4, %v529_v9, %v530_v6  ;;  %v410_v29 = vrot.slane %v408_v15, 5  ;;  %v436_v35 = vshrl.u32 %v3124_v23, 16  ;;  %v3170_v0 = vld [vmem:[%s2876_s24 + $0x58] sm:$0xf] }
  0x3d   : > { %2375 = vmatpush3.bf16.msra.mxu0 %v2652_v33  ;;  %v3127_v26 = vcombine.low %v387_v7, %v397_v17  ;;  %v420_v32 = vrot.slane %v418_v21, 5  ;;  %v423_v33 = vshrl.u32 %v3121_v22, 16  ;;  %v426_v34 = vshll.u32 %v3121_v22, 16  ;;  %v2666_v7 = vld [vmem:[%s3526_s1 + $0x1c8] sm:$0xff]  }
  0x3e   : > { %2439 = vmatpush3.bf16.msra.mxu1 %v2653_v38  ;;  %2376 = vmatprep.subr.bf16.mxu0 %v2655_v39  ;;  %v406_v36 = vrot.slane %v405_v28, 4  ;;  %v415_v37 = vor.u32 %v414_v16, %v410_v29  ;;  %v534_v38 = vrot.slane %v3082_v53, 5  ;;  %v3140_v39 = vcombine.low %v528_v20, %v531_v27  ;;  %v2667_v17 = vld [vmem:[%s3526_s1 + $0x108] sm:$0xff]   ;;  %v2670_v27 = vld [vmem:[%s3526_s1 + $0x140] sm:$0xff]   ;;  %v268_v28 = vld [vmem:[%s2876_s24 + $0x5c] sm:$0x1] }
  0x3f   : > { %2440 = vmatprep.subr.bf16.mxu1 %v2656_v60  ;;  %v537_v40 = vrot.slane %v262_v12, 5  ;;  %v3149_v45 = vcombine.low %v3121_v22, %v3124_v23  ;;  %v425_v53 = vrot.slane %v423_v33, 4  ;;  %v428_v54 = vrot.slane %v426_v34, 5 }
  0x40   : > { %1373 = vmatmul.mubr.bf16.gmra.mxu0 %v2961_v25  ;;  %v411_v42 = vsel %vm2912_vm5, %v406_v36, %v410_v29  ;;  %v416_v44 = vrot.slane %v415_v37, 4  ;;  %v536_v46 = vrot.slane %v534_v38, 4  ;;  %v432_v56 = vshll.u32 %v3124_v23, 16 }
  0x41   : > { %1470 = vmatmul.mubr.bf16.gmra.mxu1 %v3042_v19  ;;  %1380 = vmatprep.mubr.bf16.mxu0 %v3085_v55  ;;  %v438_v57 = vrot.slane %v436_v35, 4  ;;  %v535_v61 = vsel %vm2906_vm4, %v2050_v24, %v534_v38  ;;  %v442_v62 = vshll.u32 %v3158_v52, 16  ;;  %v2051_v2 = vrot.slane %v3121_v22, 9 }
  0x42   : > { %1477 = vmatprep.mubr.bf16.mxu1 %v3053_v30  ;;  %2377 = vmatpush3.bf16.msra.mxu0 %v2657_v58  ;;  %v421_v60 = vsel %vm2912_vm5, %v416_v44, %v420_v32  ;;  %v538_v4 = vsel %vm2906_vm4, %v536_v46, %v537_v40  ;;  %v429_v6 = vor.u32 %v428_v54, %v425_v53  ;;  %v434_v58 = vrot.slane %v432_v56, 5  ;;  %v2671_v40 = vld [vmem:[%s3526_s1 + $0x1c0] sm:$0xff]  }
  0x43   : > { %2441 = vmatpush3.bf16.msra.mxu1 %v2658_v10  ;;  %2378 = vmatprep.subr.bf16.mxu0 %v2660_v11  ;;  %v3175_v3 = vcombine.low %v411_v42, %v421_v60  ;;  %v444_v8 = vrot.slane %v442_v62, 5  ;;  %v447_v9 = vshrl.u32 %v3167_v63, 16  ;;  %v450_v10 = vshll.u32 %v3167_v63, 16  ;;  %v3220_v44 = vld [vmem:[%s2876_s24 + $0x60] sm:$0xf]  ;;  %v2674_v62 = vld [vmem:[%s3526_s1 + $0x238] sm:$0xff]  }
  0x44   : > { %2442 = vmatprep.subr.bf16.mxu1 %v2661_v31  ;;  %v460_v11 = vshrl.u32 %v3170_v0, 16  ;;  %v430_v12 = vrot.slane %v429_v6, 4  ;;  %v439_v13 = vor.u32 %v438_v57, %v434_v58  ;;  %v541_v14 = vrot.slane %v3124_v23, 5  ;;  %v2668_v23 = vld [vmem:[%s3526_s1 + $0x188] sm:$0xff]   ;;  %v3223_v46 = vld [vmem:[%s2876_s24 + $0x64] sm:$0xf] }
  0x45   : > { %v3188_v15 = vcombine.low %v535_v61, %v538_v4  ;;  %v544_v16 = vrot.slane %v3158_v52, 5  ;;  %v3198_v22 = vcombine.low %v3167_v63, %v3170_v0  ;;  %v449_v29 = vrot.slane %v447_v9, 4  ;;  %v2672_v54 = vld [vmem:[%s3526_s1 + $0x100] sm:$0xff]  }
  0x46   : > { %2379 = vmatpush3.bf16.msra.mxu0 %v2662_v41  ;;  %v435_v20 = vsel %vm2912_vm5, %v430_v12, %v434_v58  ;;  %v440_v21 = vrot.slane %v439_v13, 4  ;;  %v543_v24 = vrot.slane %v541_v14, 4  ;;  %v452_v31 = vrot.slane %v450_v10, 5  ;;  %v2673_v61 = vld [vmem:[%s3526_s1 + $0x180] sm:$0xff]   ;;  %v2675_v10 = vld [vmem:[%s3526_s1 + $0x230] sm:$0xff]  }
  0x47   : > { %2443 = vmatpush3.bf16.msra.mxu1 %v2663_v47  ;;  %2380 = vmatprep.subr.bf16.mxu0 %v2665_v48  ;;  %v456_v32 = vshll.u32 %v3170_v0, 16  ;;  %v462_v33 = vrot.slane %v460_v11, 4  ;;  %v466_v35 = vshll.u32 %v268_v28, 16  ;;  %v542_v41 = vsel %vm2906_vm4, %v2051_v2, %v541_v14 }
  0x48   : > { %1381 = vmatmul.mubr.bf16.gmra.mxu0 %v3005_v59  ;;  %2444 = vmatprep.subr.bf16.mxu1 %v2666_v7  ;;  %v445_v34 = vsel %vm2912_vm5, %v440_v21, %v444_v8  ;;  %v453_v37 = vor.u32 %v452_v31, %v449_v29  ;;  %v545_v47 = vsel %vm2906_vm4, %v543_v24, %v544_v16  ;;  %v548_v53 = vrot.slane %v3170_v0, 5  ;;  %v3302_v21 = vld [vmem:[%s2876_s24 + $0x6c] sm:$0xf]  ;;  %v3305_v24 = vld [vmem:[%s2876_s24 + $0x70] sm:$0xf] }
  0x49   : > { %1478 = vmatmul.mubr.bf16.gmra.mxu1 %v3094_v1  ;;  %1388 = vmatprep.mubr.bf16.mxu0 %v3127_v26  ;;  %v3210_v36 = vcombine.low %v435_v20, %v445_v34  ;;  %v458_v38 = vrot.slane %v456_v32, 5  ;;  %v468_v42 = vrot.slane %v466_v35, 5  ;;  %v2052_v60 = vrot.slane %v3167_v63, 9  ;;  %v271_v20 = vld [vmem:[%s2876_s24 + $0x68] sm:$0x1] }
  0x4a   : > { %1485 = vmatprep.mubr.bf16.mxu1 %v3099_v5  ;;  %2381 = vmatpush3.bf16.msra.mxu0 %v2667_v17  ;;  %v454_v48 = vrot.slane %v453_v37, 4  ;;  %v3242_v0 = vcombine.low %v542_v41, %v545_v47  ;;  %v3248_v4 = vcombine.low %v3220_v44, %v3223_v46  ;;  %v550_v6 = vrot.slane %v548_v53, 4 }
  0x4b   : > { %2445 = vmatpush3.bf16.msra.mxu1 %v2668_v23  ;;  %2382 = vmatprep.subr.bf16.mxu0 %v2670_v27  ;;  %v463_v52 = vor.u32 %v462_v33, %v458_v38  ;;  %v551_v63 = vrot.slane %v268_v28, 5  ;;  %v549_v7 = vsel %vm2906_vm4, %v2052_v60, %v548_v53  ;;  %v557_v11 = vshll.u32 %v3220_v44, 16  ;;  %v2682_v23 = vld [vmem:[%s3526_s1 + $0x200] sm:$0xff]  }
  0x4c   : > { %2446 = vmatprep.subr.bf16.mxu1 %v2671_v40  ;;  %v459_v56 = vsel %vm2912_vm5, %v454_v48, %v458_v38  ;;  %v567_v12 = vshrl.u32 %v3223_v46, 16  ;;  %v563_v13 = vshll.u32 %v3223_v46, 16  ;;  %v573_v29 = vshll.u32 %v271_v20, 16 }
  0x4d   : > { %v464_v57 = vrot.slane %v463_v52, 4  ;;  %v552_v8 = vsel %vm2906_vm4, %v550_v6, %v551_v63  ;;  %v559_v14 = vrot.slane %v557_v11, 5  ;;  %v588_v31 = vshrl.u32 %v3302_v21, 16 }
  0x4e   : > { %2383 = vmatpush3.bf16.msra.mxu0 %v2672_v54  ;;  %v3260_v9 = vcombine.low %v549_v7, %v552_v8  ;;  %v565_v16 = vrot.slane %v563_v13, 5  ;;  %v569_v17 = vrot.slane %v567_v12, 4  ;;  %v591_v32 = vshll.u32 %v3302_v21, 16 }
  0x4f   : > { %v469_v2 = vsel %vm2912_vm5, %v464_v57, %v468_v42  ;;  %2447 = vmatpush3.bf16.msra.mxu1 %v2673_v61  ;;  %2512 = vmatprep.subr.bf16.mxu0 %v2674_v62  ;;  %v597_v33 = vshll.u32 %v3305_v24, 16  ;;  %v575_v35 = vrot.slane %v573_v29, 5  ;;  %v590_v37 = vrot.slane %v588_v31, 4  ;;  %v274_v42 = vld [vmem:[%s2876_s24 + $0x74] sm:$0x1] }
  0x50   : > { %1389 = vmatmul.mubr.bf16.gmra.mxu0 %v3053_v30  ;;  %v3250_v58 = vcombine.low %v459_v56, %v469_v2  ;;  %2544 = vmatprep.subr.bf16.mxu1 %v2674_v62  ;;  %v570_v28 = vor.u32 %v569_v17, %v565_v16  ;;  %v593_v38 = vrot.slane %v591_v32, 5  ;;  %v582_v48 = vrot.slane %v3223_v46, 5 }
  0x51   : > { %1486 = vmatmul.mubr.bf16.gmra.mxu1 %v3140_v39  ;;  %1396 = vmatprep.mubr.bf16.mxu0 %v3175_v3  ;;  %v599_v40 = vrot.slane %v597_v33, 5  ;;  %v607_v56 = vshll.u32 %v274_v42, 16  ;;  %v585_v60 = vrot.slane %v271_v20, 5  ;;  %v616_v51 = vrot.slane %v3305_v24, 5 }
  0x52   : > { %1493 = vmatprep.mubr.bf16.mxu1 %v3149_v45  ;;  %v571_v34 = vrot.slane %v570_v28, 4  ;;  %v594_v53 = vor.u32 %v593_v38, %v590_v37 }
  0x53   : > { %v609_v2 = vrot.slane %v607_v56, 5 }
  0x54   : > { %v576_v52 = vsel %vm2912_vm5, %v571_v34, %v575_v35  ;;  %v595_v61 = vrot.slane %v594_v53, 4 }
  0x58   : > { %1397 = vmatmul.mubr.bf16.gmra.mxu0 %v3099_v5 }
  0x59   : > { %1494 = vmatmul.mubr.bf16.gmra.mxu1 %v3188_v15  ;;  %1404 = vmatprep.mubr.bf16.mxu0 %v3210_v36 }
  0x5a   : > { %1501 = vmatprep.mubr.bf16.mxu1 %v3198_v22 }
  0x60   : > { %1405 = vmatmul.mubr.bf16.gmra.mxu0 %v3149_v45 }
  0x61   : > { %1502 = vmatmul.mubr.bf16.gmra.mxu1 %v3242_v0  ;;  %1412 = vmatprep.mubr.bf16.mxu0 %v3250_v58 }
  0x62   : > { %1509 = vmatprep.mubr.bf16.mxu1 %v3248_v4 }
  0x68   : > { %1413 = vmatmul.mubr.bf16.gmra.mxu0 %v3198_v22 }
  0x69   : > { %1510 = vmatmul.mubr.bf16.gmra.mxu1 %v3260_v9  ;;  %1550 = vmatprep.mubr.bf16.mxu0 %v2997_v49  ;;  %v2676_v49 = vld [vmem:[%s3526_s1 + $0x228] sm:$0xff]  }
  0x6a   : > { %1647 = vmatprep.mubr.bf16.mxu1 %v3040_v18 }
  0x70   : > { %1551 = vmatmul.mubr.bf16.vlgmr.msra.gmra.mxu0 %v2986_v43  ;;  %v2678_v43 = vld [vmem:[%s3526_s1 + $0x218] sm:$0xff]  }
  0x71   : > { %1648 = vmatmul.mubr.bf16.vlgmr.msra.gmra.mxu1 %v2961_v25  ;;  %2513 = vmatpush3.bf16.msra.mxu0 %v2674_v62  ;;  %v2677_v25 = vld [vmem:[%s3526_s1 + $0x220] sm:$0xff]  }
  0x72   : > { %2552 = vmatpush3.bf16.msra.mxu1 %v2674_v62  ;;  %1558 = vmatprep.mubr.bf16.mxu0 %v3042_v19 }
  0x73   : > { %1655 = vmatprep.mubr.bf16.mxu1 %v3085_v55  ;;  %2514 = vmatprep.subr.bf16.mxu0 %v2675_v10 }
  0x74   : > { %2545 = vmatprep.subr.bf16.mxu1 %v2675_v10 }
  0x75   : > { %2515 = vmatpush3.bf16.msra.mxu0 %v2675_v10 }
  0x76   : > { %2553 = vmatpush3.bf16.msra.mxu1 %v2675_v10  ;;  %2516 = vmatprep.subr.bf16.mxu0 %v2676_v49  ;;  %v618_v10 = vrot.slane %v616_v51, 4 }
  0x77   : > { %2546 = vmatprep.subr.bf16.mxu1 %v2676_v49 }
  0x78   : > { %1559 = vmatmul.mubr.bf16.gmra.mxu0 %v3040_v18  ;;  %v554_v18 = vshrl.u32 %v3220_v44, 16 }
  0x79   : > { %1656 = vmatmul.mubr.bf16.gmra.mxu1 %v3005_v59  ;;  %1566 = vmatprep.mubr.bf16.mxu0 %v3094_v1  ;;  %v2679_v59 = vld [vmem:[%s3526_s1 + $0x210] sm:$0xff]  }
  0x7a   : > { %1663 = vmatprep.mubr.bf16.mxu1 %v3127_v26  ;;  %2517 = vmatpush3.bf16.msra.mxu0 %v2676_v49 }
  0x7b   : > { %2554 = vmatpush3.bf16.msra.mxu1 %v2676_v49  ;;  %2518 = vmatprep.subr.bf16.mxu0 %v2677_v25  ;;  %v619_v49 = vrot.slane %v274_v42, 5 }
  0x7c   : > { %2547 = vmatprep.subr.bf16.mxu1 %v2677_v25 }
  0x7e   : > { %2519 = vmatpush3.bf16.msra.mxu0 %v2677_v25 }
  0x7f   : > { %2555 = vmatpush3.bf16.msra.mxu1 %v2677_v25  ;;  %2520 = vmatprep.subr.bf16.mxu0 %v2678_v43 }
  0x80   : > { %2548 = vmatprep.subr.bf16.mxu1 %v2678_v43  ;;  %1567 = vmatmul.mubr.bf16.gmra.mxu0 %v3085_v55  ;;  %v556_v55 = vrot.slane %v554_v18, 4 }
  0x81   : > { %1664 = vmatmul.mubr.bf16.gmra.mxu1 %v3053_v30  ;;  %1574 = vmatprep.mubr.bf16.mxu0 %v3140_v39  ;;  %v2680_v30 = vld [vmem:[%s3526_s1 + $0x208] sm:$0xff]  }
  0x82   : > { %1671 = vmatprep.mubr.bf16.mxu1 %v3175_v3  ;;  %2521 = vmatpush3.bf16.msra.mxu0 %v2678_v43  ;;  %v560_v27 = vor.u32 %v559_v14, %v556_v55 }
  0x83   : > { %2556 = vmatpush3.bf16.msra.mxu1 %v2678_v43  ;;  %2522 = vmatprep.subr.bf16.mxu0 %v2679_v59 }
  0x84   : > { %2549 = vmatprep.subr.bf16.mxu1 %v2679_v59 }
  0x86   : > { %2523 = vmatpush3.bf16.msra.mxu0 %v2679_v59 }
  0x87   : > { %2557 = vmatpush3.bf16.msra.mxu1 %v2679_v59  ;;  %2524 = vmatprep.subr.bf16.mxu0 %v2680_v30 }
  0x88   : > { %2550 = vmatprep.subr.bf16.mxu1 %v2680_v30  ;;  %1575 = vmatmul.mubr.bf16.gmra.mxu0 %v3127_v26  ;;  %v601_v26 = vshrl.u32 %v3305_v24, 16 }
  0x89   : > { %1672 = vmatmul.mubr.bf16.gmra.mxu1 %v3099_v5  ;;  %1582 = vmatprep.mubr.bf16.mxu0 %v3188_v15  ;;  %v561_v5 = vrot.slane %v560_v27, 4 }
  0x8a   : > { %1679 = vmatprep.mubr.bf16.mxu1 %v3210_v36  ;;  %2525 = vmatpush3.bf16.msra.mxu0 %v2680_v30  ;;  %v603_v41 = vrot.slane %v601_v26, 4 }
  0x8b   : > { %2558 = vmatpush3.bf16.msra.mxu1 %v2680_v30  ;;  %2526 = vmatprep.subr.bf16.mxu0 %v2682_v23  ;;  %v566_v47 = vsel %vm2912_vm5, %v561_v5, %v565_v16 }
  0x8c   : > { %2551 = vmatprep.subr.bf16.mxu1 %v2682_v23  ;;  %v604_v54 = vor.u32 %v603_v41, %v599_v40  ;;  %v2080_v57 = vcombine.low %v566_v47, %v576_v52 }
  0x8e   : > { %2527 = vmatpush3.bf16.msra.mxu0 %v2682_v23  ;;  %v605_v62 = vrot.slane %v604_v54, 4 }
  0x8f   : > { %2559 = vmatpush3.bf16.msra.mxu1 %v2682_v23 }
  0x90   : > { %1583 = vmatmul.mubr.bf16.gmra.mxu0 %v3175_v3  ;;  %v2053_v3 = vrot.slane %v3220_v44, 9  ;;  %v600_v44 = vsel %vm2912_vm5, %v595_v61, %v599_v40  ;;  %v610_v63 = vsel %vm2912_vm5, %v605_v62, %v609_v2 }
  0x91   : > { %1680 = vmatmul.mubr.bf16.gmra.mxu1 %v3149_v45  ;;  %1590 = vmatprep.mubr.bf16.mxu0 %v3242_v0  ;;  %v584_v45 = vrot.slane %v582_v48, 4  ;;  %v2083_v8 = vcombine.low %v600_v44, %v610_v63 }
  0x92   : > { %1687 = vmatprep.mubr.bf16.mxu1 %v3250_v58  ;;  %v583_v46 = vsel %vm2906_vm4, %v2053_v3, %v582_v48 }
  0x93   : > { %v586_v6 = vsel %vm2906_vm4, %v584_v45, %v585_v60 }
  0x94   : > { %v2081_v7 = vcombine.low %v583_v46, %v586_v6 }
  0x98   : > { %1591 = vmatmul.mubr.bf16.gmra.mxu0 %v3210_v36  ;;  %v2054_v36 = vrot.slane %v3302_v21, 9 }
  0x99   : > { %1688 = vmatmul.mubr.bf16.gmra.mxu1 %v3198_v22  ;;  %1598 = vmatprep.mubr.bf16.mxu0 %v3260_v9  ;;  %v2082_v22 = vcombine.low %v3302_v21, %v3305_v24 }
  0x9a   : > { %1695 = vmatprep.mubr.bf16.mxu1 %v2080_v57 }
  0xa0   : > { %1599 = vmatmul.mubr.bf16.gmra.mxu0 %v3250_v58 }
  0xa1   : > { %1696 = vmatmul.mubr.bf16.gmra.mxu1 %v3248_v4  ;;  %1606 = vmatprep.mubr.bf16.mxu0 %v2081_v7  ;;  %v617_v4 = vsel %vm2906_vm4, %v2054_v36, %v616_v51 }
  0xa2   : > { %1703 = vmatprep.mubr.bf16.mxu1 %v2083_v8 }
  0xa8   : > { %1607 = vmatmul.mubr.bf16.gmra.mxu0 %v2080_v57 }
  0xa9   : > { %1704 = vmatmul.mubr.bf16.gmra.mxu1 %v2082_v22  ;;  %2528 = vmatprep.mubr.bf16.mxu0 %v3042_v19  ;;  %v620_v19 = vsel %vm2906_vm4, %v618_v10, %v619_v49 }
  0xaa   : > { %2536 = vmatprep.mubr.bf16.mxu1 %v3242_v0  ;;  %v2084_v0 = vcombine.low %v617_v4, %v620_v19 }
  0xb0   : > { %2529 = vmatmul.mubr.bf16.vlgmr.msra.gmra.mxu0 %v3094_v1  ;;  %v3359_v1 = vld [vmem:[%s3527_s2] ss:$0 sm:$0xff] }
  0xb1   : > { %2537 = vmatmul.mubr.bf16.vlgmr.msra.gmra.mxu1 %v3260_v9  ;;  %2532 = vmatprep.mubr.bf16.mxu0 %v3140_v39 }
  0xb2   : > { %2540 = vmatprep.mubr.bf16.mxu1 %v2081_v7 }
  0xb8   : > { %2533 = vmatmul.mubr.bf16.gmra.mxu0 %v3188_v15 }
  0xb9   : > { %2541 = vmatmul.mubr.bf16.gmra.mxu1 %v2084_v0 }
  0xf0   : > { %v2256_v58 = vpop.f32.mrf.mxu0 }
  0xf1   : > { %v2320_v25 = vpop.f32.mrf.mxu1 }
  0xf2   : > { %v2257_v9 = vpop.f32.mrf.mxu0 }
  0xf3   : > { %v2321_v39 = vpop.f32.mrf.mxu1  ;;  %v2258_v43 = vadd.f32 %v2257_v9, %v2256_v58 }
  0xf4   : > { %v2322_v59 = vadd.f32 %v2321_v39, %v2320_v25  ;;  %v2259_v18 = vpop.f32.mrf.mxu0 }
  0xf5   : > { %v2323_v11 = vpop.f32.mrf.mxu1  ;;  %v1359_v50 = vadd.f32 %v2258_v43, %v3359_v1 }
  0xf6   : > { %v2260_v12 = vpop.f32.mrf.mxu0 }
  0xf7   : > { %v2324_v13 = vpop.f32.mrf.mxu1  ;;  %v3362_v30 = vadd.f32 %v2322_v59, %v1359_v50  ;;  %v2261_v15 = vadd.f32 %v2260_v12, %v2259_v18 }
  0xf8   : > { %v2325_v55 = vadd.f32 %v2324_v13, %v2323_v11  ;;  %v2262_v14 = vpop.f32.mrf.mxu0 }
  0xf9   : > { %v2326_v16 = vpop.f32.mrf.mxu1  ;;  %v1362_v17 = vadd.f32 %v2261_v15, %v3359_v1 }
  0xfa   : > { %v2263_v20 = vpop.f32.mrf.mxu0 }
  0xfb   : > { %v2327_v21 = vpop.f32.mrf.mxu1  ;;  %v3365_v24 = vadd.f32 %v2325_v55, %v1362_v17  ;;  %v2264_v23 = vadd.f32 %v2263_v20, %v2262_v14 }
  0xfc   : > { %v2328_v27 = vadd.f32 %v2327_v21, %v2326_v16  ;;  %v2265_v28 = vpop.f32.mrf.mxu0 }
  0xfd   : > { %v2329_v29 = vpop.f32.mrf.mxu1  ;;  %v1367_v31 = vadd.f32 %v2264_v23, %v3359_v1 }
  0xfe   : > { %v2266_v32 = vpop.f32.mrf.mxu0 }
  0xff   : > { %v2330_v33 = vpop.f32.mrf.mxu1  ;;  %v3368_v26 = vadd.f32 %v2328_v27, %v1367_v31  ;;  %v2267_v5 = vadd.f32 %v2266_v32, %v2265_v28 }
 0x100   : > { %v2331_v34 = vadd.f32 %v2330_v33, %v2329_v29  ;;  %v2268_v35 = vpop.f32.mrf.mxu0 }
 0x101   : > { %v2332_v37 = vpop.f32.mrf.mxu1  ;;  %v1370_v38 = vadd.f32 %v2267_v5, %v3359_v1 }
 0x102   : > { %v2269_v40 = vpop.f32.mrf.mxu0 }
 0x103   : > { %v2333_v41 = vpop.f32.mrf.mxu1  ;;  %v3371_v42 = vadd.f32 %v2331_v34, %v1370_v38  ;;  %v2270_v47 = vadd.f32 %v2269_v40, %v2268_v35 }
 0x104   : > { %v2334_v48 = vadd.f32 %v2333_v41, %v2332_v37  ;;  %v2271_v52 = vpop.f32.mrf.mxu0 }
 0x105   : > { %v2335_v53 = vpop.f32.mrf.mxu1  ;;  %v1375_v54 = vadd.f32 %v2270_v47, %v3359_v1 }
 0x106   : > { %v2272_v56 = vpop.f32.mrf.mxu0 }
 0x107   : > { %v2336_v57 = vpop.f32.mrf.mxu1  ;;  %v3374_v3 = vadd.f32 %v2334_v48, %v1375_v54  ;;  %v2273_v60 = vadd.f32 %v2272_v56, %v2271_v52 }
 0x108   : > { %v2337_v45 = vadd.f32 %v2336_v57, %v2335_v53  ;;  %v2274_v61 = vpop.f32.mrf.mxu0 }
 0x109   : > { %v2338_v62 = vpop.f32.mrf.mxu1  ;;  %v1378_v2 = vadd.f32 %v2273_v60, %v3359_v1 }
 0x10a   : > { %v2275_v46 = vpop.f32.mrf.mxu0 }
 0x10b   : > { %v2339_v6 = vpop.f32.mrf.mxu1  ;;  %v3377_v44 = vadd.f32 %v2337_v45, %v1378_v2  ;;  %v2276_v63 = vadd.f32 %v2275_v46, %v2274_v61 }
 0x10c   : > { %v2340_v7 = vadd.f32 %v2339_v6, %v2338_v62  ;;  %v2277_v8 = vpop.f32.mrf.mxu0 }
 0x10d   : > { %v2341_v22 = vpop.f32.mrf.mxu1  ;;  %v1383_v51 = vadd.f32 %v2276_v63, %v3359_v1 }
 0x10e   : > { %v2278_v36 = vpop.f32.mrf.mxu0 }
 0x10f   : > { %v2342_v10 = vpop.f32.mrf.mxu1  ;;  %v3380_v49 = vadd.f32 %v2340_v7, %v1383_v51  ;;  %v2279_v4 = vadd.f32 %v2278_v36, %v2277_v8 }
 0x110   : > { %v2343_v19 = vadd.f32 %v2342_v10, %v2341_v22  ;;  %v2280_v0 = vpop.f32.mrf.mxu0 }
 0x111   : > { %v2344_v58 = vpop.f32.mrf.mxu1  ;;  %v1386_v25 = vadd.f32 %v2279_v4, %v3359_v1 }
 0x112   : > { %v2281_v9 = vpop.f32.mrf.mxu0 }
 0x113   : > { %v2345_v39 = vpop.f32.mrf.mxu1  ;;  %v3383_v43 = vadd.f32 %v2343_v19, %v1386_v25  ;;  %v2282_v59 = vadd.f32 %v2281_v9, %v2280_v0 }
 0x114   : > { %v2346_v18 = vadd.f32 %v2345_v39, %v2344_v58  ;;  %v2283_v11 = vpop.f32.mrf.mxu0 }
 0x115   : > { %3533 = vst [vmem:[#allocation2_spill] sm:$0xff] %v3383_v43  ;;  %v2347_v50 = vpop.f32.mrf.mxu1  ;;  %v1391_v12 = vadd.f32 %v2282_v59, %v3359_v1 }
 0x116   : > { %v2284_v13 = vpop.f32.mrf.mxu0 }
 0x117   : > { %v2348_v15 = vpop.f32.mrf.mxu1  ;;  %v3386_v55 = vadd.f32 %v2346_v18, %v1391_v12  ;;  %v2285_v14 = vadd.f32 %v2284_v13, %v2283_v11 }
 0x118   : > { %v2349_v16 = vadd.f32 %v2348_v15, %v2347_v50  ;;  %v2286_v17 = vpop.f32.mrf.mxu0 }
 0x119   : > { %v2350_v20 = vpop.f32.mrf.mxu1  ;;  %v1394_v21 = vadd.f32 %v2285_v14, %v3359_v1 }
 0x11a   : > { %v2287_v23 = vpop.f32.mrf.mxu0 }
 0x11b   : > { %v2351_v27 = vpop.f32.mrf.mxu1  ;;  %v3389_v28 = vadd.f32 %v2349_v16, %v1394_v21  ;;  %v2288_v29 = vadd.f32 %v2287_v23, %v2286_v17 }
 0x11c   : > { %v2352_v31 = vadd.f32 %v2351_v27, %v2350_v20  ;;  %v2289_v32 = vpop.f32.mrf.mxu0 }
 0x11d   : > { %v2353_v33 = vpop.f32.mrf.mxu1  ;;  %v1399_v5 = vadd.f32 %v2288_v29, %v3359_v1 }
 0x11e   : > { %v2290_v34 = vpop.f32.mrf.mxu0 }
 0x11f   : > { %v2354_v35 = vpop.f32.mrf.mxu1  ;;  %v3392_v37 = vadd.f32 %v2352_v31, %v1399_v5  ;;  %v2291_v38 = vadd.f32 %v2290_v34, %v2289_v32 }
 0x120   : > { %v2355_v40 = vadd.f32 %v2354_v35, %v2353_v33  ;;  %v2292_v41 = vpop.f32.mrf.mxu0 }
 0x121   : > { %v2356_v47 = vpop.f32.mrf.mxu1  ;;  %v1402_v48 = vadd.f32 %v2291_v38, %v3359_v1 }
 0x122   : > { %v2293_v52 = vpop.f32.mrf.mxu0 }
 0x123   : > { %v2357_v53 = vpop.f32.mrf.mxu1  ;;  %v3395_v54 = vadd.f32 %v2355_v40, %v1402_v48  ;;  %v2294_v56 = vadd.f32 %v2293_v52, %v2292_v41 }
 0x124   : > { %v2358_v57 = vadd.f32 %v2357_v53, %v2356_v47  ;;  %v2295_v60 = vpop.f32.mrf.mxu0 }
 0x125   : > { %v2359_v45 = vpop.f32.mrf.mxu1  ;;  %v1407_v61 = vadd.f32 %v2294_v56, %v3359_v1 }
 0x126   : > { %v2296_v62 = vpop.f32.mrf.mxu0 }
 0x127   : > { %v2360_v2 = vpop.f32.mrf.mxu1  ;;  %v3398_v46 = vadd.f32 %v2358_v57, %v1407_v61  ;;  %v2297_v6 = vadd.f32 %v2296_v62, %v2295_v60 }
 0x128   : > { %v2361_v63 = vadd.f32 %v2360_v2, %v2359_v45  ;;  %v2298_v7 = vpop.f32.mrf.mxu0 }
 0x129   : > { %3534 = vst [vmem:[#allocation3_spill] sm:$0xff] %v3398_v46  ;;  %v2362_v8 = vpop.f32.mrf.mxu1  ;;  %v1410_v22 = vadd.f32 %v2297_v6, %v3359_v1 }
 0x12a   : > { %v2299_v51 = vpop.f32.mrf.mxu0 }
 0x12b   : > { %v2363_v36 = vpop.f32.mrf.mxu1  ;;  %v3401_v10 = vadd.f32 %v2361_v63, %v1410_v22  ;;  %v2300_v4 = vadd.f32 %v2299_v51, %v2298_v7 }
 0x12c   : > { %v2364_v19 = vadd.f32 %v2363_v36, %v2362_v8  ;;  %v2301_v0 = vpop.f32.mrf.mxu0 }
 0x12d   : > { %3535 = vst [vmem:[#allocation4_spill] sm:$0xff] %v3401_v10  ;;  %v2365_v58 = vpop.f32.mrf.mxu1  ;;  %v1415_v25 = vadd.f32 %v2300_v4, %v3359_v1 }
 0x12e   : > { %v2302_v9 = vpop.f32.mrf.mxu0 }
 0x12f   : > { %v2366_v39 = vpop.f32.mrf.mxu1  ;;  %v3404_v59 = vadd.f32 %v2364_v19, %v1415_v25  ;;  %v2303_v18 = vadd.f32 %v2302_v9, %v2301_v0 }
 0x130   : > { %v2367_v11 = vadd.f32 %v2366_v39, %v2365_v58  ;;  %v2384_v50 = vpop.f32.mrf.mxu0 }
 0x131   : > { %3536 = vst [vmem:[#allocation5_spill] sm:$0xff] %v3404_v59  ;;  %v2448_v12 = vpop.f32.mrf.mxu1  ;;  %v1418_v13 = vadd.f32 %v2303_v18, %v3359_v1 }
 0x132   : > { %v2385_v15 = vpop.f32.mrf.mxu0 }
 0x133   : > { %v2449_v14 = vpop.f32.mrf.mxu1  ;;  %v3407_v16 = vadd.f32 %v2367_v11, %v1418_v13  ;;  %v2386_v17 = vadd.f32 %v2385_v15, %v2384_v50 }
 0x134   : > { %v2450_v20 = vadd.f32 %v2449_v14, %v2448_v12  ;;  %v2387_v21 = vpop.f32.mrf.mxu0 }
 0x135   : > { %3537 = vst [vmem:[#allocation6_spill] sm:$0xff] %v3407_v16  ;;  %v2451_v23 = vpop.f32.mrf.mxu1  ;;  %v1553_v27 = vadd.f32 %v2386_v17, %v3362_v30 }
 0x136   : > { %v2388_v29 = vpop.f32.mrf.mxu0 }
 0x137   : > { %v2452_v31 = vpop.f32.mrf.mxu1  ;;  %v3410_v32 = vadd.f32 %v2450_v20, %v1553_v27  ;;  %v2389_v16 = vadd.f32 %v2388_v29, %v2387_v21 }
 0x138   : > { %v2390_v33 = vpop.f32.mrf.mxu0 }
 0x139   : > { %3538 = vst [vmem:[#allocation7_spill] sm:$0xff] %v3410_v32  ;;  %v2454_v5 = vpop.f32.mrf.mxu1 }
 0x13a   : > { %v2391_v34 = vpop.f32.mrf.mxu0 }
 0x13b   : > { %v2455_v35 = vpop.f32.mrf.mxu1  ;;  %v2392_v32 = vadd.f32 %v2391_v34, %v2390_v33 }
 0x13c   : > { %v2393_v38 = vpop.f32.mrf.mxu0  ;;  %v2456_v34 = vadd.f32 %v2455_v35, %v2454_v5 }
 0x13d   : > { %v2457_v1 = vpop.f32.mrf.mxu1  ;;  %v1561_v21 = vadd.f32 %v2392_v32, %v3368_v26 }
 0x13e   : > { %v2394_v40 = vpop.f32.mrf.mxu0 }
 0x13f   : > { %v2458_v41 = vpop.f32.mrf.mxu1  ;;  %v2395_v59 = vadd.f32 %v2394_v40, %v2393_v38  ;;  %v1658_v32 = vadd.f32 %v2456_v34, %v1561_v21 }
 0x140   : > { %v2396_v47 = vpop.f32.mrf.mxu0  ;;  %v2459_v38 = vadd.f32 %v2458_v41, %v2457_v1 }
 0x141   : > { %v2460_v48 = vpop.f32.mrf.mxu1  ;;  %v1564_v29 = vadd.f32 %v2395_v59, %v3371_v42 }
 0x142   : > { %v2397_v52 = vpop.f32.mrf.mxu0 }
 0x143   : > { %v2461_v53 = vpop.f32.mrf.mxu1  ;;  %v2398_v43 = vadd.f32 %v2397_v52, %v2396_v47  ;;  %v1661_v5 = vadd.f32 %v2459_v38, %v1564_v29 }
 0x144   : > { %v2399_v56 = vpop.f32.mrf.mxu0 }
 0x145   : > { %v3412_v57 = vpop.f32.mrf.mxu1  ;;  %v1569_v33 = vadd.f32 %v2398_v43, %v3374_v3 }
 0x146   : > { %v2400_v30 = vpop.f32.mrf.mxu0 }
 0x147   : > { %v2464_v60 = vpop.f32.mrf.mxu1  ;;  %v2401_v40 = vadd.f32 %v2400_v30, %v2399_v56 }
 0x148   : > { %v2402_v45 = vpop.f32.mrf.mxu0 }
 0x149   : > { %v3414_v61 = vpop.f32.mrf.mxu1  ;;  %v3460_v1 = vadd.f32 %v2401_v40, %v3377_v44 }
 0x14a   : > { %v2403_v62 = vpop.f32.mrf.mxu0 }
 0x14b   : > { %v2467_v2 = vpop.f32.mrf.mxu1 }
 0x14c   : > { %v3416_v6 = vpop.f32.mrf.mxu0  ;;  %v2468_v41 = vadd.f32 %v2467_v2, %v3414_v61 }
 0x14d   : > { %v3418_v63 = vpop.f32.mrf.mxu1 }
 0x14e   : > { %3539 = vst [vmem:[#allocation8_spill] sm:$0xff] %v3418_v63  ;;  %v3420_v7 = vpop.f32.mrf.mxu0  ;;  %v2453_v63 = vadd.f32 %v2452_v31, %v2451_v23  ;;  %v3455_v31 = vadd.f32 %v2464_v60, %v3412_v57 }
 0x14f   : > { %v3422_v8 = vpop.f32.mrf.mxu1  ;;  %v2407_v30 = vadd.f32 %v3420_v7, %v3416_v6 }
 0x150   : > { %3540 = vst [vmem:[#allocation9_spill] sm:$0xff] %v3422_v8  ;;  %v2408_v22 = vpop.f32.mrf.mxu0 }
 0x151   : > { %v3424_v51 = vpop.f32.mrf.mxu1 }
 0x152   : > { %3541 = vst [vmem:[#allocation10_spill] sm:$0xff] %v3424_v51  ;;  %v2409_v36 = vpop.f32.mrf.mxu0 }
 0x153   : > { %v3426_v4 = vpop.f32.mrf.mxu1  ;;  %v2410_v47 = vadd.f32 %v2409_v36, %v2408_v22 }
 0x154   : > { %3542 = vst [vmem:[#allocation11_spill] sm:$0xff] %v3426_v4  ;;  %v2411_v19 = vpop.f32.mrf.mxu0  ;;  %v1556_v4 = vadd.f32 %v2389_v16, %v3365_v24  ;;  %v2462_v24 = vadd.f32 %v2461_v53, %v2460_v48  ;;  %v2404_v16 = vadd.f32 %v2403_v62, %v2402_v45 }
 0x155   : > { %v3428_v0 = vpop.f32.mrf.mxu1  ;;  %v1585_v48 = vadd.f32 %v2410_v47, %v3386_v55  ;;  %v3548_v45 = vld [vmem:[#allocation8_spill] sm:$0xff]  ;;  %v3558_v47 = vld [vmem:[#allocation3_spill] sm:$0xff] }
 0x156   : > { %3543 = vst [vmem:[#allocation12_spill] sm:$0xff] %v3428_v0  ;;  %v2412_v58 = vpop.f32.mrf.mxu0  ;;  %v1653_v59 = vadd.f32 %v2453_v63, %v1556_v4  ;;  %v3457_v35 = vadd.f32 %v2462_v24, %v1569_v33  ;;  %v1577_v57 = vadd.f32 %v2404_v16, %v3380_v49  ;;  %v3559_v24 = vld [vmem:[#allocation4_spill] sm:$0xff] }
 0x157   : > { %v3430_v25 = vpop.f32.mrf.mxu1  ;;  %v2413_v23 = vadd.f32 %v2412_v58, %v2411_v19  ;;  %v3549_v61 = vld [vmem:[#allocation9_spill] sm:$0xff] }
 0x158   : > { %3544 = vst [vmem:[#allocation13_spill] sm:$0xff] %v3430_v25  ;;  %v2414_v9 = vpop.f32.mrf.mxu0  ;;  %v2471_v62 = vadd.f32 %v3549_v61, %v3548_v45  ;;  %v1674_v33 = vadd.f32 %v2468_v41, %v1577_v57 }
 0x159   : > { %v2478_v39 = vpop.f32.mrf.mxu1  ;;  %v1588_v60 = vadd.f32 %v2413_v23, %v3389_v28  ;;  %v3550_v55 = vld [vmem:[#allocation10_spill] sm:$0xff] }
 0x15a   : > { %v2415_v18 = vpop.f32.mrf.mxu0 }
 0x15b   : > { %v2479_v11 = vpop.f32.mrf.mxu1  ;;  %v2416_v51 = vadd.f32 %v2415_v18, %v2414_v9  ;;  %v3551_v2 = vld [vmem:[#allocation11_spill] sm:$0xff] }
 0x15c   : > { %v2417_v50 = vpop.f32.mrf.mxu0  ;;  %v2480_v53 = vadd.f32 %v2479_v11, %v2478_v39  ;;  %v2474_v63 = vadd.f32 %v3551_v2, %v3550_v55 }
 0x15d   : > { %v2481_v12 = vpop.f32.mrf.mxu1  ;;  %v1593_v42 = vadd.f32 %v2416_v51, %v3392_v37  ;;  %v3552_v19 = vld [vmem:[#allocation12_spill] sm:$0xff] }
 0x15e   : > { %v2418_v13 = vpop.f32.mrf.mxu0  ;;  %v1682_v11 = vadd.f32 %v2474_v63, %v1585_v48 }
 0x15f   : > { %v2482_v15 = vpop.f32.mrf.mxu1  ;;  %v2419_v26 = vadd.f32 %v2418_v13, %v2417_v50  ;;  %v1690_v36 = vadd.f32 %v2480_v53, %v1593_v42  ;;  %v3553_v49 = vld [vmem:[#allocation13_spill] sm:$0xff]  ;;  %v3554_v13 = vld [vmem:[#allocation2_spill] sm:$0xff] }
 0x160   : > { %v2420_v14 = vpop.f32.mrf.mxu0  ;;  %v2477_v58 = vadd.f32 %v3553_v49, %v3552_v19  ;;  %v2483_v9 = vadd.f32 %v2482_v15, %v2481_v12  ;;  %v3556_v12 = vld [vmem:[#allocation5_spill] sm:$0xff] }
 0x161   : > { %v3432_v17 = vpop.f32.mrf.mxu1  ;;  %v1596_v44 = vadd.f32 %v2419_v26, %v3395_v54 }
 0x162   : > { %3545 = vst [vmem:[#allocation14_spill] sm:$0xff] %v3432_v17  ;;  %v2421_v20 = vpop.f32.mrf.mxu0  ;;  %v1685_v29 = vadd.f32 %v2477_v58, %v1588_v60 }
 0x163   : > { %v3434_v27 = vpop.f32.mrf.mxu1  ;;  %v2422_v6 = vadd.f32 %v2421_v20, %v2420_v14  ;;  %v1693_v21 = vadd.f32 %v2483_v9, %v1596_v44 }
 0x164   : > { %v2423_v10 = vpop.f32.mrf.mxu0 }
 0x165   : > { %v3436_v46 = vpop.f32.mrf.mxu1 }
 0x166   : > { %v2424_v25 = vpop.f32.mrf.mxu0 }
 0x167   : > { %v3438_v0 = vpop.f32.mrf.mxu1  ;;  %v2425_v7 = vadd.f32 %v2424_v25, %v2423_v10  ;;  %v3557_v10 = vld [vmem:[#allocation7_spill] sm:$0xff] }
 0x168   : > { %3546 = vst [vmem:[#allocation15_spill] sm:$0xff] %v3438_v0  ;;  %v2426_v8 = vpop.f32.mrf.mxu0 }
 0x169   : > { %v3442_v17 = vpop.f32.mrf.mxu1  ;;  %v3555_v34 = vld [vmem:[#allocation14_spill] sm:$0xff]  ;;  %v1604_v16 = vadd.f32 %v2425_v7, %v3559_v24 }
 0x16a   : > { %v2427_v52 = vpop.f32.mrf.mxu0  ;;  %v2486_v38 = vadd.f32 %v3434_v27, %v3555_v34 }
 0x16b   : > { %v2491_v0 = vpop.f32.mrf.mxu1  ;;  %v2428_v22 = vadd.f32 %v2427_v52, %v2426_v8  ;;  %v1580_v8 = vadd.f32 %v2407_v30, %v3554_v13  ;;  %v1601_v52 = vadd.f32 %v2422_v6, %v3558_v47 }
 0x16c   : > { %v2429_v3 = vpop.f32.mrf.mxu0  ;;  %v2492_v42 = vadd.f32 %v2491_v0, %v3442_v17 }
 0x16d   : > { %v2493_v43 = vpop.f32.mrf.mxu1  ;;  %v1609_v15 = vadd.f32 %v2428_v22, %v3556_v12 }
 0x16e   : > { %v2430_v37 = vpop.f32.mrf.mxu0 }
 0x16f   : > { %v2494_v56 = vpop.f32.mrf.mxu1  ;;  %v2431_v28 = vadd.f32 %v2430_v37, %v2429_v3  ;;  %v3560_v3 = vld [vmem:[#allocation6_spill] sm:$0xff]  ;;  %v1706_v17 = vadd.f32 %v2492_v42, %v1609_v15  ;;  %v3561_v19 = vld [vmem:[#allocation15_spill] sm:$0xff] }
 0x170   : > { %v2530_v51 = vpop.f32.mrf.mxu0  ;;  %v2495_v44 = vadd.f32 %v2494_v56, %v2493_v43  ;;  %v1698_v56 = vadd.f32 %v2486_v38, %v1601_v52  ;;  %v2489_v49 = vadd.f32 %v3561_v19, %v3436_v46 }
 0x171   : > { %v2538_v4 = vpop.f32.mrf.mxu1  ;;  %v1755_v39 = vadd.f32 %v2530_v51, %v1658_v32  ;;  %v1612_v32 = vadd.f32 %v2431_v28, %v3560_v3 }
 0x172   : > { %v1787_v54 = vadd.f32 %v2538_v4, %v1690_v36  ;;  %v1746_v18 = vpop.f32.mrf.mxu0  ;;  %v1677_v4 = vadd.f32 %v2471_v62, %v1580_v8  ;;  %v1669_v62 = vadd.f32 %v3455_v31, %v3460_v1 }
 0x173   : > { %v1778_v50 = vpop.f32.mrf.mxu1  ;;  %v1747_v25 = vadd.f32 %v1746_v18, %v3557_v10  ;;  %v1811_v41 = vmax.f32 %v1755_v39, 0.0  ;;  %v1709_v6 = vadd.f32 %v2495_v44, %v1612_v32 }
 0x174   : > { %v1779_v14 = vadd.f32 %v1778_v50, %v1682_v11  ;;  %v2531_v20 = vpop.f32.mrf.mxu0  ;;  %v1819_v27 = vmax.f32 %v1787_v54, 0.0  ;;  %v1701_v50 = vadd.f32 %v2489_v49, %v1604_v16 }
 0x175   : > { %v2539_v40 = vpop.f32.mrf.mxu1  ;;  %v1758_v23 = vadd.f32 %v2531_v20, %v1661_v5  ;;  %v1809_v45 = vmax.f32 %v1747_v25, 0.0 }
 0x176   : > { %v1790_v26 = vadd.f32 %v2539_v40, %v1693_v21  ;;  %v1749_v48 = vpop.f32.mrf.mxu0  ;;  %v1817_v61 = vmax.f32 %v1779_v14, 0.0 }
 0x177   : > { %v1781_v53 = vpop.f32.mrf.mxu1  ;;  %v1812_v37 = vmax.f32 %v1758_v23, 0.0  ;;  %v1750_v30 = vadd.f32 %v1749_v48, %v1653_v59 }
 0x178   : > { %v1820_v57 = vmax.f32 %v1790_v26, 0.0  ;;  %v1782_v60 = vadd.f32 %v1781_v53, %v1685_v29  ;;  %v2534_v0 = vpop.f32.mrf.mxu0 }
 0x179   : > { %v2542_v5 = vpop.f32.mrf.mxu1  ;;  %v2201_v55 = vpack.c.bf16 %v1812_v37, %v1811_v41  ;;  %v1810_v63 = vmax.f32 %v1750_v30, 0.0  ;;  %v1771_v51 = vadd.f32 %v2534_v0, %v1674_v33 }
 0x17a   : > { %v2221_v2 = vpack.c.bf16 %v1820_v57, %v1819_v27  ;;  %v1818_v22 = vmax.f32 %v1782_v60, 0.0  ;;  %v1803_v59 = vadd.f32 %v2542_v5, %v1706_v17  ;;  %v1762_v43 = vpop.f32.mrf.mxu0 }
 0x17b   : > { %v1794_v36 = vpop.f32.mrf.mxu1  ;;  %2233 = vst [vmem:[%s3495_s19 + $0x8] sm:$0xff] %v2201_v55   ;;  %v2196_v58 = vpack.c.bf16 %v1810_v63, %v1809_v45  ;;  %v1763_v7 = vadd.f32 %v1762_v43, %v3457_v35  ;;  %v1815_v46 = vmax.f32 %v1771_v51, 0.0 }
 0x17c   : > { %2237 = vst [vmem:[%s3495_s19 + $0x28] sm:$0xff] %v2221_v2   ;;  %v2216_v9 = vpack.c.bf16 %v1818_v22, %v1817_v61  ;;  %v1795_v28 = vadd.f32 %v1794_v36, %v1698_v56  ;;  %v2535_v39 = vpop.f32.mrf.mxu0  ;;  %v1823_v13 = vmax.f32 %v1803_v59, 0.0 }
 0x17d   : > { %v2543_v54 = vpop.f32.mrf.mxu1  ;;  %2197 = vst [vmem:[%s3495_s19] sm:$0xff] %v2196_v58   ;;  %v1774_v18 = vadd.f32 %v2535_v39, %v1677_v4  ;;  %v1813_v38 = vmax.f32 %v1763_v7, 0.0 }
 0x17e   : > { %2236 = vst [vmem:[%s3495_s19 + $0x20] sm:$0xff] %v2216_v9   ;;  %v1806_v11 = vadd.f32 %v2543_v54, %v1709_v6  ;;  %v1765_v8 = vpop.f32.mrf.mxu0  ;;  %v1821_v12 = vmax.f32 %v1795_v28, 0.0 }
 0x17f   : > { %v1797_v21 = vpop.f32.mrf.mxu1  ;;  %v1816_v35 = vmax.f32 %v1774_v18, 0.0  ;;  %v1766_v33 = vadd.f32 %v1765_v8, %v1669_v62 }
 0x180   : > { %v1824_v29 = vmax.f32 %v1806_v11, 0.0  ;;  %v1798_v34 = vadd.f32 %v1797_v21, %v1701_v50 }
 0x181   : > { %v2211_v15 = vpack.c.bf16 %v1816_v35, %v1815_v46  ;;  %v1814_v25 = vmax.f32 %v1766_v33, 0.0 }
 0x182   : > { %v2231_v10 = vpack.c.bf16 %v1824_v29, %v1823_v13  ;;  %v1822_v14 = vmax.f32 %v1798_v34, 0.0 }
 0x183   : > { %2235 = vst [vmem:[%s3495_s19 + $0x18] sm:$0xff] %v2211_v15   ;;  %v2206_v31 = vpack.c.bf16 %v1814_v25, %v1813_v38 }
 0x184   : > { %2239 = vst [vmem:[%s3495_s19 + $0x38] sm:$0xff] %v2231_v10   ;;  %v2226_v1 = vpack.c.bf16 %v1822_v14, %v1821_v12 }
 0x185   : > { %2234 = vst [vmem:[%s3495_s19 + $0x10] sm:$0xff] %v2206_v31  }
 0x186   : > { %2238 = vst [vmem:[%s3495_s19 + $0x30] sm:$0xff] %v2226_v1  }
 0x187 PF: > { %s13_s16 = sadd.s32 1, %s2721_s16   ;;  %s3562_s12 = smov %s2713_s14 }
 0x188   : > { %p10_p7 = scmp.ge.s32.totalorder %s13_s16, 6   ;;  %s3563_s13 = smov %s2717_s15 }
 0x189   : > { %s3564_s14 = smov %s3567_s17  ;;  %s3565_s15 = smov %s3571_s18 }
 0x18a   :  { %12 = sbr.rel (!%p10_p7) target bundleno = 3 (0x3), region = 69 }

// kernel: classification_model_forward.9
= control target key start
LH: loop header
LB: loop body
LE: loop exit
PB: predicated region body
PF: predicated region fallthrough
CT: control target
= control target key end

     0   :  { %s4011_s12 = smov 0   ;;  %s4013_s13 = smov 0   ;;  %s5398_s0 = inlined_call_operand.vmem [shape: bf16[2,18,18,128], index: 0, kind: input, shape index: {}]   ;;  %s5399_s1 = inlined_call_operand.vmem [shape: bf16[1152,768], index: 1, kind: input, shape index: {}]   ;;  %s5400_s2 = inlined_call_operand.vmem [shape: f32[1,768], index: 2, kind: input, shape index: {}]   ;;  %s5401_s3 = inlined_call_operand.vmem [shape: f32[2,256,768], index: 3, kind: output, shape index: {}]  }
   0x1   :  { %s4015_s14 = smov 0   ;;  %s4017_s15 = smov 0  }
   0x2   :  { %s4019_s16 = smov 0   ;;  %s4021_s17 = smov 0  }
   0x3   :  { %s4023_s18 = smov 0   ;;  %s4025_s19 = smov 0  }
   0x4   :  { %s4027_s20 = smov 0   ;;  %s4029_s21 = smov 0  }
   0x5   :  { %s4031_s22 = smov 0  }
   0x6 LB: > { %s25_s23 = sadd.s32 1, %s3976_s19  ;;  %s28_s24 = sadd.s32 1, %s3980_s20  ;;  %s3988_s22 = sphi %s4031_s22, %s13_s22   ;;  %s3984_s21 = sphi %s4029_s21, %s5462_s21   ;;  %s3980_s20 = sphi %s4027_s20, %s5461_s20   ;;  %s3976_s19 = sphi %s4025_s19, %s5460_s19   ;;  %s3972_s18 = sphi %s4023_s18, %s5459_s18   ;;  %s3968_s17 = sphi %s4021_s17, %s5458_s17   ;;  %s3964_s16 = sphi %s4019_s16, %s5457_s16   ;;  %s3960_s15 = sphi %s4017_s15, %s5456_s15   ;;  %s3956_s14 = sphi %s4015_s14, %s5455_s14   ;;  %s3952_s13 = sphi %s4013_s13, %s5454_s13   ;;  %s3948_s12 = sphi %s4011_s12, %s5453_s12  }
   0x7   : > { %p26_p0 = scmp.ge.s32.totalorder %s25_s23, 3  ;;  %s3200_s25 = sadd.s32 4294967295, %s3988_s22  }
   0x8   : > { %s32_s26 = sadd.s32 1, %s3984_s21  ;;  %s65_s28 = sadd.s32 1, %s3960_s15 }
   0x9   : > { %s5464_s23 = smov (%p26_p0, %s25_s23), 0  ;;  %s5466_s24 = smov (!%p26_p0, %s28_s24), %s3980_s20 }
   0xa   : > { %s62_s27 = ssub.s32 %s3976_s19, %s5464_s23  ;;  %p30_p1 = scmp.ge.s32.totalorder %s5466_s24, 2 }
   0xb   : > { %p63_p2 = scmp.eq.s32.totalorder %s62_s27, 0  ;;  %p72_p3 = scmp.ne.s32.totalorder %s3960_s15, %s3956_s14 }
   0xc   : > { %p73_p4 = scmp.eq.s32.totalorder %s3988_s22, 0  ;;  %s5468_s24 = smov (%p30_p1, %s5466_s24), 0 }
   0xd   : > { %s5470_s26 = smov (!%p30_p1, %s32_s26), %s3984_s21  ;;  %s115_s4 = ssub.s32 %s3980_s20, %s5468_s24 }
   0xe   : > { %s4083_s29 = scalar_select %p63_p2, %s3960_s15, %s65_s28  }
   0xf   : > { %p34_p5 = scmp.ge.s32.totalorder %s5470_s26, 2  ;;  %p4085_p6 = por %p73_p4, %p72_p3 }
  0x10   : > { %p131_p7 = scmp.ne.s32.totalorder %s3952_s13, %s3948_s12  ;;  %p132_p8 = scmp.eq.s32.totalorder %s3200_s25, 11 }
  0x11   : > { %s5472_s26 = smov (%p34_p5, %s5470_s26), 0  ;;  %s121_s9 = sadd.s32 1, %s3952_s13 }
  0x12   : > { %5404 = sst [smem:[#allocation4_spill]] %s5472_s26  ;;  %s114_s5 = ssub.s32 %s3984_s21, %s5472_s26 }
  0x13   : > { %s116_s6 = sor.u32 %s115_s4, %s114_s5  ;;  %p4097_p9 = por %p132_p8, %p131_p7 }
  0x14   : > { %s118_s8 = sor.u32 %s116_s6, %s62_s27  ;;  %p3203_p11 = scmp.ge.s32.totalorder %s3988_s22, 12 }
  0x15   : > { %p119_p10 = scmp.eq.s32.totalorder %s118_s8, 0 }
  0x16   : > { %154 = sbr.rel (%p3203_p11) target bundleno = 104 (0x68), region = 16 }
  0x17   : > { %s4103_s10 = scalar_select %p119_p10, %s3952_s13, %s121_s9  }
  0x1b   : > { %165 = sbr.rel (!%p4085_p6) target bundleno = 104 (0x68), region = 24  ;;  %s167_s11 = sand.u32 (%p4085_p6), 1, %s3960_s15  }
  0x1c   : > { %s3436_s25 = sshll.u32 (%p4085_p6), %s3976_s19, 3  ;;  %s3454_s28 = smul.u32 (%p4085_p6), 1152, %s167_s11 }
  0x1d   : > { %s4113_s26 = scalar_lea.vmem (%p4085_p6), %s5399_s1, %s3436_s25 }
  0x1e   : > { %v487_v0 = vld [vmem:[%s4113_s26] sm:$0xff] (%p4085_p6)  ;;  %v489_v1 = vld [vmem:[%s4113_s26 + $0x18] sm:$0xff] (%p4085_p6)  ;;  %v491_v2 = vld [vmem:[%s4113_s26 + $0x30] sm:$0xff] (%p4085_p6)  ;;  %s4121_s27 = scalar_lea.vmem (%p4085_p6), [#allocation2], %s3454_s28 }
  0x1f   : > { %v493_v3 = vld [vmem:[%s4113_s26 + $0x48] sm:$0xff] (%p4085_p6)  ;;  %v495_v4 = vld [vmem:[%s4113_s26 + $0x60] sm:$0xff] (%p4085_p6)  ;;  %v497_v5 = vld [vmem:[%s4113_s26 + $0x78] sm:$0xff] (%p4085_p6)  ;;  %488 = vst [vmem:[%s4121_s27] sm:$0xff] (%p4085_p6), %v487_v0 }
  0x20   : > { %490 = vst [vmem:[%s4121_s27 + $0x8] sm:$0xff] %v489_v1  ;;  %492 = vst [vmem:[%s4121_s27 + $0x10] sm:$0xff] %v491_v2  ;;  %v499_v6 = vld [vmem:[%s4113_s26 + $0x90] sm:$0xff]  ;;  %v501_v7 = vld [vmem:[%s4113_s26 + $0xa8] sm:$0xff] }
  0x21   : > { %494 = vst [vmem:[%s4121_s27 + $0x18] sm:$0xff] %v493_v3  ;;  %496 = vst [vmem:[%s4121_s27 + $0x20] sm:$0xff] %v495_v4  ;;  %v503_v8 = vld [vmem:[%s4113_s26 + $0xc0] sm:$0xff]  ;;  %v505_v9 = vld [vmem:[%s4113_s26 + $0xd8] sm:$0xff] }
  0x22   : > { %498 = vst [vmem:[%s4121_s27 + $0x28] sm:$0xff] %v497_v5  ;;  %500 = vst [vmem:[%s4121_s27 + $0x30] sm:$0xff] %v499_v6  ;;  %v507_v10 = vld [vmem:[%s4113_s26 + $0xf0] sm:$0xff]  ;;  %v509_v11 = vld [vmem:[%s4113_s26 + $0x108] sm:$0xff] }
  0x23   : > { %502 = vst [vmem:[%s4121_s27 + $0x38] sm:$0xff] %v501_v7  ;;  %504 = vst [vmem:[%s4121_s27 + $0x40] sm:$0xff] %v503_v8  ;;  %v511_v12 = vld [vmem:[%s4113_s26 + $0x120] sm:$0xff]  ;;  %v513_v13 = vld [vmem:[%s4113_s26 + $0x138] sm:$0xff] }
  0x24   : > { %506 = vst [vmem:[%s4121_s27 + $0x48] sm:$0xff] %v505_v9  ;;  %508 = vst [vmem:[%s4121_s27 + $0x50] sm:$0xff] %v507_v10  ;;  %v515_v14 = vld [vmem:[%s4113_s26 + $0x150] sm:$0xff]  ;;  %v517_v15 = vld [vmem:[%s4113_s26 + $0x168] sm:$0xff] }
  0x25   : > { %510 = vst [vmem:[%s4121_s27 + $0x58] sm:$0xff] %v509_v11  ;;  %512 = vst [vmem:[%s4121_s27 + $0x60] sm:$0xff] %v511_v12  ;;  %v519_v16 = vld [vmem:[%s4113_s26 + $0x180] sm:$0xff]  ;;  %v521_v17 = vld [vmem:[%s4113_s26 + $0x198] sm:$0xff] }
  0x26   : > { %514 = vst [vmem:[%s4121_s27 + $0x68] sm:$0xff] %v513_v13  ;;  %516 = vst [vmem:[%s4121_s27 + $0x70] sm:$0xff] %v515_v14  ;;  %v523_v18 = vld [vmem:[%s4113_s26 + $0x1b0] sm:$0xff]  ;;  %v525_v19 = vld [vmem:[%s4113_s26 + $0x1c8] sm:$0xff] }
  0x27   : > { %518 = vst [vmem:[%s4121_s27 + $0x78] sm:$0xff] %v517_v15  ;;  %520 = vst [vmem:[%s4121_s27 + $0x80] sm:$0xff] %v519_v16  ;;  %v527_v20 = vld [vmem:[%s4113_s26 + $0x1e0] sm:$0xff]  ;;  %v529_v21 = vld [vmem:[%s4113_s26 + $0x1f8] sm:$0xff] }
  0x28   : > { %522 = vst [vmem:[%s4121_s27 + $0x88] sm:$0xff] %v521_v17  ;;  %524 = vst [vmem:[%s4121_s27 + $0x90] sm:$0xff] %v523_v18  ;;  %v531_v22 = vld [vmem:[%s4113_s26 + $0x210] sm:$0xff]  ;;  %v533_v23 = vld [vmem:[%s4113_s26 + $0x228] sm:$0xff] }
  0x29   : > { %526 = vst [vmem:[%s4121_s27 + $0x98] sm:$0xff] %v525_v19  ;;  %528 = vst [vmem:[%s4121_s27 + $0xa0] sm:$0xff] %v527_v20  ;;  %v535_v24 = vld [vmem:[%s4113_s26 + $0x240] sm:$0xff]  ;;  %v537_v25 = vld [vmem:[%s4113_s26 + $0x258] sm:$0xff] }
  0x2a   : > { %530 = vst [vmem:[%s4121_s27 + $0xa8] sm:$0xff] %v529_v21  ;;  %532 = vst [vmem:[%s4121_s27 + $0xb0] sm:$0xff] %v531_v22  ;;  %v539_v26 = vld [vmem:[%s4113_s26 + $0x270] sm:$0xff]  ;;  %v541_v27 = vld [vmem:[%s4113_s26 + $0x288] sm:$0xff] }
  0x2b   : > { %534 = vst [vmem:[%s4121_s27 + $0xb8] sm:$0xff] %v533_v23  ;;  %536 = vst [vmem:[%s4121_s27 + $0xc0] sm:$0xff] %v535_v24  ;;  %v543_v28 = vld [vmem:[%s4113_s26 + $0x2a0] sm:$0xff]  ;;  %v545_v29 = vld [vmem:[%s4113_s26 + $0x2b8] sm:$0xff] }
  0x2c   : > { %538 = vst [vmem:[%s4121_s27 + $0xc8] sm:$0xff] %v537_v25  ;;  %540 = vst [vmem:[%s4121_s27 + $0xd0] sm:$0xff] %v539_v26  ;;  %v547_v30 = vld [vmem:[%s4113_s26 + $0x2d0] sm:$0xff]  ;;  %v549_v31 = vld [vmem:[%s4113_s26 + $0x2e8] sm:$0xff] }
  0x2d   : > { %542 = vst [vmem:[%s4121_s27 + $0xd8] sm:$0xff] %v541_v27  ;;  %544 = vst [vmem:[%s4121_s27 + $0xe0] sm:$0xff] %v543_v28  ;;  %v551_v32 = vld [vmem:[%s4113_s26 + $0x300] sm:$0xff]  ;;  %v553_v33 = vld [vmem:[%s4113_s26 + $0x318] sm:$0xff] }
  0x2e   : > { %546 = vst [vmem:[%s4121_s27 + $0xe8] sm:$0xff] %v545_v29  ;;  %548 = vst [vmem:[%s4121_s27 + $0xf0] sm:$0xff] %v547_v30  ;;  %v555_v34 = vld [vmem:[%s4113_s26 + $0x330] sm:$0xff]  ;;  %v557_v35 = vld [vmem:[%s4113_s26 + $0x348] sm:$0xff] }
  0x2f   : > { %550 = vst [vmem:[%s4121_s27 + $0xf8] sm:$0xff] %v549_v31  ;;  %552 = vst [vmem:[%s4121_s27 + $0x100] sm:$0xff] %v551_v32  ;;  %v559_v36 = vld [vmem:[%s4113_s26 + $0x360] sm:$0xff]  ;;  %v561_v37 = vld [vmem:[%s4113_s26 + $0x378] sm:$0xff] }
  0x30   : > { %554 = vst [vmem:[%s4121_s27 + $0x108] sm:$0xff] %v553_v33  ;;  %556 = vst [vmem:[%s4121_s27 + $0x110] sm:$0xff] %v555_v34  ;;  %v563_v38 = vld [vmem:[%s4113_s26 + $0x390] sm:$0xff]  ;;  %v565_v39 = vld [vmem:[%s4113_s26 + $0x3a8] sm:$0xff] }
  0x31   : > { %558 = vst [vmem:[%s4121_s27 + $0x118] sm:$0xff] %v557_v35  ;;  %560 = vst [vmem:[%s4121_s27 + $0x120] sm:$0xff] %v559_v36  ;;  %v567_v40 = vld [vmem:[%s4113_s26 + $0x3c0] sm:$0xff]  ;;  %v569_v41 = vld [vmem:[%s4113_s26 + $0x3d8] sm:$0xff] }
  0x32   : > { %562 = vst [vmem:[%s4121_s27 + $0x128] sm:$0xff] %v561_v37  ;;  %564 = vst [vmem:[%s4121_s27 + $0x130] sm:$0xff] %v563_v38  ;;  %v571_v42 = vld [vmem:[%s4113_s26 + $0x3f0] sm:$0xff]  ;;  %v573_v43 = vld [vmem:[%s4113_s26 + $0x408] sm:$0xff] }
  0x33   : > { %566 = vst [vmem:[%s4121_s27 + $0x138] sm:$0xff] %v565_v39  ;;  %568 = vst [vmem:[%s4121_s27 + $0x140] sm:$0xff] %v567_v40  ;;  %v575_v44 = vld [vmem:[%s4113_s26 + $0x420] sm:$0xff]  ;;  %v577_v45 = vld [vmem:[%s4113_s26 + $0x438] sm:$0xff] }
  0x34   : > { %570 = vst [vmem:[%s4121_s27 + $0x148] sm:$0xff] %v569_v41  ;;  %572 = vst [vmem:[%s4121_s27 + $0x150] sm:$0xff] %v571_v42  ;;  %v579_v46 = vld [vmem:[%s4113_s26 + $0x450] sm:$0xff]  ;;  %v581_v47 = vld [vmem:[%s4113_s26 + $0x468] sm:$0xff] }
  0x35   : > { %574 = vst [vmem:[%s4121_s27 + $0x158] sm:$0xff] %v573_v43  ;;  %576 = vst [vmem:[%s4121_s27 + $0x160] sm:$0xff] %v575_v44  ;;  %v583_v48 = vld [vmem:[%s4113_s26 + $0x480] sm:$0xff]  ;;  %v585_v49 = vld [vmem:[%s4113_s26 + $0x498] sm:$0xff] }
  0x36   : > { %578 = vst [vmem:[%s4121_s27 + $0x168] sm:$0xff] %v577_v45  ;;  %580 = vst [vmem:[%s4121_s27 + $0x170] sm:$0xff] %v579_v46  ;;  %v587_v50 = vld [vmem:[%s4113_s26 + $0x4b0] sm:$0xff]  ;;  %v589_v51 = vld [vmem:[%s4113_s26 + $0x4c8] sm:$0xff] }
  0x37   : > { %582 = vst [vmem:[%s4121_s27 + $0x178] sm:$0xff] %v581_v47  ;;  %584 = vst [vmem:[%s4121_s27 + $0x180] sm:$0xff] %v583_v48  ;;  %v591_v52 = vld [vmem:[%s4113_s26 + $0x4e0] sm:$0xff]  ;;  %v593_v53 = vld [vmem:[%s4113_s26 + $0x4f8] sm:$0xff] }
  0x38   : > { %586 = vst [vmem:[%s4121_s27 + $0x188] sm:$0xff] %v585_v49  ;;  %588 = vst [vmem:[%s4121_s27 + $0x190] sm:$0xff] %v587_v50  ;;  %v595_v54 = vld [vmem:[%s4113_s26 + $0x510] sm:$0xff]  ;;  %v597_v55 = vld [vmem:[%s4113_s26 + $0x528] sm:$0xff] }
  0x39   : > { %590 = vst [vmem:[%s4121_s27 + $0x198] sm:$0xff] %v589_v51  ;;  %592 = vst [vmem:[%s4121_s27 + $0x1a0] sm:$0xff] %v591_v52  ;;  %v599_v56 = vld [vmem:[%s4113_s26 + $0x540] sm:$0xff]  ;;  %v601_v57 = vld [vmem:[%s4113_s26 + $0x558] sm:$0xff] }
  0x3a   : > { %594 = vst [vmem:[%s4121_s27 + $0x1a8] sm:$0xff] %v593_v53  ;;  %596 = vst [vmem:[%s4121_s27 + $0x1b0] sm:$0xff] %v595_v54  ;;  %v603_v58 = vld [vmem:[%s4113_s26 + $0x570] sm:$0xff]  ;;  %v605_v59 = vld [vmem:[%s4113_s26 + $0x588] sm:$0xff] }
  0x3b   : > { %598 = vst [vmem:[%s4121_s27 + $0x1b8] sm:$0xff] %v597_v55  ;;  %600 = vst [vmem:[%s4121_s27 + $0x1c0] sm:$0xff] %v599_v56  ;;  %v607_v60 = vld [vmem:[%s4113_s26 + $0x5a0] sm:$0xff]  ;;  %v609_v61 = vld [vmem:[%s4113_s26 + $0x5b8] sm:$0xff] }
  0x3c   : > { %602 = vst [vmem:[%s4121_s27 + $0x1c8] sm:$0xff] %v601_v57  ;;  %604 = vst [vmem:[%s4121_s27 + $0x1d0] sm:$0xff] %v603_v58  ;;  %v611_v62 = vld [vmem:[%s4113_s26 + $0x5d0] sm:$0xff]  ;;  %v613_v63 = vld [vmem:[%s4113_s26 + $0x5e8] sm:$0xff] }
  0x3d   : > { %606 = vst [vmem:[%s4121_s27 + $0x1d8] sm:$0xff] %v605_v59  ;;  %608 = vst [vmem:[%s4121_s27 + $0x1e0] sm:$0xff] %v607_v60  ;;  %v615_v0 = vld [vmem:[%s4113_s26 + $0x600] sm:$0xff]  ;;  %v617_v1 = vld [vmem:[%s4113_s26 + $0x618] sm:$0xff] }
  0x3e   : > { %610 = vst [vmem:[%s4121_s27 + $0x1e8] sm:$0xff] %v609_v61  ;;  %612 = vst [vmem:[%s4121_s27 + $0x1f0] sm:$0xff] %v611_v62  ;;  %v619_v2 = vld [vmem:[%s4113_s26 + $0x630] sm:$0xff]  ;;  %v621_v3 = vld [vmem:[%s4113_s26 + $0x648] sm:$0xff] }
  0x3f   : > { %614 = vst [vmem:[%s4121_s27 + $0x1f8] sm:$0xff] %v613_v63  ;;  %616 = vst [vmem:[%s4121_s27 + $0x200] sm:$0xff] %v615_v0  ;;  %v623_v4 = vld [vmem:[%s4113_s26 + $0x660] sm:$0xff]  ;;  %v625_v5 = vld [vmem:[%s4113_s26 + $0x678] sm:$0xff] }
  0x40   : > { %618 = vst [vmem:[%s4121_s27 + $0x208] sm:$0xff] %v617_v1  ;;  %620 = vst [vmem:[%s4121_s27 + $0x210] sm:$0xff] %v619_v2  ;;  %v627_v6 = vld [vmem:[%s4113_s26 + $0x690] sm:$0xff]  ;;  %v629_v7 = vld [vmem:[%s4113_s26 + $0x6a8] sm:$0xff] }
  0x41   : > { %622 = vst [vmem:[%s4121_s27 + $0x218] sm:$0xff] %v621_v3  ;;  %624 = vst [vmem:[%s4121_s27 + $0x220] sm:$0xff] %v623_v4  ;;  %v631_v8 = vld [vmem:[%s4113_s26 + $0x6c0] sm:$0xff]  ;;  %v633_v9 = vld [vmem:[%s4113_s26 + $0x6d8] sm:$0xff] }
  0x42   : > { %626 = vst [vmem:[%s4121_s27 + $0x228] sm:$0xff] %v625_v5  ;;  %628 = vst [vmem:[%s4121_s27 + $0x230] sm:$0xff] %v627_v6  ;;  %v635_v10 = vld [vmem:[%s4113_s26 + $0x6f0] sm:$0xff]  ;;  %v637_v11 = vld [vmem:[%s4113_s26 + $0x708] sm:$0xff] }
  0x43   : > { %630 = vst [vmem:[%s4121_s27 + $0x238] sm:$0xff] %v629_v7  ;;  %632 = vst [vmem:[%s4121_s27 + $0x240] sm:$0xff] %v631_v8  ;;  %v639_v12 = vld [vmem:[%s4113_s26 + $0x720] sm:$0xff]  ;;  %v641_v13 = vld [vmem:[%s4113_s26 + $0x738] sm:$0xff] }
  0x44   : > { %634 = vst [vmem:[%s4121_s27 + $0x248] sm:$0xff] %v633_v9  ;;  %636 = vst [vmem:[%s4121_s27 + $0x250] sm:$0xff] %v635_v10  ;;  %v643_v14 = vld [vmem:[%s4113_s26 + $0x750] sm:$0xff]  ;;  %v645_v15 = vld [vmem:[%s4113_s26 + $0x768] sm:$0xff] }
  0x45   : > { %638 = vst [vmem:[%s4121_s27 + $0x258] sm:$0xff] %v637_v11  ;;  %640 = vst [vmem:[%s4121_s27 + $0x260] sm:$0xff] %v639_v12  ;;  %v647_v16 = vld [vmem:[%s4113_s26 + $0x780] sm:$0xff]  ;;  %v649_v17 = vld [vmem:[%s4113_s26 + $0x798] sm:$0xff] }
  0x46   : > { %642 = vst [vmem:[%s4121_s27 + $0x268] sm:$0xff] %v641_v13  ;;  %644 = vst [vmem:[%s4121_s27 + $0x270] sm:$0xff] %v643_v14  ;;  %v651_v18 = vld [vmem:[%s4113_s26 + $0x7b0] sm:$0xff]  ;;  %v653_v19 = vld [vmem:[%s4113_s26 + $0x7c8] sm:$0xff] }
  0x47   : > { %646 = vst [vmem:[%s4121_s27 + $0x278] sm:$0xff] %v645_v15  ;;  %648 = vst [vmem:[%s4121_s27 + $0x280] sm:$0xff] %v647_v16  ;;  %v655_v20 = vld [vmem:[%s4113_s26 + $0x7e0] sm:$0xff]  ;;  %v657_v21 = vld [vmem:[%s4113_s26 + $0x7f8] sm:$0xff] }
  0x48   : > { %650 = vst [vmem:[%s4121_s27 + $0x288] sm:$0xff] %v649_v17  ;;  %652 = vst [vmem:[%s4121_s27 + $0x290] sm:$0xff] %v651_v18  ;;  %v659_v22 = vld [vmem:[%s4113_s26 + $0x810] sm:$0xff]  ;;  %v661_v23 = vld [vmem:[%s4113_s26 + $0x828] sm:$0xff] }
  0x49   : > { %654 = vst [vmem:[%s4121_s27 + $0x298] sm:$0xff] %v653_v19  ;;  %656 = vst [vmem:[%s4121_s27 + $0x2a0] sm:$0xff] %v655_v20  ;;  %v663_v24 = vld [vmem:[%s4113_s26 + $0x840] sm:$0xff]  ;;  %v665_v25 = vld [vmem:[%s4113_s26 + $0x858] sm:$0xff] }
  0x4a   : > { %658 = vst [vmem:[%s4121_s27 + $0x2a8] sm:$0xff] %v657_v21  ;;  %660 = vst [vmem:[%s4121_s27 + $0x2b0] sm:$0xff] %v659_v22  ;;  %v667_v26 = vld [vmem:[%s4113_s26 + $0x870] sm:$0xff]  ;;  %v669_v27 = vld [vmem:[%s4113_s26 + $0x888] sm:$0xff] }
  0x4b   : > { %662 = vst [vmem:[%s4121_s27 + $0x2b8] sm:$0xff] %v661_v23  ;;  %664 = vst [vmem:[%s4121_s27 + $0x2c0] sm:$0xff] %v663_v24  ;;  %v671_v28 = vld [vmem:[%s4113_s26 + $0x8a0] sm:$0xff]  ;;  %v673_v29 = vld [vmem:[%s4113_s26 + $0x8b8] sm:$0xff] }
  0x4c   : > { %666 = vst [vmem:[%s4121_s27 + $0x2c8] sm:$0xff] %v665_v25  ;;  %668 = vst [vmem:[%s4121_s27 + $0x2d0] sm:$0xff] %v667_v26  ;;  %v675_v30 = vld [vmem:[%s4113_s26 + $0x8d0] sm:$0xff]  ;;  %v677_v31 = vld [vmem:[%s4113_s26 + $0x8e8] sm:$0xff] }
  0x4d   : > { %670 = vst [vmem:[%s4121_s27 + $0x2d8] sm:$0xff] %v669_v27  ;;  %672 = vst [vmem:[%s4121_s27 + $0x2e0] sm:$0xff] %v671_v28  ;;  %v679_v32 = vld [vmem:[%s4113_s26 + $0x900] sm:$0xff]  ;;  %v681_v33 = vld [vmem:[%s4113_s26 + $0x918] sm:$0xff] }
  0x4e   : > { %674 = vst [vmem:[%s4121_s27 + $0x2e8] sm:$0xff] %v673_v29  ;;  %676 = vst [vmem:[%s4121_s27 + $0x2f0] sm:$0xff] %v675_v30  ;;  %v683_v34 = vld [vmem:[%s4113_s26 + $0x930] sm:$0xff]  ;;  %v685_v35 = vld [vmem:[%s4113_s26 + $0x948] sm:$0xff] }
  0x4f   : > { %678 = vst [vmem:[%s4121_s27 + $0x2f8] sm:$0xff] %v677_v31  ;;  %680 = vst [vmem:[%s4121_s27 + $0x300] sm:$0xff] %v679_v32  ;;  %v687_v36 = vld [vmem:[%s4113_s26 + $0x960] sm:$0xff]  ;;  %v689_v37 = vld [vmem:[%s4113_s26 + $0x978] sm:$0xff] }
  0x50   : > { %682 = vst [vmem:[%s4121_s27 + $0x308] sm:$0xff] %v681_v33  ;;  %684 = vst [vmem:[%s4121_s27 + $0x310] sm:$0xff] %v683_v34  ;;  %v691_v38 = vld [vmem:[%s4113_s26 + $0x990] sm:$0xff]  ;;  %v693_v39 = vld [vmem:[%s4113_s26 + $0x9a8] sm:$0xff] }
  0x51   : > { %686 = vst [vmem:[%s4121_s27 + $0x318] sm:$0xff] %v685_v35  ;;  %688 = vst [vmem:[%s4121_s27 + $0x320] sm:$0xff] %v687_v36  ;;  %v695_v40 = vld [vmem:[%s4113_s26 + $0x9c0] sm:$0xff]  ;;  %v697_v41 = vld [vmem:[%s4113_s26 + $0x9d8] sm:$0xff] }
  0x52   : > { %690 = vst [vmem:[%s4121_s27 + $0x328] sm:$0xff] %v689_v37  ;;  %692 = vst [vmem:[%s4121_s27 + $0x330] sm:$0xff] %v691_v38  ;;  %v699_v42 = vld [vmem:[%s4113_s26 + $0x9f0] sm:$0xff]  ;;  %v701_v43 = vld [vmem:[%s4113_s26 + $0xa08] sm:$0xff] }
  0x53   : > { %694 = vst [vmem:[%s4121_s27 + $0x338] sm:$0xff] %v693_v39  ;;  %696 = vst [vmem:[%s4121_s27 + $0x340] sm:$0xff] %v695_v40  ;;  %v703_v44 = vld [vmem:[%s4113_s26 + $0xa20] sm:$0xff]  ;;  %v705_v45 = vld [vmem:[%s4113_s26 + $0xa38] sm:$0xff] }
  0x54   : > { %698 = vst [vmem:[%s4121_s27 + $0x348] sm:$0xff] %v697_v41  ;;  %700 = vst [vmem:[%s4121_s27 + $0x350] sm:$0xff] %v699_v42  ;;  %v707_v46 = vld [vmem:[%s4113_s26 + $0xa50] sm:$0xff]  ;;  %v709_v47 = vld [vmem:[%s4113_s26 + $0xa68] sm:$0xff] }
  0x55   : > { %702 = vst [vmem:[%s4121_s27 + $0x358] sm:$0xff] %v701_v43  ;;  %704 = vst [vmem:[%s4121_s27 + $0x360] sm:$0xff] %v703_v44  ;;  %v711_v48 = vld [vmem:[%s4113_s26 + $0xa80] sm:$0xff]  ;;  %v713_v49 = vld [vmem:[%s4113_s26 + $0xa98] sm:$0xff] }
  0x56   : > { %706 = vst [vmem:[%s4121_s27 + $0x368] sm:$0xff] %v705_v45  ;;  %708 = vst [vmem:[%s4121_s27 + $0x370] sm:$0xff] %v707_v46  ;;  %v715_v50 = vld [vmem:[%s4113_s26 + $0xab0] sm:$0xff]  ;;  %v717_v51 = vld [vmem:[%s4113_s26 + $0xac8] sm:$0xff] }
  0x57   : > { %710 = vst [vmem:[%s4121_s27 + $0x378] sm:$0xff] %v709_v47  ;;  %712 = vst [vmem:[%s4121_s27 + $0x380] sm:$0xff] %v711_v48  ;;  %v719_v52 = vld [vmem:[%s4113_s26 + $0xae0] sm:$0xff]  ;;  %v721_v53 = vld [vmem:[%s4113_s26 + $0xaf8] sm:$0xff] }
  0x58   : > { %714 = vst [vmem:[%s4121_s27 + $0x388] sm:$0xff] %v713_v49  ;;  %716 = vst [vmem:[%s4121_s27 + $0x390] sm:$0xff] %v715_v50  ;;  %v723_v54 = vld [vmem:[%s4113_s26 + $0xb10] sm:$0xff]  ;;  %v725_v55 = vld [vmem:[%s4113_s26 + $0xb28] sm:$0xff] }
  0x59   : > { %718 = vst [vmem:[%s4121_s27 + $0x398] sm:$0xff] %v717_v51  ;;  %720 = vst [vmem:[%s4121_s27 + $0x3a0] sm:$0xff] %v719_v52  ;;  %v727_v56 = vld [vmem:[%s4113_s26 + $0xb40] sm:$0xff]  ;;  %v729_v57 = vld [vmem:[%s4113_s26 + $0xb58] sm:$0xff] }
  0x5a   : > { %722 = vst [vmem:[%s4121_s27 + $0x3a8] sm:$0xff] %v721_v53  ;;  %724 = vst [vmem:[%s4121_s27 + $0x3b0] sm:$0xff] %v723_v54  ;;  %v731_v58 = vld [vmem:[%s4113_s26 + $0xb70] sm:$0xff]  ;;  %v733_v59 = vld [vmem:[%s4113_s26 + $0xb88] sm:$0xff] }
  0x5b   : > { %726 = vst [vmem:[%s4121_s27 + $0x3b8] sm:$0xff] %v725_v55  ;;  %728 = vst [vmem:[%s4121_s27 + $0x3c0] sm:$0xff] %v727_v56  ;;  %v735_v60 = vld [vmem:[%s4113_s26 + $0xba0] sm:$0xff]  ;;  %v737_v61 = vld [vmem:[%s4113_s26 + $0xbb8] sm:$0xff] }
  0x5c   : > { %730 = vst [vmem:[%s4121_s27 + $0x3c8] sm:$0xff] %v729_v57  ;;  %732 = vst [vmem:[%s4121_s27 + $0x3d0] sm:$0xff] %v731_v58  ;;  %v739_v62 = vld [vmem:[%s4113_s26 + $0xbd0] sm:$0xff]  ;;  %v741_v63 = vld [vmem:[%s4113_s26 + $0xbe8] sm:$0xff] }
  0x5d   : > { %734 = vst [vmem:[%s4121_s27 + $0x3d8] sm:$0xff] %v733_v59  ;;  %736 = vst [vmem:[%s4121_s27 + $0x3e0] sm:$0xff] %v735_v60  ;;  %v743_v0 = vld [vmem:[%s4113_s26 + $0xc00] sm:$0xff]  ;;  %v745_v1 = vld [vmem:[%s4113_s26 + $0xc18] sm:$0xff] }
  0x5e   : > { %738 = vst [vmem:[%s4121_s27 + $0x3e8] sm:$0xff] %v737_v61  ;;  %740 = vst [vmem:[%s4121_s27 + $0x3f0] sm:$0xff] %v739_v62  ;;  %v747_v2 = vld [vmem:[%s4113_s26 + $0xc30] sm:$0xff]  ;;  %v749_v3 = vld [vmem:[%s4113_s26 + $0xc48] sm:$0xff] }
  0x5f   : > { %742 = vst [vmem:[%s4121_s27 + $0x3f8] sm:$0xff] %v741_v63  ;;  %744 = vst [vmem:[%s4121_s27 + $0x400] sm:$0xff] %v743_v0  ;;  %v751_v4 = vld [vmem:[%s4113_s26 + $0xc60] sm:$0xff]  ;;  %v753_v5 = vld [vmem:[%s4113_s26 + $0xc78] sm:$0xff] }
  0x60   : > { %746 = vst [vmem:[%s4121_s27 + $0x408] sm:$0xff] %v745_v1  ;;  %748 = vst [vmem:[%s4121_s27 + $0x410] sm:$0xff] %v747_v2  ;;  %v755_v6 = vld [vmem:[%s4113_s26 + $0xc90] sm:$0xff]  ;;  %v757_v7 = vld [vmem:[%s4113_s26 + $0xca8] sm:$0xff] }
  0x61   : > { %750 = vst [vmem:[%s4121_s27 + $0x418] sm:$0xff] %v749_v3  ;;  %752 = vst [vmem:[%s4121_s27 + $0x420] sm:$0xff] %v751_v4  ;;  %v759_v8 = vld [vmem:[%s4113_s26 + $0xcc0] sm:$0xff]  ;;  %v761_v9 = vld [vmem:[%s4113_s26 + $0xcd8] sm:$0xff] }
  0x62   : > { %754 = vst [vmem:[%s4121_s27 + $0x428] sm:$0xff] %v753_v5  ;;  %756 = vst [vmem:[%s4121_s27 + $0x430] sm:$0xff] %v755_v6  ;;  %v763_v10 = vld [vmem:[%s4113_s26 + $0xcf0] sm:$0xff]  ;;  %v765_v11 = vld [vmem:[%s4113_s26 + $0xd08] sm:$0xff] }
  0x63   : > { %758 = vst [vmem:[%s4121_s27 + $0x438] sm:$0xff] %v757_v7  ;;  %760 = vst [vmem:[%s4121_s27 + $0x440] sm:$0xff] %v759_v8  ;;  %v767_v12 = vld [vmem:[%s4113_s26 + $0xd20] sm:$0xff]  ;;  %v769_v13 = vld [vmem:[%s4113_s26 + $0xd38] sm:$0xff] }
  0x64   : > { %762 = vst [vmem:[%s4121_s27 + $0x448] sm:$0xff] %v761_v9  ;;  %764 = vst [vmem:[%s4121_s27 + $0x450] sm:$0xff] %v763_v10  ;;  %v771_v14 = vld [vmem:[%s4113_s26 + $0xd50] sm:$0xff]  ;;  %v773_v15 = vld [vmem:[%s4113_s26 + $0xd68] sm:$0xff] }
  0x65   : > { %766 = vst [vmem:[%s4121_s27 + $0x458] sm:$0xff] %v765_v11  ;;  %768 = vst [vmem:[%s4121_s27 + $0x460] sm:$0xff] %v767_v12 }
  0x66   : > { %770 = vst [vmem:[%s4121_s27 + $0x468] sm:$0xff] %v769_v13  ;;  %772 = vst [vmem:[%s4121_s27 + $0x470] sm:$0xff] %v771_v14 }
  0x67   : > { %774 = vst [vmem:[%s4121_s27 + $0x478] sm:$0xff] %v773_v15 }
  0x68 PF: > { %p3206_p12 = scmp.ge.s32.totalorder %s3988_s22, 1  ;;  %p787_p13 = scmp.lt.s32.totalorder %s3988_s22, 13 }
  0x6a   : > { %p788_p0 = pnand %p3206_p12, %p787_p13 }
  0x6c   : > { %791 = sbr.rel (%p788_p0) target bundleno = 593 (0x251), region = 66 }
  0x71   : > { %s794_s30 = sand.u32 1, %s3956_s14   ;;  %p825_p1 = scmp.lt.s32.totalorder %s3972_s18, 1  ;;  %vm873_vm0 = vsmask.f32 3328  ;;  %vm874_vm1 = vsmask.f32 7440 }
  0x72   : > { %s3455_s6 = smul.u32 1152, %s794_s30  ;;  %vm4498_vm2 = vmor %vm873_vm0, %vm874_vm1  ;;  %vm1092_vm3 = vcmask 1042432   ;;  %vm1093_vm4 = vcmask 1046532   ;;  %s4969_s5 = sshll.u32 %s3964_s16, 1 }
  0x73   : > { %s826_s14 = scalar_select %p825_p1, %s3972_s18, 1  ;;  %vm4543_vm5 = vmor %vm1092_vm3, %vm1093_vm4 }
  0x74   : > { %s4408_s8 = scalar_lea.vmem [#allocation2], %s3455_s6  ;;  %s3437_s9 = smul.u32 96, %s3968_s17 }
  0x75   : > { %v3548_v16 = vld [vmem:[%s4408_s8 + $0x74] ss:$8 sps:$4 sm:$0xff]   ;;  %v3552_v18 = vld [vmem:[%s4408_s8 + $0x70] ss:$8 sps:$4 sm:$0xff]   ;;  %v3554_v20 = vld [vmem:[%s4408_s8 + $0x64] ss:$8 sps:$4 sm:$0xff]  }
  0x76   : > { %v3550_v17 = vld [vmem:[%s4408_s8 + $0x174] ss:$8 sps:$4 sm:$0xff]   ;;  %2215 = vmatprep.subr.bf16.mxu0 %v3548_v16  ;;  %v3553_v19 = vld [vmem:[%s4408_s8 + $0x170] ss:$8 sps:$4 sm:$0xff]   ;;  %v3556_v21 = vld [vmem:[%s4408_s8 + $0x164] ss:$8 sps:$4 sm:$0xff]  }
  0x77   : > { %2328 = vmatprep.subr.bf16.mxu1 %v3550_v17  ;;  %2216 = vmatpush1.bf16.msra.mxu0 %v3552_v18  ;;  %v3558_v22 = vld [vmem:[%s4408_s8 + $0x60] ss:$8 sps:$4 sm:$0xff]   ;;  %v3560_v24 = vld [vmem:[%s4408_s8 + $0x54] ss:$8 sps:$4 sm:$0xff]   ;;  %v3564_v26 = vld [vmem:[%s4408_s8 + $0x50] ss:$8 sps:$4 sm:$0xff]  }
  0x78   : > { %2329 = vmatpush1.bf16.msra.mxu1 %v3553_v19  ;;  %2217 = vmatprep.subr.bf16.mxu0 %v3554_v20  ;;  %v3559_v23 = vld [vmem:[%s4408_s8 + $0x160] ss:$8 sps:$4 sm:$0xff]   ;;  %v3562_v25 = vld [vmem:[%s4408_s8 + $0x154] ss:$8 sps:$4 sm:$0xff]   ;;  %v3565_v27 = vld [vmem:[%s4408_s8 + $0x150] ss:$8 sps:$4 sm:$0xff]  }
  0x79   : > { %2330 = vmatprep.subr.bf16.mxu1 %v3556_v21  ;;  %v3566_v28 = vld [vmem:[%s4408_s8 + $0x44] ss:$8 sps:$4 sm:$0xff]   ;;  %v3570_v30 = vld [vmem:[%s4408_s8 + $0x40] ss:$8 sps:$4 sm:$0xff]   ;;  %v3572_v32 = vld [vmem:[%s4408_s8 + $0x34] ss:$8 sps:$4 sm:$0xff]  }
  0x7a   : > { %v3568_v29 = vld [vmem:[%s4408_s8 + $0x144] ss:$8 sps:$4 sm:$0xff]   ;;  %v3571_v31 = vld [vmem:[%s4408_s8 + $0x140] ss:$8 sps:$4 sm:$0xff]   ;;  %v3574_v33 = vld [vmem:[%s4408_s8 + $0x134] ss:$8 sps:$4 sm:$0xff]  }
  0x7b   : > { %2218 = vmatpush1.bf16.msra.mxu0 %v3558_v22  ;;  %v3576_v34 = vld [vmem:[%s4408_s8 + $0x30] ss:$8 sps:$4 sm:$0xff]   ;;  %v3578_v36 = vld [vmem:[%s4408_s8 + $0x24] ss:$8 sps:$4 sm:$0xff]   ;;  %v3582_v38 = vld [vmem:[%s4408_s8 + $0x20] ss:$8 sps:$4 sm:$0xff]  }
  0x7c   : > { %2331 = vmatpush1.bf16.msra.mxu1 %v3559_v23  ;;  %2219 = vmatprep.subr.bf16.mxu0 %v3560_v24  ;;  %v3577_v35 = vld [vmem:[%s4408_s8 + $0x130] ss:$8 sps:$4 sm:$0xff]   ;;  %v3580_v37 = vld [vmem:[%s4408_s8 + $0x124] ss:$8 sps:$4 sm:$0xff]   ;;  %v3583_v39 = vld [vmem:[%s4408_s8 + $0x120] ss:$8 sps:$4 sm:$0xff]  }
  0x7d   : > { %2332 = vmatprep.subr.bf16.mxu1 %v3562_v25  ;;  %v3584_v40 = vld [vmem:[%s4408_s8 + $0x14] ss:$8 sps:$4 sm:$0xff]   ;;  %v3588_v42 = vld [vmem:[%s4408_s8 + $0x10] ss:$8 sps:$4 sm:$0xff]   ;;  %v3590_v44 = vld [vmem:[%s4408_s8 + $0x4] ss:$8 sps:$4 sm:$0xff]  }
  0x7e   : > { %v3586_v41 = vld [vmem:[%s4408_s8 + $0x114] ss:$8 sps:$4 sm:$0xff]   ;;  %v3589_v43 = vld [vmem:[%s4408_s8 + $0x110] ss:$8 sps:$4 sm:$0xff]   ;;  %v3592_v45 = vld [vmem:[%s4408_s8 + $0x104] ss:$8 sps:$4 sm:$0xff]  }
  0x7f   : > { %2220 = vmatpush1.bf16.msra.mxu0 %v3564_v26  ;;  %v3594_v46 = vld [vmem:[%s4408_s8] ss:$8 sps:$4 sm:$0xff]   ;;  %v3596_v48 = vld [vmem:[%s4408_s8 + $0xf4] ss:$8 sps:$4 sm:$0xff]   ;;  %v3600_v50 = vld [vmem:[%s4408_s8 + $0xf0] ss:$8 sps:$4 sm:$0xff]  }
  0x80   : > { %2333 = vmatpush1.bf16.msra.mxu1 %v3565_v27  ;;  %2221 = vmatprep.subr.bf16.mxu0 %v3566_v28  ;;  %v3595_v47 = vld [vmem:[%s4408_s8 + $0x100] ss:$8 sps:$4 sm:$0xff]   ;;  %v3598_v49 = vld [vmem:[%s4408_s8 + $0x1f4] ss:$8 sps:$4 sm:$0xff]   ;;  %v3601_v51 = vld [vmem:[%s4408_s8 + $0x1f0] ss:$8 sps:$4 sm:$0xff]  }
  0x81   : > { %2334 = vmatprep.subr.bf16.mxu1 %v3568_v29  ;;  %v3602_v52 = vld [vmem:[%s4408_s8 + $0xe4] ss:$8 sps:$4 sm:$0xff]   ;;  %s3456_s26 = smul.u32 216, %s826_s14  ;;  %v3606_v54 = vld [vmem:[%s4408_s8 + $0xe0] ss:$8 sps:$4 sm:$0xff]   ;;  %p832_p2 = scmp.lt.s32.totalorder %s4969_s5, 5 }
  0x82   : > { %v3604_v53 = vld [vmem:[%s4408_s8 + $0x1e4] ss:$8 sps:$4 sm:$0xff]   ;;  %v3607_v55 = vld [vmem:[%s4408_s8 + $0x1e0] ss:$8 sps:$4 sm:$0xff]   ;;  %v3608_v56 = vld [vmem:[%s4408_s8 + $0xd4] ss:$8 sps:$4 sm:$0xff]  }
  0x83   : > { %2222 = vmatpush1.bf16.msra.mxu0 %v3570_v30  ;;  %s829_s28 = scalar_lea.vmem %s5398_s0, %s3456_s26  ;;  %v3610_v57 = vld [vmem:[%s4408_s8 + $0x1d4] ss:$8 sps:$4 sm:$0xff]   ;;  %v3612_v58 = vld [vmem:[%s4408_s8 + $0xd0] ss:$8 sps:$4 sm:$0xff]   ;;  %v3614_v60 = vld [vmem:[%s4408_s8 + $0xc4] ss:$8 sps:$4 sm:$0xff]   ;;  %s3014_s26 = sadd.s32 (%p4097_p9), %s3437_s9, %s4969_s5 }
  0x84   : > { %2335 = vmatpush1.bf16.msra.mxu1 %v3571_v31  ;;  %2223 = vmatprep.subr.bf16.mxu0 %v3572_v32  ;;  %v3613_v59 = vld [vmem:[%s4408_s8 + $0x1d0] ss:$8 sps:$4 sm:$0xff]   ;;  %s4462_s4 = scalar_lea.vmem %s829_s28, %s3437_s9  ;;  %v3616_v61 = vld [vmem:[%s4408_s8 + $0x1c4] ss:$8 sps:$4 sm:$0xff]   ;;  %v3618_v62 = vld [vmem:[%s4408_s8 + $0xc0] ss:$8 sps:$4 sm:$0xff]  }
  0x85   : > { %2336 = vmatprep.subr.bf16.mxu1 %v3574_v33  ;;  %v3619_v63 = vld [vmem:[%s4408_s8 + $0x1c0] ss:$8 sps:$4 sm:$0xff]   ;;  %v3620_v1 = vld [vmem:[%s4408_s8 + $0xb4] ss:$8 sps:$4 sm:$0xff]   ;;  %v4474_v3 = vld [vmem:[%s4462_s4 + $0x4] sm:$0xf] }
  0x86   : > { %v4469_v0 = vld [vmem:[%s4462_s4] sm:$0xf]  ;;  %v3622_v2 = vld [vmem:[%s4408_s8 + $0x1b4] ss:$8 sps:$4 sm:$0xff]   ;;  %v4477_v4 = vld [vmem:[%s4462_s4 + $0x8] sm:$0x1] }
  0x87   : > { %2224 = vmatpush1.bf16.msra.mxu0 %v3576_v34  ;;  %v877_v5 = vshrl.u32 %v4469_v0, 16  ;;  %v880_v6 = vshll.u32 %v4469_v0, 16  ;;  %v886_v7 = vshll.u32 %v4474_v3, 16  ;;  %v890_v8 = vshrl.u32 %v4474_v3, 16  ;;  %v4485_v10 = vld [vmem:[%s4462_s4 + $0xc] sm:$0xf] }
  0x88   : > { %2337 = vmatpush1.bf16.msra.mxu1 %v3577_v35  ;;  %2225 = vmatprep.subr.bf16.mxu0 %v3578_v36  ;;  %v896_v9 = vshll.u32 %v4477_v4, 16  ;;  %v4488_v13 = vld [vmem:[%s4462_s4 + $0x10] sm:$0xf]  ;;  %v901_v14 = vshrl.u32 %v4485_v10, 16  ;;  %v904_v15 = vshll.u32 %v4485_v10, 16  ;;  %s833_s27 = scalar_select %p832_p2, %s4969_s5, 5 }
  0x89   : > { %2338 = vmatprep.subr.bf16.mxu1 %v3580_v37  ;;  %v879_v11 = vrot.slane %v877_v5, 4  ;;  %v882_v12 = vrot.slane %v880_v6, 5  ;;  %v888_v16 = vrot.slane %v886_v7, 5  ;;  %v892_v17 = vrot.slane %v890_v8, 4  ;;  %v3624_v18 = vld [vmem:[%s4408_s8 + $0xb0] ss:$8 sps:$4 sm:$0xff]  }
  0x8a   : > { %v898_v20 = vrot.slane %v896_v9, 5  ;;  %v910_v21 = vshll.u32 %v4488_v13, 16  ;;  %v914_v22 = vshrl.u32 %v4488_v13, 16  ;;  %v3625_v23 = vld [vmem:[%s4408_s8 + $0x1b0] ss:$8 sps:$4 sm:$0xff]   ;;  %v903_v26 = vrot.slane %v901_v14, 4 }
  0x8b   : > { %2226 = vmatpush1.bf16.msra.mxu0 %v3582_v38  ;;  %v883_v19 = vor.u32 %v882_v12, %v879_v11  ;;  %v893_v25 = vor.u32 %v892_v17, %v888_v16  ;;  %v906_v27 = vrot.slane %v904_v15, 5  ;;  %v4504_v28 = vcombine.low %v4485_v10, %v4488_v13  ;;  %v3626_v29 = vld [vmem:[%s4408_s8 + $0xa4] ss:$8 sps:$4 sm:$0xff]   ;;  %v3630_v32 = vld [vmem:[%s4408_s8 + $0xa0] ss:$8 sps:$4 sm:$0xff]   ;;  %s822_s16 = sand.u32 1, %s3948_s12  }
  0x8c   : > { %2339 = vmatpush1.bf16.msra.mxu1 %v3583_v39  ;;  %2227 = vmatprep.subr.bf16.mxu0 %v3584_v40  ;;  %v3628_v30 = vld [vmem:[%s4408_s8 + $0x1a4] ss:$8 sps:$4 sm:$0xff]   ;;  %v3631_v33 = vld [vmem:[%s4408_s8 + $0x1a0] ss:$8 sps:$4 sm:$0xff]   ;;  %v916_v35 = vrot.slane %v914_v22, 4  ;;  %v1097_v40 = vrot.slane %v4474_v3, 5 }
  0x8d   : > { %2340 = vmatprep.subr.bf16.mxu1 %v3586_v41  ;;  %v884_v31 = vrot.slane %v883_v19, 4  ;;  %v894_v34 = vrot.slane %v893_v25, 4  ;;  %2360 = vmatprep.mubr.bf16.mxu1 %v4504_v28  ;;  %v3632_v36 = vld [vmem:[%s4408_s8 + $0x94] ss:$8 sps:$4 sm:$0xff]   ;;  %v3642_v5 = vld [vmem:[%s4408_s8 + $0x80] ss:$8 sps:$4 sm:$0xff]  }
  0x8e   : > { %v3634_v38 = vld [vmem:[%s4408_s8 + $0x194] ss:$8 sps:$4 sm:$0xff]   ;;  %v3214_v8 = vrot.slane %v4485_v10, 9  ;;  %v4558_v15 = vld [vmem:[%s4462_s4 + $0x20] sm:$0x1]  ;;  %s5229_s14 = sshll.u32 %s822_s16, 8 }
  0x8f   : > { %2228 = vmatpush1.bf16.msra.mxu0 %v3588_v42  ;;  %v889_v37 = vsel %vm4498_vm2, %v884_v31, %v888_v16  ;;  %v899_v39 = vsel %vm4498_vm2, %v894_v34, %v898_v20  ;;  %v4519_v41 = vld [vmem:[%s4462_s4 + $0x14] sm:$0x1]  ;;  %v907_v42 = vor.u32 %v906_v27, %v903_v26  ;;  %v4563_v17 = vld [vmem:[%s4462_s4 + $0x24] sm:$0xf]  ;;  %v4573_v22 = vld [vmem:[%s4462_s4 + $0x28] sm:$0xf] }
  0x90   : > { %2341 = vmatpush1.bf16.msra.mxu1 %v3589_v43  ;;  %2229 = vmatprep.subr.bf16.mxu0 %v3590_v44  ;;  %v4521_v43 = vrot.slane %v910_v21, 5  ;;  %v3231_v44 = vcombine.low %v889_v37, %v899_v39  ;;  %v3648_v7 = vld [vmem:[%s4408_s8 + $0x274] ss:$8 sps:$4 sm:$0xff]   ;;  %v1107_v14 = vrot.slane %v4519_v41, 5  ;;  %v944_v21 = vshll.u32 %v4558_v15, 16  ;;  %s5244_s12 = scalar_lea.vmem [#allocation3], %s5229_s14 }
  0x91   : > { %2342 = vmatprep.subr.bf16.mxu1 %v3592_v45  ;;  %v920_v45 = vshll.u32 %v4519_v41, 16  ;;  %v3651_v10 = vld [vmem:[%s4408_s8 + $0x374] ss:$8 sps:$4 sm:$0xff]   ;;  %v949_v25 = vshrl.u32 %v4563_v17, 16  ;;  %v952_v26 = vshll.u32 %v4563_v17, 16  ;;  %v962_v27 = vshrl.u32 %v4573_v22, 16 }
  0x92   : > { %2247 = vmatprep.mubr.bf16.mxu0 %v3231_v44  ;;  %v3646_v31 = vld [vmem:[%s4408_s8 + $0x270] ss:$8 sps:$4 sm:$0xff]   ;;  %v3657_v34 = vld [vmem:[%s4408_s8 + $0x364] ss:$8 sps:$4 sm:$0xff]   ;;  %v946_v39 = vrot.slane %v944_v21, 5  ;;  %v958_v44 = vshll.u32 %v4573_v22, 16 }
  0x93   : > { %2230 = vmatpush1.bf16.msra.mxu0 %v3594_v46  ;;  %v4525_v46 = vld [vmem:[%s4462_s4 + $0x18] sm:$0xf]  ;;  %v3655_v41 = vld [vmem:[%s4408_s8 + $0x360] ss:$8 sps:$4 sm:$0xff]   ;;  %s3458_s11 = smul.u32 (%p4097_p9), 192, %s3972_s18 }
  0x94   : > { %2343 = vmatpush1.bf16.msra.mxu1 %v3595_v47  ;;  %2231 = vmatprep.subr.bf16.mxu0 %v3596_v48  ;;  %v4528_v47 = vld [vmem:[%s4462_s4 + $0x1c] sm:$0xf]  ;;  %v3636_v48 = vld [vmem:[%s4408_s8 + $0x90] ss:$8 sps:$4 sm:$0xff]  }
  0x95   : > { %2344 = vmatprep.subr.bf16.mxu1 %v3598_v49  ;;  %v3637_v49 = vld [vmem:[%s4408_s8 + $0x190] ss:$8 sps:$4 sm:$0xff]   ;;  %v934_v6 = vshll.u32 %v4528_v47, 16  ;;  %s3016_s17 = sadd.s32 (%p4097_p9), %s3458_s11, %s3014_s26 }
  0x96   : > { %v4648_v21 = vld [vmem:[%s4462_s4 + $0x38] sm:$0x1]  ;;  %s3433_s7 = sshll.u32 (%p4097_p9), %s3016_s17, 3 }
  0x97   : > { %2232 = vmatpush2.bf16.msra.mxu0 %v3600_v50  ;;  %v917_v50 = vor.u32 %v916_v35, %v4521_v43  ;;  %v4560_v16 = vrot.slane %v934_v6, 5  ;;  %v4587_v35 = vcombine.low %v4525_v46, %v4528_v47  ;;  %v3662_v6 = vld [vmem:[%s4408_s8 + $0x350] ss:$8 sps:$4 sm:$0xff]   ;;  %s5311_s18 = scalar_lea.vmem (%p4097_p9), %s5401_s3, %s3433_s7 }
  0x98   : > { %2345 = vmatpush2.bf16.msra.mxu1 %v3601_v51  ;;  %2233 = vmatprep.subr.bf16.mxu0 %v3602_v52  ;;  %v925_v51 = vshrl.u32 %v4525_v46, 16  ;;  %v3638_v52 = vld [vmem:[%s4408_s8 + $0x84] ss:$8 sps:$4 sm:$0xff]  }
  0x99   : > { %2346 = vmatprep.subr.bf16.mxu1 %v3604_v53  ;;  %v3640_v53 = vld [vmem:[%s4408_s8 + $0x184] ss:$8 sps:$4 sm:$0xff]  }
  0x9b   : > { %2234 = vmatpush2.bf16.msra.mxu0 %v3606_v54  ;;  %v928_v54 = vshll.u32 %v4525_v46, 16 }
  0x9c   : > { %2347 = vmatpush2.bf16.msra.mxu1 %v3607_v55  ;;  %2235 = vmatprep.subr.bf16.mxu0 %v3608_v56  ;;  %v938_v55 = vshrl.u32 %v4528_v47, 16  ;;  %v1104_v56 = vrot.slane %v4488_v13, 5 }
  0x9d   : > { %2348 = vmatprep.subr.bf16.mxu1 %v3610_v57  ;;  %v1100_v57 = vrot.slane %v4477_v4, 5  ;;  %v3643_v4 = vld [vmem:[%s4408_s8 + $0x180] ss:$8 sps:$4 sm:$0xff]  }
  0x9e   : > { %v1106_v9 = vrot.slane %v1104_v56, 4  ;;  %v940_v11 = vrot.slane %v938_v55, 4  ;;  %v3664_v55 = vld [vmem:[%s4408_s8 + $0x354] ss:$8 sps:$4 sm:$0xff]  }
  0x9f   : > { %2236 = vmatpush2.bf16.msra.mxu0 %v3612_v58  ;;  %v3213_v58 = vrot.slane %v4469_v0, 9 }
  0xa0   : > { %2349 = vmatpush2.bf16.msra.mxu1 %v3613_v59  ;;  %2237 = vmatprep.subr.bf16.mxu0 %v3614_v60  ;;  %v1099_v59 = vrot.slane %v1097_v40, 4  ;;  %v908_v60 = vrot.slane %v907_v42, 4  ;;  %v951_v42 = vrot.slane %v949_v25, 4 }
  0xa1   : > { %2350 = vmatprep.subr.bf16.mxu1 %v3616_v61  ;;  %v1098_v12 = vsel %vm4543_vm5, %v3213_v58, %v1097_v40  ;;  %v3652_v40 = vld [vmem:[%s4408_s8 + $0x260] ss:$8 sps:$4 sm:$0xff]   ;;  %v3659_v58 = vld [vmem:[%s4408_s8 + $0x250] ss:$8 sps:$4 sm:$0xff]  }
  0xa2   : > { %v1101_v13 = vsel %vm4543_vm5, %v1099_v59, %v1100_v57 }
  0xa3   : > { %2238 = vmatpush2.bf16.msra.mxu0 %v3618_v62  ;;  %v918_v62 = vrot.slane %v917_v50, 4  ;;  %v4601_v50 = vld [vmem:[%s4462_s4 + $0x2c] sm:$0x1] }
  0xa4   : > { %2351 = vmatpush2.bf16.msra.mxu1 %v3619_v63  ;;  %2239 = vmatprep.subr.bf16.mxu0 %v3620_v1  ;;  %v922_v63 = vrot.slane %v920_v45, 5  ;;  %v927_v1 = vrot.slane %v925_v51, 4  ;;  %v964_v45 = vrot.slane %v962_v27, 4  ;;  %v4603_v51 = vrot.slane %v958_v44, 5 }
  0xa5   : > { %2352 = vmatprep.subr.bf16.mxu1 %v3622_v2  ;;  %v930_v2 = vrot.slane %v928_v54, 5  ;;  %v1118_v27 = vrot.slane %v4573_v22, 5  ;;  %v1121_v44 = vrot.slane %v4601_v50, 5 }
  0xa6   : > { %v923_v19 = vsel %vm4498_vm2, %v918_v62, %v922_v63  ;;  %v968_v62 = vshll.u32 %v4601_v50, 16 }
  0xa7   : > { %2240 = vmatpush2.bf16.msra.mxu0 %v3624_v18  ;;  %v913_v18 = vsel %vm4498_vm2, %v908_v60, %v4521_v43  ;;  %v931_v20 = vor.u32 %v930_v2, %v927_v1  ;;  %v954_v43 = vrot.slane %v952_v26, 5  ;;  %v965_v60 = vor.u32 %v964_v45, %v4603_v51  ;;  %v4652_v26 = vld [vmem:[%s4462_s4 + $0x3c] sm:$0xf] }
  0xa8   : > { %2353 = vmatpush2.bf16.msra.mxu1 %v3625_v23  ;;  %2241 = vmatprep.subr.bf16.mxu0 %v3626_v29  ;;  %v941_v23 = vor.u32 %v940_v11, %v4560_v16  ;;  %v3223_v29 = vcombine.low %v4469_v0, %v4474_v3  ;;  %v1108_v0 = vsel %vm4543_vm5, %v1106_v9, %v1107_v14  ;;  %v3215_v1 = vrot.slane %v4525_v46, 9 }
  0xa9   : > { %2354 = vmatprep.subr.bf16.mxu1 %v3628_v30  ;;  %v3239_v30 = vcombine.low %v1098_v12, %v1101_v13  ;;  %v4593_v3 = vcombine.low %v913_v18, %v923_v19  ;;  %v932_v37 = vrot.slane %v931_v20, 4  ;;  %v955_v59 = vor.u32 %v954_v43, %v951_v42  ;;  %v3665_v12 = vld [vmem:[%s4408_s8 + $0x240] ss:$8 sps:$4 sm:$0xff]   ;;  %v3674_v20 = vld [vmem:[%s4408_s8 + $0x234] ss:$8 sps:$4 sm:$0xff]  }
  0xaa   : > { %v4636_v11 = vcombine.low %v4563_v17, %v4573_v22  ;;  %v3668_v13 = vld [vmem:[%s4408_s8 + $0x340] ss:$8 sps:$4 sm:$0xff]   ;;  %v992_v22 = vshll.u32 %v4648_v21, 16  ;;  %v1120_v43 = vrot.slane %v1118_v27, 4 }
  0xab   : > { %2242 = vmatpush2.bf16.msra.mxu0 %v3630_v32  ;;  %v3649_v32 = vld [vmem:[%s4408_s8 + $0x370] ss:$8 sps:$4 sm:$0xff]   ;;  %v956_v14 = vrot.slane %v955_v59, 4 }
  0xac   : > { %2355 = vmatpush2.bf16.msra.mxu1 %v3631_v33  ;;  %2243 = vmatprep.subr.bf16.mxu0 %v3632_v36  ;;  %v3654_v33 = vld [vmem:[%s4408_s8 + $0x264] ss:$8 sps:$4 sm:$0xff]   ;;  %v1105_v36 = vsel %vm4543_vm5, %v3214_v8, %v1104_v56 }
  0xad   : > { %2356 = vmatprep.subr.bf16.mxu1 %v3634_v38  ;;  %v942_v38 = vrot.slane %v941_v23, 4  ;;  %v4611_v54 = vcombine.low %v1105_v36, %v1108_v0  ;;  %v3670_v8 = vld [vmem:[%s4408_s8 + $0x344] ss:$8 sps:$4 sm:$0xff]   ;;  %v3672_v36 = vld [vmem:[%s4408_s8 + $0x230] ss:$8 sps:$4 sm:$0xff]  }
  0xae   : > { %v3675_v0 = vld [vmem:[%s4408_s8 + $0x330] ss:$8 sps:$4 sm:$0xff]  }
  0xaf   : > { %2244 = vmatpush2.bf16.msra.mxu0 %v3636_v48  ;;  %v3661_v48 = vld [vmem:[%s4408_s8 + $0x254] ss:$8 sps:$4 sm:$0xff]   ;;  %v947_v56 = vsel %vm4498_vm2, %v942_v38, %v946_v39  ;;  %v3683_v38 = vld [vmem:[%s4408_s8 + $0x324] ss:$8 sps:$4 sm:$0xff]   ;;  %v961_v39 = vsel %vm4498_vm2, %v956_v14, %v4603_v51 }
  0xb0   : > { %2357 = vmatpush2.bf16.msra.mxu1 %v3637_v49  ;;  %2245 = vmatprep.subr.bf16.mxu0 %v3638_v52  ;;  %v1111_v49 = vrot.slane %v4528_v47, 5  ;;  %v4606_v52 = vld [vmem:[%s4462_s4 + $0x30] sm:$0xf]  ;;  %v937_v47 = vsel %vm4498_vm2, %v932_v37, %v4560_v16  ;;  %v970_v16 = vrot.slane %v968_v62, 5  ;;  %v3680_v37 = vld [vmem:[%s4408_s8 + $0x224] ss:$8 sps:$4 sm:$0xff]  }
  0xb1   : > { %2358 = vmatprep.subr.bf16.mxu1 %v3640_v53  ;;  %v4609_v53 = vld [vmem:[%s4462_s4 + $0x34] sm:$0xf]  ;;  %v973_v57 = vshrl.u32 %v4606_v52, 16  ;;  %v976_v63 = vshll.u32 %v4606_v52, 16  ;;  %v4632_v9 = vcombine.low %v937_v47, %v947_v56  ;;  %v3678_v47 = vld [vmem:[%s4408_s8 + $0x220] ss:$8 sps:$4 sm:$0xff]  }
  0xb2   : > { %v1113_v2 = vrot.slane %v1111_v49, 4  ;;  %v1112_v18 = vsel %vm4543_vm5, %v3215_v1, %v1111_v49  ;;  %v982_v23 = vshll.u32 %v4609_v53, 16  ;;  %v1125_v49 = vrot.slane %v4609_v53, 5 }
  0xb3   : > { %2246 = vmatpush2.bf16.msra.mxu0 %v3642_v5  ;;  %v1114_v5 = vrot.slane %v4558_v15, 5  ;;  %v975_v46 = vrot.slane %v973_v57, 4  ;;  %v966_v15 = vrot.slane %v965_v60, 4  ;;  %v4688_v57 = vcombine.low %v4606_v52, %v4609_v53  ;;  %v4695_v60 = vld [vmem:[%s4462_s4 + $0x44] sm:$0x1] }
  0xb4   : > { %2359 = vmatpush2.bf16.msra.mxu1 %v3643_v4  ;;  %2441 = vmatprep.subr.bf16.mxu0 %v3648_v7  ;;  %v986_v4 = vshrl.u32 %v4609_v53, 16  ;;  %v3667_v7 = vld [vmem:[%s4408_s8 + $0x244] ss:$8 sps:$4 sm:$0xff]   ;;  %v1122_v53 = vsel %vm4543_vm5, %v1120_v43, %v1121_v44  ;;  %v3217_v1 = vrot.slane %v4606_v52, 9  ;;  %v1016_v14 = vshll.u32 %v4695_v60, 16 }
  0xb5   : > { %2554 = vmatprep.subr.bf16.mxu1 %v3651_v10  ;;  %v978_v10 = vrot.slane %v976_v63, 5  ;;  %v1115_v19 = vsel %vm4543_vm5, %v1113_v2, %v1114_v5  ;;  %v4699_v63 = vld [vmem:[%s4462_s4 + $0x48] sm:$0xf]  ;;  %v1128_v2 = vrot.slane %v4648_v21, 5  ;;  %v3688_v21 = vld [vmem:[%s4408_s8 + $0x310] ss:$8 sps:$4 sm:$0xff]  }
  0xb6   : > { %2248 = vmatmul.mubr.bf16.vlgmr.msra.gmra.mxu0 %v3223_v29  ;;  %v988_v25 = vrot.slane %v986_v4, 4  ;;  %v4706_v4 = vld [vmem:[%s4462_s4 + $0x4c] sm:$0xf]  ;;  %v4751_v44 = vld [vmem:[%s4462_s4 + $0x54] sm:$0xf] }
  0xb7   : > { %2361 = vmatmul.mubr.bf16.vlgmr.msra.gmra.mxu1 %v3239_v30  ;;  %2442 = vmatpush1.bf16.msra.mxu0 %v3646_v31  ;;  %v979_v29 = vor.u32 %v978_v10, %v975_v46  ;;  %v4656_v30 = vrot.slane %v982_v23, 5  ;;  %v4659_v31 = vld [vmem:[%s4462_s4 + $0x40] sm:$0xf]  ;;  %v1127_v46 = vrot.slane %v1125_v49, 4  ;;  %v3693_v23 = vld [vmem:[%s4408_s8 + $0x204] ss:$8 sps:$4 sm:$0xff]  }
  0xb8   : > { %2555 = vmatpush1.bf16.msra.mxu1 %v3649_v32  ;;  %2443 = vmatprep.subr.bf16.mxu0 %v3654_v33  ;;  %v997_v32 = vshrl.u32 %v4652_v26, 16  ;;  %v1000_v33 = vshll.u32 %v4652_v26, 16  ;;  %v1010_v45 = vshrl.u32 %v4659_v31, 16  ;;  %v1006_v62 = vshll.u32 %v4659_v31, 16 }
  0xb9   : > { %2556 = vmatprep.subr.bf16.mxu1 %v3657_v34  ;;  %2257 = vmatprep.mubr.bf16.mxu0 %v4593_v3  ;;  %v4665_v34 = vcombine.low %v1112_v18, %v1115_v19  ;;  %v989_v42 = vor.u32 %v988_v25, %v4656_v30  ;;  %v3685_v18 = vld [vmem:[%s4408_s8 + $0x210] ss:$8 sps:$4 sm:$0xff]   ;;  %v4731_v25 = vcombine.low %v4652_v26, %v4659_v31 }
  0xba   : > { %2370 = vmatprep.mubr.bf16.mxu1 %v4587_v35  ;;  %v999_v51 = vrot.slane %v997_v32, 4  ;;  %v1012_v5 = vrot.slane %v1010_v45, 4  ;;  %v4756_v45 = vld [vmem:[%s4462_s4 + $0x58] sm:$0xf] }
  0xbb   : > { %2444 = vmatpush1.bf16.msra.mxu0 %v3652_v40  ;;  %v971_v40 = vsel %vm4498_vm2, %v966_v15, %v970_v16  ;;  %v990_v50 = vrot.slane %v989_v42, 4  ;;  %v1021_v15 = vshrl.u32 %v4699_v63, 16  ;;  %v1024_v16 = vshll.u32 %v4699_v63, 16  ;;  %v4748_v42 = vld [vmem:[%s4462_s4 + $0x50] sm:$0x1] }
  0xbc   : > { %2557 = vmatpush1.bf16.msra.mxu1 %v3655_v41  ;;  %2445 = vmatprep.subr.bf16.mxu0 %v3661_v48  ;;  %v3216_v41 = vrot.slane %v4563_v17, 9  ;;  %v980_v48 = vrot.slane %v979_v29, 4  ;;  %v3681_v17 = vld [vmem:[%s4408_s8 + $0x320] ss:$8 sps:$4 sm:$0xff]   ;;  %v4684_v56 = vcombine.low %v961_v39, %v971_v40  ;;  %v1030_v39 = vshll.u32 %v4706_v4, 16 }
  0xbd   : > { %2558 = vmatprep.subr.bf16.mxu1 %v3664_v55  ;;  %v1002_v55 = vrot.slane %v1000_v33, 5  ;;  %v1132_v33 = vrot.slane %v4659_v31, 5  ;;  %v3700_v40 = vld [vmem:[%s4408_s8 + $0x2f4] ss:$8 sps:$4 sm:$0xff]  }
  0xbe   : > { %2258 = vmatmul.mubr.bf16.gmra.mxu0 %v4504_v28  ;;  %v3677_v28 = vld [vmem:[%s4408_s8 + $0x334] ss:$8 sps:$4 sm:$0xff]   ;;  %v1119_v59 = vsel %vm4543_vm5, %v3216_v41, %v1118_v27  ;;  %v3696_v27 = vld [vmem:[%s4408_s8 + $0x304] ss:$8 sps:$4 sm:$0xff]   ;;  %v4753_v31 = vrot.slane %v1030_v39, 5 }
  0xbf   : > { %2371 = vmatmul.mubr.bf16.gmra.mxu1 %v4611_v54  ;;  %2446 = vmatpush1.bf16.msra.mxu0 %v3659_v58  ;;  %v994_v58 = vrot.slane %v992_v22, 5  ;;  %v4722_v10 = vcombine.low %v1119_v59, %v1122_v53  ;;  %v1018_v22 = vrot.slane %v1016_v14, 5  ;;  %v1040_v59 = vshll.u32 %v4748_v42, 16 }
  0xc0   : > { %2559 = vmatpush1.bf16.msra.mxu1 %v3662_v6  ;;  %2447 = vmatprep.subr.bf16.mxu0 %v3667_v7  ;;  %v3687_v6 = vld [vmem:[%s4408_s8 + $0x214] ss:$8 sps:$4 sm:$0xff]   ;;  %v1048_v53 = vshll.u32 %v4751_v44, 16 }
  0xc1   : > { %2560 = vmatprep.subr.bf16.mxu1 %v3670_v8  ;;  %2267 = vmatprep.mubr.bf16.mxu0 %v4632_v9  ;;  %v3690_v7 = vld [vmem:[%s4408_s8 + $0x314] ss:$8 sps:$4 sm:$0xff]   ;;  %v985_v8 = vsel %vm4498_vm2, %v980_v48, %v4656_v30  ;;  %v995_v52 = vsel %vm4498_vm2, %v990_v50, %v994_v58  ;;  %v1129_v30 = vsel %vm4543_vm5, %v1127_v46, %v1128_v2  ;;  %v3701_v2 = vld [vmem:[%s4408_s8 + $0x3f0] ss:$8 sps:$4 sm:$0xff]  }
  0xc2   : > { %2380 = vmatprep.mubr.bf16.mxu1 %v4636_v11  ;;  %v4736_v29 = vcombine.low %v985_v8, %v995_v52 }
  0xc3   : > { %2448 = vmatpush1.bf16.msra.mxu0 %v3665_v12  ;;  %v1003_v12 = vor.u32 %v1002_v55, %v999_v51  ;;  %v3218_v51 = vrot.slane %v4652_v26, 9  ;;  %v1134_v55 = vrot.slane %v1132_v33, 4  ;;  %v3698_v26 = vld [vmem:[%s4408_s8 + $0x2f0] ss:$8 sps:$4 sm:$0xff]  }
  0xc4   : > { %2561 = vmatpush1.bf16.msra.mxu1 %v3668_v13  ;;  %2449 = vmatprep.subr.bf16.mxu0 %v3674_v20  ;;  %v4713_v13 = vrot.slane %v1006_v62, 5  ;;  %v1034_v20 = vshrl.u32 %v4706_v4, 16  ;;  %v1045_v62 = vshrl.u32 %v4751_v44, 16 }
  0xc5   : > { %2562 = vmatprep.subr.bf16.mxu1 %v3677_v28  ;;  %v1126_v28 = vsel %vm4543_vm5, %v3217_v1, %v1125_v49  ;;  %v1004_v32 = vrot.slane %v1003_v12, 4  ;;  %v3703_v49 = vld [vmem:[%s4408_s8 + $0x3f4] ss:$8 sps:$4 sm:$0xff]   ;;  %v1058_v1 = vshrl.u32 %v4756_v45, 16  ;;  %v1133_v8 = vsel %vm4543_vm5, %v3218_v51, %v1132_v33  ;;  %v3704_v12 = vld [vmem:[%s4408_s8 + $0x2e0] ss:$8 sps:$4 sm:$0xff]  }
  0xc6   : > { %2268 = vmatmul.mubr.bf16.gmra.mxu0 %v4587_v35  ;;  %v1013_v19 = vor.u32 %v1012_v5, %v4713_v13  ;;  %v1036_v43 = vrot.slane %v1034_v20, 4  ;;  %v4758_v48 = vcombine.low %v1126_v28, %v1129_v30  ;;  %v3706_v5 = vld [vmem:[%s4408_s8 + $0x2e4] ss:$8 sps:$4 sm:$0xff]   ;;  %v4796_v28 = vld [vmem:[%s4462_s4 + $0x5c] sm:$0x1] }
  0xc7   : > { %2381 = vmatmul.mubr.bf16.gmra.mxu1 %v4665_v34  ;;  %2450 = vmatpush1.bf16.msra.mxu0 %v3672_v36  ;;  %v3691_v36 = vld [vmem:[%s4408_s8 + $0x200] ss:$8 sps:$4 sm:$0xff]   ;;  %v1060_v20 = vrot.slane %v1058_v1, 4  ;;  %v3716_v30 = vld [vmem:[%s4408_s8 + $0x3d4] ss:$8 sps:$4 sm:$0xff]   ;;  %v1064_v39 = vshll.u32 %v4796_v28, 16 }
  0xc8   : > { %2563 = vmatpush1.bf16.msra.mxu1 %v3675_v0  ;;  %2451 = vmatprep.subr.bf16.mxu0 %v3680_v37  ;;  %v3694_v0 = vld [vmem:[%s4408_s8 + $0x300] ss:$8 sps:$4 sm:$0xff]   ;;  %v1023_v37 = vrot.slane %v1021_v15, 4  ;;  %v1014_v41 = vrot.slane %v1013_v19, 4  ;;  %v1037_v58 = vor.u32 %v1036_v43, %v4753_v31  ;;  %v1042_v15 = vrot.slane %v1040_v59, 5 }
  0xc9   : > { %2564 = vmatprep.subr.bf16.mxu1 %v3683_v38  ;;  %2277 = vmatprep.mubr.bf16.mxu0 %v4684_v56  ;;  %v1026_v38 = vrot.slane %v1024_v16, 5  ;;  %v1047_v16 = vrot.slane %v1045_v62, 4  ;;  %v1054_v19 = vshll.u32 %v4756_v45, 16  ;;  %v1142_v43 = vrot.slane %v4748_v42, 5  ;;  %v3717_v51 = vld [vmem:[%s4408_s8 + $0x2c0] ss:$8 sps:$4 sm:$0xff]  }
  0xca   : > { %2390 = vmatprep.mubr.bf16.mxu1 %v4688_v57  ;;  %v1038_v14 = vrot.slane %v1037_v58, 4  ;;  %v3729_v62 = vld [vmem:[%s4408_s8 + $0x3b4] ss:$8 sps:$4 sm:$0xff]   ;;  %v3727_v1 = vld [vmem:[%s4408_s8 + $0x3b0] ss:$8 sps:$4 sm:$0xff]  }
  0xcb   : > { %2452 = vmatpush1.bf16.msra.mxu0 %v3678_v47  ;;  %v1135_v47 = vrot.slane %v4695_v60, 5  ;;  %v1027_v50 = vor.u32 %v1026_v38, %v1023_v37  ;;  %v1019_v60 = vsel %vm4498_vm2, %v1014_v41, %v1018_v22 }
  0xcc   : > { %2565 = vmatpush1.bf16.msra.mxu1 %v3681_v17  ;;  %2453 = vmatprep.subr.bf16.mxu0 %v3687_v6  ;;  %v1009_v17 = vsel %vm4498_vm2, %v1004_v32, %v4713_v13  ;;  %v3709_v6 = vld [vmem:[%s4408_s8 + $0x3e4] ss:$8 sps:$4 sm:$0xff]   ;;  %v1056_v32 = vrot.slane %v1054_v19, 5  ;;  %v1043_v22 = vsel %vm4498_vm2, %v1038_v14, %v1042_v15  ;;  %v3733_v19 = vld [vmem:[%s4408_s8 + $0x3a0] ss:$8 sps:$4 sm:$0xff]  }
  0xcd   : > { %2566 = vmatprep.subr.bf16.mxu1 %v3690_v7  ;;  %v4781_v7 = vcombine.low %v4699_v63, %v4706_v4  ;;  %v1136_v46 = vsel %vm4543_vm5, %v1134_v55, %v1135_v47  ;;  %v4788_v13 = vcombine.low %v1009_v17, %v1019_v60  ;;  %v1028_v52 = vrot.slane %v1027_v50, 4  ;;  %v3720_v50 = vld [vmem:[%s4408_s8 + $0x3c0] ss:$8 sps:$4 sm:$0xff]   ;;  %v3726_v60 = vld [vmem:[%s4408_s8 + $0x2b4] ss:$8 sps:$4 sm:$0xff]  }
  0xce   : > { %2278 = vmatmul.mubr.bf16.gmra.mxu0 %v4636_v11  ;;  %v4802_v33 = vcombine.low %v1133_v8, %v1136_v46  ;;  %v1061_v38 = vor.u32 %v1060_v20, %v1056_v32  ;;  %v4821_v47 = vcombine.low %v4751_v44, %v4756_v45  ;;  %v1066_v17 = vrot.slane %v1064_v39, 5  ;;  %v4847_v8 = vld [vmem:[%s4462_s4 + $0x64] sm:$0xf] }
  0xcf   : > { %2391 = vmatmul.mubr.bf16.gmra.mxu1 %v4722_v10  ;;  %2454 = vmatpush1.bf16.msra.mxu0 %v3685_v18  ;;  %v1050_v18 = vrot.slane %v1048_v53, 5  ;;  %v3724_v53 = vld [vmem:[%s4408_s8 + $0x2b0] ss:$8 sps:$4 sm:$0xff]   ;;  %v3220_v46 = vrot.slane %v4751_v44, 9  ;;  %v3732_v14 = vld [vmem:[%s4408_s8 + $0x2a4] ss:$8 sps:$4 sm:$0xff]  }
  0xd0   : > { %2567 = vmatpush1.bf16.msra.mxu1 %v3688_v21  ;;  %2455 = vmatprep.subr.bf16.mxu0 %v3693_v23  ;;  %v3707_v21 = vld [vmem:[%s4408_s8 + $0x3e0] ss:$8 sps:$4 sm:$0xff]   ;;  %v1139_v23 = vrot.slane %v4706_v4, 5  ;;  %v1033_v4 = vsel %vm4498_vm2, %v1028_v52, %v4753_v31  ;;  %v3722_v31 = vld [vmem:[%s4408_s8 + $0x3c4] ss:$8 sps:$4 sm:$0xff]   ;;  %v1062_v42 = vrot.slane %v1061_v38, 4 }
  0xd1   : > { %2568 = vmatprep.subr.bf16.mxu1 %v3696_v27  ;;  %2287 = vmatprep.mubr.bf16.mxu0 %v4736_v29  ;;  %v3713_v27 = vld [vmem:[%s4408_s8 + $0x2d4] ss:$8 sps:$4 sm:$0xff]   ;;  %v1051_v37 = vor.u32 %v1050_v18, %v1047_v16  ;;  %v4817_v55 = vcombine.low %v1033_v4, %v1043_v22  ;;  %v1149_v52 = vrot.slane %v4796_v28, 5  ;;  %v3735_v15 = vld [vmem:[%s4408_s8 + $0x3a4] ss:$8 sps:$4 sm:$0xff]  }
  0xd2   : > { %2400 = vmatprep.mubr.bf16.mxu1 %v4731_v25  ;;  %v1141_v41 = vrot.slane %v1139_v23, 4  ;;  %v3730_v44 = vld [vmem:[%s4408_s8 + $0x2a0] ss:$8 sps:$4 sm:$0xff]   ;;  %v3742_v28 = vld [vmem:[%s4408_s8 + $0x394] ss:$8 sps:$4 sm:$0xff]  }
  0xd3   : > { %2456 = vmatpush1.bf16.msra.mxu0 %v3691_v36  ;;  %v3711_v36 = vld [vmem:[%s4408_s8 + $0x2d0] ss:$8 sps:$4 sm:$0xff]   ;;  %v3748_v4 = vld [vmem:[%s4408_s8 + $0x384] ss:$8 sps:$4 sm:$0xff]   ;;  %v3746_v22 = vld [vmem:[%s4408_s8 + $0x380] ss:$8 sps:$4 sm:$0xff]  }
  0xd4   : > { %2569 = vmatpush1.bf16.msra.mxu1 %v3694_v0  ;;  %2457 = vmatprep.subr.bf16.mxu0 %v3700_v40  ;;  %v3714_v0 = vld [vmem:[%s4408_s8 + $0x3d0] ss:$8 sps:$4 sm:$0xff]   ;;  %v3219_v40 = vrot.slane %v4699_v63, 9  ;;  %v1052_v63 = vrot.slane %v1051_v37, 4  ;;  %v1143_v59 = vsel %vm4543_vm5, %v1141_v41, %v1142_v43  ;;  %v3751_v37 = vld [vmem:[%s4408_s8 + $0x474] ss:$8 sps:$4 sm:$0xff]  }
  0xd5   : > { %2570 = vmatprep.subr.bf16.mxu1 %v3703_v49  ;;  %v3719_v49 = vld [vmem:[%s4408_s8 + $0x2c4] ss:$8 sps:$4 sm:$0xff]   ;;  %v3749_v38 = vld [vmem:[%s4408_s8 + $0x470] ss:$8 sps:$4 sm:$0xff]   ;;  %v3763_v43 = vld [vmem:[%s4408_s8 + $0x434] ss:$8 sps:$4 sm:$0xff]  }
  0xd6   : > { %2288 = vmatmul.mubr.bf16.gmra.mxu0 %v4688_v57  ;;  %v1140_v58 = vsel %vm4543_vm5, %v3219_v40, %v1139_v23  ;;  %v3739_v23 = vld [vmem:[%s4408_s8 + $0x294] ss:$8 sps:$4 sm:$0xff]   ;;  %v3754_v39 = vld [vmem:[%s4408_s8 + $0x464] ss:$8 sps:$4 sm:$0xff]   ;;  %v3752_v40 = vld [vmem:[%s4408_s8 + $0x460] ss:$8 sps:$4 sm:$0xff]  }
  0xd7   : > { %2401 = vmatmul.mubr.bf16.gmra.mxu1 %v4758_v48  ;;  %2458 = vmatpush2.bf16.msra.mxu0 %v3698_v26  ;;  %v1146_v26 = vrot.slane %v4756_v45, 5  ;;  %v1067_v45 = vsel %vm4498_vm2, %v1062_v42, %v1066_v17  ;;  %v3755_v41 = vld [vmem:[%s4408_s8 + $0x450] ss:$8 sps:$4 sm:$0xff]  }
  0xd8   : > { %2571 = vmatpush2.bf16.msra.mxu1 %v3701_v2  ;;  %2459 = vmatprep.subr.bf16.mxu0 %v3706_v5  ;;  %v4838_v2 = vld [vmem:[%s4462_s4 + $0x60] sm:$0xf]  ;;  %v4840_v5 = vcombine.low %v1140_v58, %v1143_v59  ;;  %v869_v59 = vld [vmem:[%s4462_s4 + $0x68] sm:$0x1] }
  0xd9   : > { %2572 = vmatprep.subr.bf16.mxu1 %v3709_v6  ;;  %2297 = vmatprep.mubr.bf16.mxu0 %v4788_v13  ;;  %v1057_v6 = vsel %vm4498_vm2, %v1052_v63, %v1056_v32  ;;  %v4857_v18 = vcombine.low %v4838_v2, %v4847_v8  ;;  %v1147_v20 = vsel %vm4543_vm5, %v3220_v46, %v1146_v26  ;;  %v3740_v32 = vld [vmem:[%s4408_s8 + $0x390] ss:$8 sps:$4 sm:$0xff]   ;;  %v1161_v63 = vshll.u32 %v4847_v8, 16 }
  0xda   : > { %2410 = vmatprep.mubr.bf16.mxu1 %v4781_v7  ;;  %v4853_v16 = vcombine.low %v1057_v6, %v1067_v45  ;;  %v1171_v45 = vshll.u32 %v869_v59, 16 }
  0xdb   : > { %2460 = vmatpush2.bf16.msra.mxu0 %v3704_v12  ;;  %v1148_v12 = vrot.slane %v1146_v26, 4  ;;  %v3767_v26 = vld [vmem:[%s4408_s8 + $0x410] ss:$8 sps:$4 sm:$0xff]  }
  0xdc   : > { %2573 = vmatpush2.bf16.msra.mxu1 %v3707_v21  ;;  %2461 = vmatprep.subr.bf16.mxu0 %v3713_v27 }
  0xdd   : > { %2574 = vmatprep.subr.bf16.mxu1 %v3716_v30  ;;  %v1150_v21 = vsel %vm4543_vm5, %v1148_v12, %v1149_v52  ;;  %v3737_v30 = vld [vmem:[%s4408_s8 + $0x290] ss:$8 sps:$4 sm:$0xff]  }
  0xde   : > { %2298 = vmatmul.mubr.bf16.gmra.mxu0 %v4731_v25  ;;  %v4871_v27 = vcombine.low %v1147_v20, %v1150_v21 }
  0xdf   : > { %2411 = vmatmul.mubr.bf16.gmra.mxu1 %v4802_v33  ;;  %2462 = vmatpush2.bf16.msra.mxu0 %v3711_v36  ;;  %v3745_v36 = vld [vmem:[%s4408_s8 + $0x284] ss:$8 sps:$4 sm:$0xff]  }
  0xe0   : > { %2575 = vmatpush2.bf16.msra.mxu1 %v3714_v0  ;;  %2463 = vmatprep.subr.bf16.mxu0 %v3719_v49  ;;  %v3743_v0 = vld [vmem:[%s4408_s8 + $0x280] ss:$8 sps:$4 sm:$0xff]   ;;  %v3761_v49 = vld [vmem:[%s4408_s8 + $0x430] ss:$8 sps:$4 sm:$0xff]  }
  0xe1   : > { %2576 = vmatprep.subr.bf16.mxu1 %v3722_v31  ;;  %2307 = vmatprep.mubr.bf16.mxu0 %v4817_v55  ;;  %v1155_v31 = vshll.u32 %v4838_v2, 16 }
  0xe2   : > { %2420 = vmatprep.mubr.bf16.mxu1 %v4821_v47 }
  0xe3   : > { %2464 = vmatpush2.bf16.msra.mxu0 %v3717_v51  ;;  %v1165_v51 = vshrl.u32 %v4847_v8, 16  ;;  %v1157_v17 = vrot.slane %v1155_v31, 5 }
  0xe4   : > { %2577 = vmatpush2.bf16.msra.mxu1 %v3720_v50  ;;  %2465 = vmatprep.subr.bf16.mxu0 %v3726_v60  ;;  %v1163_v50 = vrot.slane %v1161_v63, 5  ;;  %v4915_v60 = vld [vmem:[%s4462_s4 + $0x6c] sm:$0xf] }
  0xe5   : > { %2578 = vmatprep.subr.bf16.mxu1 %v3729_v62  ;;  %v1167_v58 = vrot.slane %v1165_v51, 4  ;;  %v4918_v62 = vld [vmem:[%s4462_s4 + $0x70] sm:$0xf]  ;;  %v1186_v46 = vshrl.u32 %v4915_v60, 16  ;;  %v1189_v12 = vshll.u32 %v4915_v60, 16 }
  0xe6   : > { %2308 = vmatmul.mubr.bf16.gmra.mxu0 %v4781_v7  ;;  %v1195_v52 = vshll.u32 %v4918_v62, 16  ;;  %v1214_v24 = vrot.slane %v4918_v62, 5 }
  0xe7   : > { %2421 = vmatmul.mubr.bf16.gmra.mxu1 %v4840_v5  ;;  %2466 = vmatpush2.bf16.msra.mxu0 %v3724_v53  ;;  %v3773_v53 = vld [vmem:[%s4408_s8 + $0x404] ss:$8 sps:$4 sm:$0xff]   ;;  %v1168_v6 = vor.u32 %v1167_v58, %v1163_v50  ;;  %v1191_v20 = vrot.slane %v1189_v12, 5 }
  0xe8   : > { %2579 = vmatpush2.bf16.msra.mxu1 %v3727_v1  ;;  %2467 = vmatprep.subr.bf16.mxu0 %v3732_v14  ;;  %v3771_v14 = vld [vmem:[%s4408_s8 + $0x400] ss:$8 sps:$4 sm:$0xff]   ;;  %v1197_v21 = vrot.slane %v1195_v52, 5 }
  0xe9   : > { %2580 = vmatprep.subr.bf16.mxu1 %v3735_v15  ;;  %2317 = vmatprep.mubr.bf16.mxu0 %v4853_v16  ;;  %v1169_v15 = vrot.slane %v1168_v6, 4 }
  0xea   : > { %2430 = vmatprep.mubr.bf16.mxu1 %v4857_v18 }
  0xeb   : > { %2468 = vmatpush2.bf16.msra.mxu0 %v3730_v44  ;;  %v1173_v44 = vrot.slane %v1171_v45, 5 }
  0xec   : > { %2581 = vmatpush2.bf16.msra.mxu1 %v3733_v19  ;;  %2469 = vmatprep.subr.bf16.mxu0 %v3739_v23  ;;  %v1188_v19 = vrot.slane %v1186_v46, 4 }
  0xed   : > { %2582 = vmatprep.subr.bf16.mxu1 %v3742_v28  ;;  %v872_v28 = vld [vmem:[%s4462_s4 + $0x74] sm:$0x1] }
  0xee   : > { %2318 = vmatmul.mubr.bf16.gmra.mxu0 %v4821_v47 }
  0xef   : > { %2431 = vmatmul.mubr.bf16.gmra.mxu1 %v4871_v27  ;;  %2470 = vmatpush2.bf16.msra.mxu0 %v3737_v30 }
  0xf0   : > { %2583 = vmatpush2.bf16.msra.mxu1 %v3740_v32  ;;  %2471 = vmatprep.subr.bf16.mxu0 %v3745_v36  ;;  %v1180_v32 = vrot.slane %v4847_v8, 5  ;;  %v1174_v36 = vsel %vm4498_vm2, %v1169_v15, %v1173_v44 }
  0xf1   : > { %2584 = vmatprep.subr.bf16.mxu1 %v3748_v4  ;;  %2473 = vmatprep.mubr.bf16.mxu0 %v4611_v54  ;;  %v3757_v54 = vld [vmem:[%s4408_s8 + $0x454] ss:$8 sps:$4 sm:$0xff]   ;;  %v1192_v4 = vor.u32 %v1191_v20, %v1188_v19 }
  0xf2   : > { %2586 = vmatprep.mubr.bf16.mxu1 %v4632_v9 }
  0xf3   : > { %2472 = vmatpush2.bf16.msra.mxu0 %v3743_v0 }
  0xf4   : > { %2585 = vmatpush2.bf16.msra.mxu1 %v3746_v22  ;;  %2667 = vmatprep.subr.bf16.mxu0 %v3751_v37  ;;  %v1205_v22 = vshll.u32 %v872_v28, 16 }
  0xf5   : > { %3438 = vmatprep.subr.bf16.mxu1 %v3751_v37 }
  0xf6   : > { %2474 = vmatmul.mubr.bf16.vlgmr.msra.gmra.mxu0 %v4593_v3  ;;  %v3760_v3 = vld [vmem:[%s4408_s8 + $0x444] ss:$8 sps:$4 sm:$0xff]  }
  0xf7   : > { %2587 = vmatmul.mubr.bf16.vlgmr.msra.gmra.mxu1 %v4587_v35  ;;  %2668 = vmatpush1.bf16.msra.mxu0 %v3749_v38  ;;  %v3758_v35 = vld [vmem:[%s4408_s8 + $0x440] ss:$8 sps:$4 sm:$0xff]  }
  0xf8   : > { %3446 = vmatpush1.bf16.msra.mxu1 %v3749_v38  ;;  %2483 = vmatprep.mubr.bf16.mxu0 %v4665_v34  ;;  %v1182_v38 = vrot.slane %v1180_v32, 4 }
  0xf9   : > { %2596 = vmatprep.mubr.bf16.mxu1 %v4684_v56  ;;  %2669 = vmatprep.subr.bf16.mxu0 %v3754_v39 }
  0xfa   : > { %3439 = vmatprep.subr.bf16.mxu1 %v3754_v39  ;;  %v1193_v39 = vrot.slane %v1192_v4, 4 }
  0xfb   : > { %2670 = vmatpush1.bf16.msra.mxu0 %v3752_v40 }
  0xfc   : > { %3447 = vmatpush1.bf16.msra.mxu1 %v3752_v40  ;;  %2671 = vmatprep.subr.bf16.mxu0 %v3757_v54 }
  0xfd   : > { %3440 = vmatprep.subr.bf16.mxu1 %v3757_v54  ;;  %v1207_v54 = vrot.slane %v1205_v22, 5 }
  0xfe   : > { %2484 = vmatmul.mubr.bf16.gmra.mxu0 %v4632_v9  ;;  %v3766_v9 = vld [vmem:[%s4408_s8 + $0x424] ss:$8 sps:$4 sm:$0xff]  }
  0xff   : > { %2597 = vmatmul.mubr.bf16.gmra.mxu1 %v4636_v11  ;;  %2493 = vmatprep.mubr.bf16.mxu0 %v4722_v10  ;;  %v1152_v11 = vshrl.u32 %v4838_v2, 16 }
 0x100   : > { %2606 = vmatprep.mubr.bf16.mxu1 %v4736_v29  ;;  %2672 = vmatpush1.bf16.msra.mxu0 %v3755_v41 }
 0x101   : > { %3448 = vmatpush1.bf16.msra.mxu1 %v3755_v41  ;;  %2673 = vmatprep.subr.bf16.mxu0 %v3760_v3  ;;  %v1154_v42 = vrot.slane %v1152_v11, 4 }
 0x102   : > { %3441 = vmatprep.subr.bf16.mxu1 %v3760_v3 }
 0x103   : > { %v1158_v1 = vor.u32 %v1157_v17, %v1154_v42 }
 0x104   : > { %2674 = vmatpush1.bf16.msra.mxu0 %v3758_v35 }
 0x105   : > { %3449 = vmatpush1.bf16.msra.mxu1 %v3758_v35  ;;  %2675 = vmatprep.subr.bf16.mxu0 %v3763_v43 }
 0x106   : > { %3442 = vmatprep.subr.bf16.mxu1 %v3763_v43  ;;  %2494 = vmatmul.mubr.bf16.gmra.mxu0 %v4684_v56  ;;  %v3764_v56 = vld [vmem:[%s4408_s8 + $0x420] ss:$8 sps:$4 sm:$0xff]  }
 0x107   : > { %2607 = vmatmul.mubr.bf16.gmra.mxu1 %v4688_v57  ;;  %2503 = vmatprep.mubr.bf16.mxu0 %v4758_v48  ;;  %v3769_v57 = vld [vmem:[%s4408_s8 + $0x414] ss:$8 sps:$4 sm:$0xff]   ;;  %s834_s8 = scalar_lea.vmem %s5400_s2, %s833_s27 }
 0x108   : > { %2616 = vmatprep.mubr.bf16.mxu1 %v4788_v13  ;;  %2676 = vmatpush1.bf16.msra.mxu0 %v3761_v49  ;;  %v1483_v11 = vld [vmem:[%s834_s8] sm:$0x3] }
 0x109   : > { %3450 = vmatpush1.bf16.msra.mxu1 %v3761_v49  ;;  %2677 = vmatprep.subr.bf16.mxu0 %v3766_v9  ;;  %v1217_v49 = vrot.slane %v872_v28, 5 }
 0x10a   : > { %3443 = vmatprep.subr.bf16.mxu1 %v3766_v9 }
 0x10c   : > { %2678 = vmatpush1.bf16.msra.mxu0 %v3764_v56 }
 0x10d   : > { %3451 = vmatpush1.bf16.msra.mxu1 %v3764_v56  ;;  %2679 = vmatprep.subr.bf16.mxu0 %v3769_v57 }
 0x10e   : > { %3444 = vmatprep.subr.bf16.mxu1 %v3769_v57  ;;  %2504 = vmatmul.mubr.bf16.gmra.mxu0 %v4736_v29  ;;  %v1199_v29 = vshrl.u32 %v4918_v62, 16 }
 0x10f   : > { %2617 = vmatmul.mubr.bf16.gmra.mxu1 %v4731_v25  ;;  %2513 = vmatprep.mubr.bf16.mxu0 %v4802_v33  ;;  %v1159_v25 = vrot.slane %v1158_v1, 4 }
 0x110   : > { %2626 = vmatprep.mubr.bf16.mxu1 %v4817_v55  ;;  %2680 = vmatpush1.bf16.msra.mxu0 %v3767_v26  ;;  %v1201_v23 = vrot.slane %v1199_v29, 4 }
 0x111   : > { %3452 = vmatpush1.bf16.msra.mxu1 %v3767_v26  ;;  %2681 = vmatprep.subr.bf16.mxu0 %v3773_v53  ;;  %v1164_v30 = vsel %vm4498_vm2, %v1159_v25, %v1163_v50 }
 0x112   : > { %3445 = vmatprep.subr.bf16.mxu1 %v3773_v53  ;;  %v1202_v0 = vor.u32 %v1201_v23, %v1197_v21  ;;  %v3248_v37 = vcombine.low %v1164_v30, %v1174_v36 }
 0x114   : > { %2682 = vmatpush1.bf16.msra.mxu0 %v3771_v14  ;;  %v1203_v40 = vrot.slane %v1202_v0, 4 }
 0x115   : > { %3453 = vmatpush1.bf16.msra.mxu1 %v3771_v14 }
 0x116   : > { %2514 = vmatmul.mubr.bf16.gmra.mxu0 %v4788_v13  ;;  %v3221_v13 = vrot.slane %v4838_v2, 9  ;;  %v1198_v2 = vsel %vm4498_vm2, %v1193_v39, %v1197_v21  ;;  %v1208_v3 = vsel %vm4498_vm2, %v1203_v40, %v1207_v54 }
 0x117   : > { %2627 = vmatmul.mubr.bf16.gmra.mxu1 %v4781_v7  ;;  %2523 = vmatprep.mubr.bf16.mxu0 %v4840_v5  ;;  %v1183_v7 = vrot.slane %v869_v59, 5  ;;  %v3251_v43 = vcombine.low %v1198_v2, %v1208_v3 }
 0x118   : > { %2636 = vmatprep.mubr.bf16.mxu1 %v4853_v16  ;;  %v1181_v8 = vsel %vm4543_vm5, %v3221_v13, %v1180_v32 }
 0x119   : > { %v1184_v41 = vsel %vm4543_vm5, %v1182_v38, %v1183_v7 }
 0x11a   : > { %v3249_v35 = vcombine.low %v1181_v8, %v1184_v41 }
 0x11e   : > { %2524 = vmatmul.mubr.bf16.gmra.mxu0 %v4817_v55  ;;  %v3250_v55 = vcombine.low %v4915_v60, %v4918_v62 }
 0x11f   : > { %2637 = vmatmul.mubr.bf16.gmra.mxu1 %v4821_v47  ;;  %2533 = vmatprep.mubr.bf16.mxu0 %v4871_v27  ;;  %v3990_v47 = vmov 0  }
 0x120   : > { %2646 = vmatprep.mubr.bf16.mxu1 %v3248_v37 }
 0x126   : > { %2534 = vmatmul.mubr.bf16.gmra.mxu0 %v4853_v16  ;;  %v3222_v16 = vrot.slane %v4915_v60, 9 }
 0x127   : > { %2647 = vmatmul.mubr.bf16.gmra.mxu1 %v4857_v18  ;;  %2543 = vmatprep.mubr.bf16.mxu0 %v3249_v35  ;;  %v1216_v18 = vrot.slane %v1214_v24, 4 }
 0x128   : > { %2656 = vmatprep.mubr.bf16.mxu1 %v3251_v43 }
 0x12e   : > { %2544 = vmatmul.mubr.bf16.gmra.mxu0 %v3248_v37 }
 0x12f   : > { %2657 = vmatmul.mubr.bf16.gmra.mxu1 %v3250_v55  ;;  %2699 = vmatprep.mubr.bf16.mxu0 %v3990_v47 }
 0x130   : > { %2739 = vmatprep.mubr.bf16.mxu1 %v3990_v47 }
 0x136   : > { %2700 = vmatmul.mubr.bf16.vlgmr.msra.gmra.mxu0 %v4665_v34  ;;  %v1215_v34 = vsel %vm4543_vm5, %v3222_v16, %v1214_v24 }
 0x137   : > { %2740 = vmatmul.mubr.bf16.vlgmr.msra.gmra.mxu1 %v4840_v5  ;;  %2709 = vmatprep.mubr.bf16.mxu0 %v3990_v47 }
 0x138   : > { %2749 = vmatprep.mubr.bf16.mxu1 %v3990_v47 }
 0x13e   : > { %2710 = vmatmul.mubr.bf16.gmra.mxu0 %v4722_v10  ;;  %v1218_v10 = vsel %vm4543_vm5, %v1216_v18, %v1217_v49 }
 0x13f   : > { %2750 = vmatmul.mubr.bf16.gmra.mxu1 %v4871_v27  ;;  %2719 = vmatprep.mubr.bf16.mxu0 %v3990_v47  ;;  %v3252_v5 = vcombine.low %v1215_v34, %v1218_v10  ;;  %v1485_v27 = vlaneseq }
 0x140   : > { %2759 = vmatprep.mubr.bf16.mxu1 %v3990_v47 }
 0x146   : > { %2720 = vmatmul.mubr.bf16.gmra.mxu0 %v4758_v48  ;;  %v1486_v48 = vshrl.u32 %v1485_v27, 7 }
 0x147   : > { %2760 = vmatmul.mubr.bf16.gmra.mxu1 %v3249_v35  ;;  %2729 = vmatprep.mubr.bf16.mxu0 %v3990_v47 }
 0x148   : > { %2769 = vmatprep.mubr.bf16.mxu1 %v3990_v47  ;;  %v1487_v9 = vsub.s32 0, %v1486_v48  ;;  %v1491_v61 = vsub.s32 1, %v1486_v48 }
 0x14a   : > { %v4976_v31 = vrot.slane %v1483_v11, %v1487_v9  ;;  %v4978_v51 = vrot.slane %v1483_v11, %v1491_v61 }
 0x14e   : > { %2730 = vmatmul.mubr.bf16.gmra.mxu0 %v4802_v33 }
 0x14f   : > { %2770 = vmatmul.mubr.bf16.gmra.mxu1 %v3252_v5 }
 0x176   : > { %v2249_v33 = vpop.f32.mrf.mxu0 }
 0x177   : > { %v2362_v63 = vpop.f32.mrf.mxu1  ;;  %v2250_v56 = vadd.f32 %v2249_v33, %v4976_v31 }
 0x178   : > { %v2251_v57 = vpop.f32.mrf.mxu0 }
 0x179   : > { %v2364_v42 = vpop.f32.mrf.mxu1  ;;  %v4981_v17 = vadd.f32 %v2362_v63, %v2250_v56  ;;  %v2252_v50 = vadd.f32 %v2251_v57, %v4978_v51 }
 0x17a   : > { %v2253_v58 = vpop.f32.mrf.mxu0 }
 0x17b   : > { %v2366_v59 = vpop.f32.mrf.mxu1  ;;  %v4984_v26 = vadd.f32 %v2364_v42, %v2252_v50  ;;  %v2254_v60 = vadd.f32 %v2253_v58, %v4976_v31 }
 0x17c   : > { %v2255_v62 = vpop.f32.mrf.mxu0 }
 0x17d   : > { %v2368_v53 = vpop.f32.mrf.mxu1  ;;  %v4987_v1 = vadd.f32 %v2366_v59, %v2254_v60  ;;  %v2256_v6 = vadd.f32 %v2255_v62, %v4978_v51 }
 0x17e   : > { %v2259_v45 = vpop.f32.mrf.mxu0 }
 0x17f   : > { %v2372_v46 = vpop.f32.mrf.mxu1  ;;  %v4990_v12 = vadd.f32 %v2368_v53, %v2256_v6  ;;  %v2260_v52 = vadd.f32 %v2259_v45, %v4976_v31 }
 0x180   : > { %v2261_v29 = vpop.f32.mrf.mxu0 }
 0x181   : > { %v2374_v14 = vpop.f32.mrf.mxu1  ;;  %v4993_v25 = vadd.f32 %v2372_v46, %v2260_v52  ;;  %v2262_v15 = vadd.f32 %v2261_v29, %v4978_v51 }
 0x182   : > { %v2263_v44 = vpop.f32.mrf.mxu0 }
 0x183   : > { %v2376_v19 = vpop.f32.mrf.mxu1  ;;  %v4996_v20 = vadd.f32 %v2374_v14, %v2262_v15  ;;  %v2264_v21 = vadd.f32 %v2263_v44, %v4976_v31 }
 0x184   : > { %v2265_v23 = vpop.f32.mrf.mxu0 }
 0x185   : > { %v2378_v28 = vpop.f32.mrf.mxu1  ;;  %v4999_v30 = vadd.f32 %v2376_v19, %v2264_v21  ;;  %v2266_v32 = vadd.f32 %v2265_v23, %v4978_v51 }
 0x186   : > { %v2269_v36 = vpop.f32.mrf.mxu0 }
 0x187   : > { %v2382_v4 = vpop.f32.mrf.mxu1  ;;  %v5002_v0 = vadd.f32 %v2378_v28, %v2266_v32  ;;  %v2270_v22 = vadd.f32 %v2269_v36, %v4976_v31 }
 0x188   : > { %v2271_v37 = vpop.f32.mrf.mxu0 }
 0x189   : > { %v2384_v13 = vpop.f32.mrf.mxu1  ;;  %v5005_v38 = vadd.f32 %v2382_v4, %v2270_v22  ;;  %v2272_v7 = vadd.f32 %v2271_v37, %v4978_v51 }
 0x18a   : > { %v2273_v39 = vpop.f32.mrf.mxu0 }
 0x18b   : > { %v2386_v40 = vpop.f32.mrf.mxu1  ;;  %v5008_v54 = vadd.f32 %v2384_v13, %v2272_v7  ;;  %v2274_v8 = vadd.f32 %v2273_v39, %v4976_v31 }
 0x18c   : > { %v2275_v41 = vpop.f32.mrf.mxu0 }
 0x18d   : > { %v2388_v2 = vpop.f32.mrf.mxu1  ;;  %v5011_v3 = vadd.f32 %v2386_v40, %v2274_v8  ;;  %v2276_v35 = vadd.f32 %v2275_v41, %v4978_v51 }
 0x18e   : > { %v2279_v43 = vpop.f32.mrf.mxu0 }
 0x18f   : > { %v2392_v55 = vpop.f32.mrf.mxu1  ;;  %v5014_v47 = vadd.f32 %v2388_v2, %v2276_v35  ;;  %v2280_v24 = vadd.f32 %v2279_v43, %v4976_v31 }
 0x190   : > { %v2281_v16 = vpop.f32.mrf.mxu0 }
 0x191   : > { %v2394_v18 = vpop.f32.mrf.mxu1  ;;  %v5017_v49 = vadd.f32 %v2392_v55, %v2280_v24  ;;  %v2282_v34 = vadd.f32 %v2281_v16, %v4978_v51 }
 0x192   : > { %v2283_v10 = vpop.f32.mrf.mxu0 }
 0x193   : > { %v2396_v5 = vpop.f32.mrf.mxu1  ;;  %v5020_v27 = vadd.f32 %v2394_v18, %v2282_v34  ;;  %v2284_v48 = vadd.f32 %v2283_v10, %v4976_v31 }
 0x194   : > { %v2285_v9 = vpop.f32.mrf.mxu0 }
 0x195   : > { %v2398_v11 = vpop.f32.mrf.mxu1  ;;  %v5023_v61 = vadd.f32 %v2396_v5, %v2284_v48  ;;  %v2286_v33 = vadd.f32 %v2285_v9, %v4978_v51 }
 0x196   : > { %v2289_v63 = vpop.f32.mrf.mxu0 }
 0x197   : > { %v2402_v56 = vpop.f32.mrf.mxu1  ;;  %v5026_v57 = vadd.f32 %v2398_v11, %v2286_v33  ;;  %v2290_v42 = vadd.f32 %v2289_v63, %v4976_v31 }
 0x198   : > { %v2291_v50 = vpop.f32.mrf.mxu0 }
 0x199   : > { %v2404_v58 = vpop.f32.mrf.mxu1  ;;  %v5029_v59 = vadd.f32 %v2402_v56, %v2290_v42  ;;  %v2292_v60 = vadd.f32 %v2291_v50, %v4978_v51 }
 0x19a   : > { %v2293_v62 = vpop.f32.mrf.mxu0 }
 0x19b   : > { %v2406_v53 = vpop.f32.mrf.mxu1  ;;  %v5032_v6 = vadd.f32 %v2404_v58, %v2292_v60  ;;  %v2294_v45 = vadd.f32 %v2293_v62, %v4976_v31 }
 0x19c   : > { %v2295_v46 = vpop.f32.mrf.mxu0 }
 0x19d   : > { %v2408_v52 = vpop.f32.mrf.mxu1  ;;  %v5035_v29 = vadd.f32 %v2406_v53, %v2294_v45  ;;  %v2296_v14 = vadd.f32 %v2295_v46, %v4978_v51 }
 0x19e   : > { %v2299_v15 = vpop.f32.mrf.mxu0 }
 0x19f   : > { %v2412_v44 = vpop.f32.mrf.mxu1  ;;  %v5038_v19 = vadd.f32 %v2408_v52, %v2296_v14  ;;  %v2300_v21 = vadd.f32 %v2299_v15, %v4976_v31 }
 0x1a0   : > { %v2301_v23 = vpop.f32.mrf.mxu0 }
 0x1a1   : > { %v2414_v28 = vpop.f32.mrf.mxu1  ;;  %v5041_v32 = vadd.f32 %v2412_v44, %v2300_v21  ;;  %v2302_v36 = vadd.f32 %v2301_v23, %v4978_v51 }
 0x1a2   : > { %v2303_v4 = vpop.f32.mrf.mxu0 }
 0x1a3   : > { %v2416_v22 = vpop.f32.mrf.mxu1  ;;  %v5044_v37 = vadd.f32 %v2414_v28, %v2302_v36  ;;  %v2304_v13 = vadd.f32 %v2303_v4, %v4976_v31 }
 0x1a4   : > { %v2305_v7 = vpop.f32.mrf.mxu0 }
 0x1a5   : > { %v2418_v39 = vpop.f32.mrf.mxu1  ;;  %v5047_v40 = vadd.f32 %v2416_v22, %v2304_v13  ;;  %v2306_v8 = vadd.f32 %v2305_v7, %v4978_v51 }
 0x1a6   : > { %v2309_v41 = vpop.f32.mrf.mxu0 }
 0x1a7   : > { %v2422_v2 = vpop.f32.mrf.mxu1  ;;  %v5050_v35 = vadd.f32 %v2418_v39, %v2306_v8  ;;  %v2310_v43 = vadd.f32 %v2309_v41, %v4976_v31 }
 0x1a8   : > { %v2311_v55 = vpop.f32.mrf.mxu0 }
 0x1a9   : > { %v2424_v24 = vpop.f32.mrf.mxu1  ;;  %v5053_v16 = vadd.f32 %v2422_v2, %v2310_v43  ;;  %v2312_v18 = vadd.f32 %v2311_v55, %v4978_v51 }
 0x1aa   : > { %v2313_v34 = vpop.f32.mrf.mxu0 }
 0x1ab   : > { %v2426_v10 = vpop.f32.mrf.mxu1  ;;  %v5056_v5 = vadd.f32 %v2424_v24, %v2312_v18  ;;  %v2314_v48 = vadd.f32 %v2313_v34, %v4976_v31 }
 0x1ac   : > { %v2315_v9 = vpop.f32.mrf.mxu0 }
 0x1ad   : > { %v2428_v11 = vpop.f32.mrf.mxu1  ;;  %v5059_v33 = vadd.f32 %v2426_v10, %v2314_v48  ;;  %v2316_v63 = vadd.f32 %v2315_v9, %v4978_v51 }
 0x1ae   : > { %v2319_v56 = vpop.f32.mrf.mxu0 }
 0x1af   : > { %v2432_v42 = vpop.f32.mrf.mxu1  ;;  %v5062_v50 = vadd.f32 %v2428_v11, %v2316_v63  ;;  %v2320_v58 = vadd.f32 %v2319_v56, %v4976_v31 }
 0x1b0   : > { %v2321_v60 = vpop.f32.mrf.mxu0 }
 0x1b1   : > { %v2434_v62 = vpop.f32.mrf.mxu1  ;;  %v5065_v53 = vadd.f32 %v2432_v42, %v2320_v58  ;;  %v2322_v45 = vadd.f32 %v2321_v60, %v4978_v51 }
 0x1b2   : > { %v2323_v46 = vpop.f32.mrf.mxu0 }
 0x1b3   : > { %5410 = vst [vmem:[#allocation5_spill] sm:$0xff] %v5065_v53  ;;  %v2436_v52 = vpop.f32.mrf.mxu1  ;;  %v5068_v14 = vadd.f32 %v2434_v62, %v2322_v45  ;;  %v2324_v15 = vadd.f32 %v2323_v46, %v4976_v31 }
 0x1b4   : > { %v2325_v44 = vpop.f32.mrf.mxu0 }
 0x1b5   : > { %5411 = vst [vmem:[#allocation6_spill] sm:$0xff] %v5068_v14  ;;  %v2438_v21 = vpop.f32.mrf.mxu1  ;;  %v5071_v23 = vadd.f32 %v2436_v52, %v2324_v15  ;;  %v2326_v28 = vadd.f32 %v2325_v44, %v4978_v51 }
 0x1b6   : > { %v5074_v36 = vpop.f32.mrf.mxu0 }
 0x1b7   : > { %5412 = vst [vmem:[#allocation7_spill] sm:$0xff] %v5071_v23  ;;  %v5076_v4 = vpop.f32.mrf.mxu1  ;;  %v5078_v22 = vadd.f32 %v2438_v21, %v2326_v28 }
 0x1b8   : > { %v5080_v13 = vpop.f32.mrf.mxu0 }
 0x1b9   : > { %5413 = vst [vmem:[#allocation8_spill] sm:$0xff] %v5078_v22  ;;  %v5082_v7 = vpop.f32.mrf.mxu1 }
 0x1ba   : > { %v5084_v39 = vpop.f32.mrf.mxu0 }
 0x1bb   : > { %v5086_v8 = vpop.f32.mrf.mxu1 }
 0x1bc   : > { %v5088_v31 = vpop.f32.mrf.mxu0 }
 0x1bd   : > { %v5090_v41 = vpop.f32.mrf.mxu1 }
 0x1be   : > { %v5092_v2 = vpop.f32.mrf.mxu0 }
 0x1bf   : > { %v5094_v51 = vpop.f32.mrf.mxu1 }
 0x1c0   : > { %v5096_v43 = vpop.f32.mrf.mxu0 }
 0x1c1   : > { %v5098_v55 = vpop.f32.mrf.mxu1 }
 0x1c2   : > { %v5100_v24 = vpop.f32.mrf.mxu0 }
 0x1c3   : > { %v5102_v18 = vpop.f32.mrf.mxu1 }
 0x1c4   : > { %v5104_v34 = vpop.f32.mrf.mxu0 }
 0x1c5   : > { %v5106_v10 = vpop.f32.mrf.mxu1 }
 0x1c6   : > { %v2495_v48 = vpop.f32.mrf.mxu0 }
 0x1c7   : > { %v2608_v9 = vpop.f32.mrf.mxu1  ;;  %v2496_v11 = vadd.f32 %v2495_v48, %v5005_v38 }
 0x1c8   : > { %v2497_v63 = vpop.f32.mrf.mxu0 }
 0x1c9   : > { %v2610_v56 = vpop.f32.mrf.mxu1  ;;  %v5109_v42 = vadd.f32 %v2608_v9, %v2496_v11  ;;  %v2498_v58 = vadd.f32 %v2497_v63, %v5008_v54 }
 0x1ca   : > { %v2499_v60 = vpop.f32.mrf.mxu0 }
 0x1cb   : > { %5414 = vst [vmem:[#allocation9_spill] sm:$0xff] %v5109_v42  ;;  %v2612_v62 = vpop.f32.mrf.mxu1  ;;  %v5112_v45 = vadd.f32 %v2610_v56, %v2498_v58  ;;  %v2500_v46 = vadd.f32 %v2499_v60, %v5011_v3 }
 0x1cc   : > { %v2501_v52 = vpop.f32.mrf.mxu0 }
 0x1cd   : > { %5415 = vst [vmem:[#allocation10_spill] sm:$0xff] %v5112_v45  ;;  %v2614_v15 = vpop.f32.mrf.mxu1  ;;  %v5115_v44 = vadd.f32 %v2612_v62, %v2500_v46  ;;  %v2502_v21 = vadd.f32 %v2501_v52, %v5014_v47 }
 0x1ce   : > { %v2505_v28 = vpop.f32.mrf.mxu0 }
 0x1cf   : > { %5416 = vst [vmem:[#allocation11_spill] sm:$0xff] %v5115_v44  ;;  %v2618_v38 = vpop.f32.mrf.mxu1  ;;  %v5118_v48 = vadd.f32 %v2614_v15, %v2502_v21  ;;  %v2506_v9 = vadd.f32 %v2505_v28, %v5017_v49 }
 0x1d0   : > { %v2507_v11 = vpop.f32.mrf.mxu0 }
 0x1d1   : > { %5417 = vst [vmem:[#allocation12_spill] sm:$0xff] %v5118_v48  ;;  %v2620_v54 = vpop.f32.mrf.mxu1  ;;  %v5121_v63 = vadd.f32 %v2618_v38, %v2506_v9  ;;  %v2508_v56 = vadd.f32 %v2507_v11, %v5020_v27 }
 0x1d2   : > { %v2509_v58 = vpop.f32.mrf.mxu0 }
 0x1d3   : > { %5418 = vst [vmem:[#allocation13_spill] sm:$0xff] %v5121_v63  ;;  %v2622_v3 = vpop.f32.mrf.mxu1  ;;  %v5124_v60 = vadd.f32 %v2620_v54, %v2508_v56  ;;  %v2510_v62 = vadd.f32 %v2509_v58, %v5023_v61 }
 0x1d4   : > { %v2511_v46 = vpop.f32.mrf.mxu0 }
 0x1d5   : > { %5419 = vst [vmem:[#allocation14_spill] sm:$0xff] %v5124_v60  ;;  %v2624_v47 = vpop.f32.mrf.mxu1  ;;  %v5127_v52 = vadd.f32 %v2622_v3, %v2510_v62  ;;  %v2512_v15 = vadd.f32 %v2511_v46, %v5026_v57 }
 0x1d6   : > { %v2515_v21 = vpop.f32.mrf.mxu0 }
 0x1d7   : > { %5420 = vst [vmem:[#allocation15_spill] sm:$0xff] %v5127_v52  ;;  %v2628_v49 = vpop.f32.mrf.mxu1  ;;  %v5130_v28 = vadd.f32 %v2624_v47, %v2512_v15 }
 0x1d8   : > { %v2517_v38 = vpop.f32.mrf.mxu0 }
 0x1d9   : > { %5421 = vst [vmem:[#allocation16_spill] sm:$0xff] %v5130_v28  ;;  %v2630_v9 = vpop.f32.mrf.mxu1 }
 0x1da   : > { %v2519_v22 = vpop.f32.mrf.mxu0 }
 0x1db   : > { %v2632_v27 = vpop.f32.mrf.mxu1 }
 0x1dc   : > { %v2521_v11 = vpop.f32.mrf.mxu0 }
 0x1dd   : > { %v2634_v63 = vpop.f32.mrf.mxu1 }
 0x1de   : > { %v2525_v54 = vpop.f32.mrf.mxu0 }
 0x1df   : > { %v5132_v56 = vpop.f32.mrf.mxu1 }
 0x1e0   : > { %v2527_v61 = vpop.f32.mrf.mxu0 }
 0x1e1   : > { %v2640_v58 = vpop.f32.mrf.mxu1 }
 0x1e2   : > { %v5134_v60 = vpop.f32.mrf.mxu0 }
 0x1e3   : > { %v5136_v3 = vpop.f32.mrf.mxu1 }
 0x1e4   : > { %v5138_v57 = vpop.f32.mrf.mxu0 }
 0x1e5   : > { %v5140_v62 = vpop.f32.mrf.mxu1 }
 0x1e6   : > { %v5142_v46 = vpop.f32.mrf.mxu0 }
 0x1e7   : > { %v5144_v47 = vpop.f32.mrf.mxu1 }
 0x1e8   : > { %5422 = vst [vmem:[#allocation17_spill] sm:$0xff] %v5144_v47  ;;  %v5146_v15 = vpop.f32.mrf.mxu0  ;;  %v2476_v47 = vadd.f32 %v5074_v36, %v4981_v17  ;;  %v2486_v17 = vadd.f32 %v5092_v2, %v4993_v25 }
 0x1e9   : > { %v5148_v28 = vpop.f32.mrf.mxu1 }
 0x1ea   : > { %5423 = vst [vmem:[#allocation18_spill] sm:$0xff] %v5148_v28  ;;  %v5150_v52 = vpop.f32.mrf.mxu0  ;;  %v2516_v28 = vadd.f32 %v2515_v21, %v5029_v59  ;;  %v2488_v59 = vadd.f32 %v5096_v43, %v4996_v20 }
 0x1eb   : > { %v5152_v23 = vpop.f32.mrf.mxu1 }
 0x1ec   : > { %5424 = vst [vmem:[#allocation19_spill] sm:$0xff] %v5152_v23  ;;  %v5154_v48 = vpop.f32.mrf.mxu0  ;;  %v2478_v23 = vadd.f32 %v5080_v13, %v4984_v26  ;;  %v2629_v13 = vadd.f32 %v2628_v49, %v2516_v28  ;;  %v2526_v49 = vadd.f32 %v2525_v54, %v5041_v32 }
 0x1ed   : > { %5425 = vst [vmem:[#allocation20_spill] sm:$0xff] %v5154_v48  ;;  %v5156_v44 = vpop.f32.mrf.mxu1  ;;  %v2480_v48 = vadd.f32 %v5084_v39, %v4987_v1  ;;  %v2589_v1 = vadd.f32 %v5076_v4, %v2476_v47  ;;  %v2601_v4 = vadd.f32 %v5098_v55, %v2488_v59 }
 0x1ee   : > { %5426 = vst [vmem:[#allocation21_spill] sm:$0xff] %v5156_v44  ;;  %v5158_v14 = vpop.f32.mrf.mxu0  ;;  %v2591_v39 = vadd.f32 %v5082_v7, %v2478_v23  ;;  %v2528_v23 = vadd.f32 %v2527_v61, %v5044_v37 }
 0x1ef   : > { %5427 = vst [vmem:[#allocation22_spill] sm:$0xff] %v5158_v14  ;;  %v5160_v45 = vpop.f32.mrf.mxu1  ;;  %v2593_v21 = vadd.f32 %v5086_v8, %v2480_v48 }
 0x1f0   : > { %5428 = vst [vmem:[#allocation23_spill] sm:$0xff] %v5160_v45  ;;  %v5162_v53 = vpop.f32.mrf.mxu0  ;;  %v2482_v45 = vadd.f32 %v5088_v31, %v4990_v12  ;;  %v2520_v12 = vadd.f32 %v2519_v22, %v5035_v29  ;;  %v2641_v54 = vadd.f32 %v2640_v58, %v2528_v23 }
 0x1f1   : > { %v5164_v42 = vpop.f32.mrf.mxu1 }
 0x1f2   : > { %5429 = vst [vmem:[#allocation24_spill] sm:$0xff] %v5164_v42  ;;  %v5173_v44 = vpop.f32.mrf.mxu0  ;;  %v2518_v42 = vadd.f32 %v2517_v38, %v5032_v6  ;;  %v2522_v6 = vadd.f32 %v2521_v11, %v5038_v19  ;;  %v2595_v2 = vadd.f32 %v5090_v41, %v2482_v45  ;;  %v2490_v41 = vadd.f32 %v5100_v24, %v4999_v30 }
 0x1f3   : > { %v5175_v14 = vpop.f32.mrf.mxu1  ;;  %v2633_v45 = vadd.f32 %v2632_v27, %v2520_v12  ;;  %v2639_v11 = vadd.f32 %v5132_v56, %v2526_v49 }
 0x1f4   : > { %v5184_v36 = vpop.f32.mrf.mxu0  ;;  %v2631_v20 = vadd.f32 %v2630_v9, %v2518_v42  ;;  %v2492_v42 = vadd.f32 %v5104_v34, %v5002_v0  ;;  %v2530_v0 = vadd.f32 %v5134_v60, %v5047_v40  ;;  %v2532_v34 = vadd.f32 %v5138_v57, %v5050_v35 }
 0x1f5   : > { %v5186_v26 = vpop.f32.mrf.mxu1 }
 0x1f6   : > { %5430 = vst [vmem:[#allocation25_spill] sm:$0xff] %v5186_v26  ;;  %v2701_v31 = vpop.f32.mrf.mxu0  ;;  %v2599_v26 = vadd.f32 %v5094_v51, %v2486_v17  ;;  %v2635_v51 = vadd.f32 %v2634_v63, %v2522_v6  ;;  %v2643_v57 = vadd.f32 %v5136_v3, %v2530_v0 }
 0x1f7   : > { %v2741_v25 = vpop.f32.mrf.mxu1  ;;  %v2702_v43 = vadd.f32 %v2701_v31, %v2589_v1 }
 0x1f8   : > { %v2742_v38 = vadd.f32 %v2741_v25, %v2629_v13  ;;  %v2703_v7 = vpop.f32.mrf.mxu0  ;;  %v2645_v25 = vadd.f32 %v5140_v62, %v2532_v34 }
 0x1f9   : > { %v2743_v8 = vpop.f32.mrf.mxu1  ;;  %v3397_v29 = vmul.f32 -1.442695, %v2702_v43  ;;  %v2704_v19 = vadd.f32 %v2703_v7, %v2591_v39  ;;  %v2603_v39 = vadd.f32 %v5102_v18, %v2490_v41 }
 0x1fa   : > { %v3413_v22 = vmul.f32 -1.442695, %v2742_v38  ;;  %v2744_v48 = vadd.f32 %v2743_v8, %v2631_v20  ;;  %v2705_v28 = vpop.f32.mrf.mxu0 }
 0x1fb   : > { %v2745_v55 = vpop.f32.mrf.mxu1  ;;  %3774 = vpow2.f32 %v3397_v29  ;;  %v3398_v32 = vmul.f32 -1.442695, %v2704_v19  ;;  %v2706_v37 = vadd.f32 %v2705_v28, %v2593_v21  ;;  %v2605_v21 = vadd.f32 %v5106_v10, %v2492_v42 }
 0x1fc   : > { %v3414_v9 = vmul.f32 -1.442695, %v2744_v48  ;;  %3776 = vpow2.f32 %v3413_v22  ;;  %v2746_v61 = vadd.f32 %v2745_v55, %v2633_v45  ;;  %v2707_v47 = vpop.f32.mrf.mxu0 }
 0x1fd   : > { %v2747_v17 = vpop.f32.mrf.mxu1  ;;  %3778 = vpow2.f32 %v3398_v32  ;;  %v3399_v30 = vmul.f32 -1.442695, %v2706_v37  ;;  %v2708_v24 = vadd.f32 %v2707_v47, %v2595_v2 }
 0x1fe   : > { %v2748_v59 = vadd.f32 %v2747_v17, %v2635_v51  ;;  %3780 = vpow2.f32 %v3414_v9  ;;  %v3415_v63 = vmul.f32 -1.442695, %v2746_v61  ;;  %v2711_v27 = vpop.f32.mrf.mxu0 }
 0x1ff   : > { %v2751_v1 = vpop.f32.mrf.mxu1  ;;  %3782 = vpow2.f32 %v3399_v30  ;;  %v3400_v56 = vmul.f32 -1.442695, %v2708_v24  ;;  %v2712_v13 = vadd.f32 %v2711_v27, %v2599_v26  ;;  %v2536_v24 = vadd.f32 %v5142_v46, %v5053_v16 }
 0x200   : > { %v3416_v58 = vmul.f32 -1.442695, %v2748_v59  ;;  %3784 = vpow2.f32 %v3415_v63  ;;  %v2752_v12 = vadd.f32 %v2751_v1, %v2639_v11  ;;  %v2713_v6 = vpop.f32.mrf.mxu0  ;;  %v2538_v59 = vadd.f32 %v5146_v15, %v5056_v5 }
 0x201   : > { %v2753_v31 = vpop.f32.mrf.mxu1  ;;  %3786 = vpow2.f32 %v3400_v56  ;;  %v3401_v40 = vmul.f32 -1.442695, %v2712_v13  ;;  %v2714_v60 = vadd.f32 %v2713_v6, %v2601_v4  ;;  %v2540_v27 = vadd.f32 %v5150_v52, %v5059_v33  ;;  %v5431_v13 = vld [vmem:[#allocation20_spill] sm:$0xff]  ;;  %v5433_v6 = vld [vmem:[#allocation18_spill] sm:$0xff] }
 0x202   : > { %v2754_v35 = vadd.f32 %v2753_v31, %v2641_v54  ;;  %3788 = vpow2.f32 %v3416_v58  ;;  %v3417_v2 = vmul.f32 -1.442695, %v2752_v12  ;;  %v2715_v20 = vpop.f32.mrf.mxu0  ;;  %v2651_v31 = vadd.f32 %v5433_v6, %v2538_v59  ;;  %v5443_v59 = vld [vmem:[#allocation12_spill] sm:$0xff] }
 0x203   : > { %v2755_v26 = vpop.f32.mrf.mxu1  ;;  %3790 = vpow2.f32 %v3401_v40  ;;  %v3402_v18 = vmul.f32 -1.442695, %v2714_v60  ;;  %v2716_v10 = vadd.f32 %v2715_v20, %v2603_v39  ;;  %v2542_v39 = vadd.f32 %v5431_v13, %v5062_v50  ;;  %v5434_v60 = vld [vmem:[#allocation19_spill] sm:$0xff] }
 0x204   : > { %v3418_v43 = vmul.f32 -1.442695, %v2754_v35  ;;  %3792 = vpow2.f32 %v3417_v2  ;;  %v2756_v38 = vadd.f32 %v2755_v26, %v2643_v57  ;;  %v2717_v49 = vpop.f32.mrf.mxu0  ;;  %v2653_v35 = vadd.f32 %v5434_v60, %v2540_v27  ;;  %v5435_v57 = vld [vmem:[#allocation9_spill] sm:$0xff] }
 0x205   : > { %v2757_v23 = vpop.f32.mrf.mxu1  ;;  %3794 = vpow2.f32 %v3402_v18  ;;  %v3403_v7 = vmul.f32 -1.442695, %v2716_v10  ;;  %v2718_v4 = vadd.f32 %v2717_v49, %v2605_v21  ;;  %v5432_v21 = vld [vmem:[#allocation17_spill] sm:$0xff] }
 0x206   : > { %v2758_v8 = vadd.f32 %v2757_v23, %v2645_v25  ;;  %3796 = vpow2.f32 %v3418_v43  ;;  %v3419_v3 = vmul.f32 -1.442695, %v2756_v38  ;;  %v2721_v29 = vpop.f32.mrf.mxu0  ;;  %v2649_v12 = vadd.f32 %v5432_v21, %v2536_v24  ;;  %v5436_v26 = vld [vmem:[#allocation21_spill] sm:$0xff]  ;;  %v5438_v23 = vld [vmem:[#allocation22_spill] sm:$0xff] }
 0x207   : > { %v2761_v62 = vpop.f32.mrf.mxu1  ;;  %3798 = vpow2.f32 %v3403_v7  ;;  %v3404_v22 = vmul.f32 -1.442695, %v2718_v4  ;;  %v2722_v25 = vadd.f32 %v2721_v29, %v5435_v57  ;;  %v2655_v18 = vadd.f32 %v5436_v26, %v2542_v39  ;;  %v5437_v49 = vld [vmem:[#allocation5_spill] sm:$0xff]  ;;  %v5445_v39 = vld [vmem:[#allocation24_spill] sm:$0xff] }
 0x208   : > { %v3420_v19 = vmul.f32 -1.442695, %v2758_v8  ;;  %v3775_v48 = vpop.eup %3774  ;;  %3800 = vpow2.f32 %v3419_v3  ;;  %v2723_v41 = vpop.f32.mrf.mxu0  ;;  %v2762_v10 = vadd.f32 %v2761_v62, %v2649_v12  ;;  %v2546_v7 = vadd.f32 %v5438_v23, %v5437_v49  ;;  %v5439_v8 = vld [vmem:[#allocation10_spill] sm:$0xff]  ;;  %v5447_v12 = vld [vmem:[#allocation8_spill] sm:$0xff] }
 0x209   : > { %v5211_v42 = vpop.f32.mrf.mxu1  ;;  %v3777_v45 = vpop.eup %3776  ;;  %v2876_v51 = vadd.f32 1.0, %v3775_v48  ;;  %3802 = vpow2.f32 %v3404_v22  ;;  %v2724_v3 = vadd.f32 %v2723_v41, %v5439_v8 }
 0x20a   : > { %v3779_v28 = vpop.eup %3778  ;;  %v2892_v55 = vadd.f32 1.0, %v3777_v45  ;;  %3804 = vpow2.f32 %v3420_v19  ;;  %v5213_v32 = vpop.f32.mrf.mxu0  ;;  %v5440_v19 = vld [vmem:[#allocation6_spill] sm:$0xff]  ;;  %v2764_v45 = vadd.f32 %v5211_v42, %v2651_v31 }
 0x20b   : > { %v3781_v9 = vpop.eup %3780  ;;  %3806 = vrcp.f32 %v2876_v51  ;;  %v2877_v37 = vadd.f32 1.0, %v3779_v28  ;;  %v5215_v11 = vpop.f32.mrf.mxu1  ;;  %v2548_v48 = vadd.f32 %v5162_v53, %v5440_v19  ;;  %v3406_v42 = vmul.f32 -1.442695, %v2724_v3 }
 0x20c   : > { %v3783_v54 = vpop.eup %3782  ;;  %3808 = vrcp.f32 %v2892_v55  ;;  %v2893_v61 = vadd.f32 1.0, %v3781_v9  ;;  %v2727_v34 = vpop.f32.mrf.mxu0  ;;  %v3405_v55 = vmul.f32 -1.442695, %v2722_v25  ;;  %v5441_v9 = vld [vmem:[#allocation11_spill] sm:$0xff]  ;;  %v2766_v53 = vadd.f32 %v5215_v11, %v2653_v35 }
 0x20d   : > { %v3785_v47 = vpop.eup %3784  ;;  %3810 = vrcp.f32 %v2877_v37  ;;  %v2878_v17 = vadd.f32 1.0, %v3783_v54  ;;  %v2767_v56 = vpop.f32.mrf.mxu1  ;;  %v2726_v37 = vadd.f32 %v5213_v32, %v5441_v9  ;;  %v2728_v32 = vadd.f32 %v2727_v34, %v5443_v59 }
 0x20e   : > { %v3787_v30 = vpop.eup %3786  ;;  %3812 = vrcp.f32 %v2893_v61  ;;  %v2894_v0 = vadd.f32 1.0, %v3785_v47  ;;  %v2731_v52 = vpop.f32.mrf.mxu0  ;;  %v3421_v47 = vmul.f32 -1.442695, %v2762_v10  ;;  %v3422_v11 = vmul.f32 -1.442695, %v2764_v45  ;;  %v5450_v10 = vld [vmem:[#allocation25_spill] sm:$0xff] }
 0x20f   : > { %v3789_v63 = vpop.eup %3788  ;;  %3814 = vrcp.f32 %v2878_v17  ;;  %v2879_v1 = vadd.f32 1.0, %v3787_v30  ;;  %v2771_v2 = vpop.f32.mrf.mxu1  ;;  %v5442_v30 = vld [vmem:[#allocation23_spill] sm:$0xff] }
 0x210   : > { %v3791_v58 = vpop.eup %3790  ;;  %3816 = vrcp.f32 %v2894_v0  ;;  %v2895_v16 = vadd.f32 1.0, %v3789_v63  ;;  %v2733_v51 = vpop.f32.mrf.mxu0  ;;  %v2659_v24 = vadd.f32 %v5442_v30, %v2546_v7  ;;  %v5444_v63 = vld [vmem:[#allocation7_spill] sm:$0xff] }
 0x211   : > { %v3793_v46 = vpop.eup %3792  ;;  %3818 = vrcp.f32 %v2879_v1  ;;  %v2880_v5 = vadd.f32 1.0, %v3791_v58  ;;  %v2773_v54 = vpop.f32.mrf.mxu1  ;;  %v2550_v27 = vadd.f32 %v5173_v44, %v5444_v63  ;;  %v2768_v1 = vadd.f32 %v2767_v56, %v2655_v18 }
 0x212   : > { %v3795_v15 = vpop.eup %3794  ;;  %3820 = vrcp.f32 %v2895_v16  ;;  %v2896_v33 = vadd.f32 1.0, %v3793_v46  ;;  %v2735_v58 = vpop.f32.mrf.mxu0  ;;  %v2661_v16 = vadd.f32 %v5445_v39, %v2548_v48  ;;  %v3407_v46 = vmul.f32 -1.442695, %v2726_v37 }
 0x213   : > { %v3797_v40 = vpop.eup %3796  ;;  %3822 = vrcp.f32 %v2880_v5  ;;  %v2881_v50 = vadd.f32 1.0, %v3795_v15  ;;  %v5446_v5 = vld [vmem:[#allocation13_spill] sm:$0xff]  ;;  %v2775_v15 = vpop.f32.mrf.mxu1  ;;  %v2552_v44 = vadd.f32 %v5184_v36, %v5447_v12  ;;  %v3423_v56 = vmul.f32 -1.442695, %v2766_v53 }
 0x214   : > { %v3799_v20 = vpop.eup %3798  ;;  %3824 = vrcp.f32 %v2896_v33  ;;  %v2897_v43 = vadd.f32 1.0, %v3797_v40  ;;  %v2732_v34 = vadd.f32 %v2731_v52, %v5446_v5  ;;  %v2772_v6 = vadd.f32 %v2771_v2, %v2659_v24  ;;  %v5448_v40 = vld [vmem:[#allocation14_spill] sm:$0xff]  ;;  %v2737_v57 = vpop.f32.mrf.mxu0 }
 0x215   : > { %v3801_v38 = vpop.eup %3800  ;;  %3826 = vrcp.f32 %v2881_v50  ;;  %v2882_v4 = vadd.f32 1.0, %v3799_v20  ;;  %v3408_v33 = vmul.f32 -1.442695, %v2728_v32  ;;  %v2734_v60 = vadd.f32 %v2733_v51, %v5448_v40  ;;  %v5449_v20 = vld [vmem:[#allocation15_spill] sm:$0xff]  ;;  %v2777_v18 = vpop.f32.mrf.mxu1 }
 0x216   : > { %v3803_v22 = vpop.eup %3802  ;;  %3828 = vrcp.f32 %v2897_v43  ;;  %v2898_v29 = vadd.f32 1.0, %v3801_v38  ;;  %v2663_v52 = vadd.f32 %v5175_v14, %v2550_v27  ;;  %v3424_v50 = vmul.f32 -1.442695, %v2768_v1 }
 0x217   : > { %v3805_v28 = vpop.eup %3804  ;;  %3830 = vrcp.f32 %v2882_v4  ;;  %v2883_v62 = vadd.f32 1.0, %v3803_v22  ;;  %v2774_v36 = vadd.f32 %v2773_v54, %v2661_v16  ;;  %v3409_v2 = vmul.f32 -1.442695, %v2732_v34  ;;  %v5451_v4 = vld [vmem:[#allocation16_spill] sm:$0xff] }
 0x218   : > { %v3807_v61 = vpop.eup %3806  ;;  %3832 = vrcp.f32 %v2898_v29  ;;  %v2899_v41 = vadd.f32 1.0, %v3805_v28  ;;  %v2736_v26 = vadd.f32 %v2735_v58, %v5449_v20  ;;  %v2665_v38 = vadd.f32 %v5450_v10, %v2552_v44 }
 0x219   : > { %v3809_v17 = vpop.eup %3808  ;;  %2972 = vst [vmem:[%s5244_s12] sm:$0xff] %v3807_v61  ;;  %3834 = vrcp.f32 %v2883_v62  ;;  %v3425_v14 = vmul.f32 -1.442695, %v2772_v6  ;;  %v2776_v49 = vadd.f32 %v2775_v15, %v2663_v52  ;;  %v3410_v7 = vmul.f32 -1.442695, %v2734_v60 }
 0x21a   : > { %v3811_v0 = vpop.eup %3810  ;;  %2988 = vst [vmem:[%s5244_s12 + $0x80] sm:$0xff] %v3809_v17  ;;  %3836 = vrcp.f32 %v2899_v41  ;;  %v2738_v8 = vadd.f32 %v2737_v57, %v5451_v4  ;;  %v3426_v22 = vmul.f32 -1.442695, %v2774_v36  ;;  %v2778_v19 = vadd.f32 %v2777_v18, %v2665_v38 }
 0x21b   : > { %v3813_v13 = vpop.eup %3812  ;;  %2973 = vst [vmem:[%s5244_s12 + $0x8] sm:$0xff] %v3811_v0  ;;  %3838 = vpow2.f32 %v3405_v55  ;;  %v3411_v29 = vmul.f32 -1.442695, %v2736_v26  ;;  %v3427_v51 = vmul.f32 -1.442695, %v2776_v49 }
 0x21c   : > { %v3815_v21 = vpop.eup %3814  ;;  %2989 = vst [vmem:[%s5244_s12 + $0x88] sm:$0xff] %v3813_v13  ;;  %3840 = vpow2.f32 %v3421_v47  ;;  %v3412_v62 = vmul.f32 -1.442695, %v2738_v8  ;;  %v3428_v9 = vmul.f32 -1.442695, %v2778_v19 }
 0x21d   : > { %v3817_v31 = vpop.eup %3816  ;;  %2974 = vst [vmem:[%s5244_s12 + $0x10] sm:$0xff] %v3815_v21  ;;  %3842 = vpow2.f32 %v3406_v42 }
 0x21e   : > { %v3819_v35 = vpop.eup %3818  ;;  %2990 = vst [vmem:[%s5244_s12 + $0x90] sm:$0xff] %v3817_v31  ;;  %3844 = vpow2.f32 %v3422_v11 }
 0x21f   : > { %v3821_v25 = vpop.eup %3820  ;;  %2975 = vst [vmem:[%s5244_s12 + $0x18] sm:$0xff] %v3819_v35  ;;  %3846 = vpow2.f32 %v3407_v46 }
 0x220   : > { %v3823_v43 = vpop.eup %3822  ;;  %2991 = vst [vmem:[%s5244_s12 + $0x98] sm:$0xff] %v3821_v25  ;;  %3848 = vpow2.f32 %v3423_v56 }
 0x221   : > { %v3825_v23 = vpop.eup %3824  ;;  %2976 = vst [vmem:[%s5244_s12 + $0x20] sm:$0xff] %v3823_v43  ;;  %3850 = vpow2.f32 %v3408_v33 }
 0x222   : > { %v3827_v3 = vpop.eup %3826  ;;  %2992 = vst [vmem:[%s5244_s12 + $0xa0] sm:$0xff] %v3825_v23  ;;  %3852 = vpow2.f32 %v3424_v50  ;;  %v3031_v23 = vld [vmem:[%s5244_s12] sm:$0xff] (%p4097_p9) }
 0x223   : > { %v3829_v48 = vpop.eup %3828  ;;  %2977 = vst [vmem:[%s5244_s12 + $0x28] sm:$0xff] %v3827_v3  ;;  %3854 = vpow2.f32 %v3409_v2  ;;  %3032 = vst [vmem:[%s5311_s18] sm:$0xff] (%p4097_p9), %v3031_v23 }
 0x224   : > { %v3831_v45 = vpop.eup %3830  ;;  %2993 = vst [vmem:[%s5244_s12 + $0xa8] sm:$0xff] %v3829_v48  ;;  %3856 = vpow2.f32 %v3425_v14  ;;  %v3035_v4 = vld [vmem:[%s5244_s12 + $0x10] sm:$0xff] (%p4097_p9) }
 0x225   : > { %v3833_v28 = vpop.eup %3832  ;;  %2978 = vst [vmem:[%s5244_s12 + $0x30] sm:$0xff] %v3831_v45  ;;  %3858 = vpow2.f32 %v3410_v7  ;;  %v3033_v7 = vld [vmem:[%s5244_s12 + $0x8] sm:$0xff] (%p4097_p9)  ;;  %3036 = vst [vmem:[%s5311_s18 + $0x30] sm:$0xff] (%p4097_p9), %v3035_v4 }
 0x226   : > { %v3835_v55 = vpop.eup %3834  ;;  %2994 = vst [vmem:[%s5244_s12 + $0xb0] sm:$0xff] %v3833_v28  ;;  %3860 = vpow2.f32 %v3426_v22  ;;  %v3037_v8 = vld [vmem:[%s5244_s12 + $0x18] sm:$0xff] (%p4097_p9)  ;;  %3034 = vst [vmem:[%s5311_s18 + $0x8] sm:$0xff] (%p4097_p9), %v3033_v7 }
 0x227   : > { %v3837_v37 = vpop.eup %3836  ;;  %2979 = vst [vmem:[%s5244_s12 + $0x38] sm:$0xff] %v3835_v55  ;;  %3862 = vpow2.f32 %v3411_v29  ;;  %3038 = vst [vmem:[%s5311_s18 + $0x38] sm:$0xff] (%p4097_p9), %v3037_v8 }
 0x228   : > { %v3839_v54 = vpop.eup %3838  ;;  %2995 = vst [vmem:[%s5244_s12 + $0xb8] sm:$0xff] %v3837_v37  ;;  %3864 = vpow2.f32 %v3427_v51  ;;  %v3039_v3 = vld [vmem:[%s5244_s12 + $0x20] sm:$0xff] (%p4097_p9) }
 0x229   : > { %v3841_v61 = vpop.eup %3840  ;;  %v2884_v41 = vadd.f32 1.0, %v3839_v54  ;;  %3866 = vpow2.f32 %v3412_v62  ;;  %3040 = vst [vmem:[%s5311_s18 + $0x60] sm:$0xff] (%p4097_p9), %v3039_v3  ;;  %v3063_v54 = vld [vmem:[%s5244_s12 + $0x80] sm:$0xff] (%p4097_p9) }
 0x22a   : > { %v3843_v47 = vpop.eup %3842  ;;  %v2900_v53 = vadd.f32 1.0, %v3841_v61  ;;  %3868 = vpow2.f32 %v3428_v9  ;;  %v3041_v22 = vld [vmem:[%s5244_s12 + $0x28] sm:$0xff] (%p4097_p9)  ;;  %3064 = vst [vmem:[%s5311_s18 + $0x180] sm:$0xff] (%p4097_p9), %v3063_v54 }
 0x22b   : > { %v3845_v17 = vpop.eup %3844  ;;  %3870 = vrcp.f32 %v2884_v41  ;;  %v2885_v30 = vadd.f32 1.0, %v3843_v47  ;;  %3042 = vst [vmem:[%s5311_s18 + $0x68] sm:$0xff] (%p4097_p9), %v3041_v22  ;;  %v3065_v61 = vld [vmem:[%s5244_s12 + $0x88] sm:$0xff] (%p4097_p9)  ;;  %v3067_v41 = vld [vmem:[%s5244_s12 + $0x90] sm:$0xff] (%p4097_p9)  ;;  %v3069_v47 = vld [vmem:[%s5244_s12 + $0x98] sm:$0xff] (%p4097_p9) }
 0x22c   : > { %v3847_v24 = vpop.eup %3846  ;;  %3872 = vrcp.f32 %v2900_v53  ;;  %v2901_v42 = vadd.f32 1.0, %v3845_v17  ;;  %v3043_v19 = vld [vmem:[%s5244_s12 + $0x30] sm:$0xff] (%p4097_p9)  ;;  %3066 = vst [vmem:[%s5311_s18 + $0x188] sm:$0xff] (%p4097_p9), %v3065_v61  ;;  %v3071_v53 = vld [vmem:[%s5244_s12 + $0xa0] sm:$0xff] (%p4097_p9)  ;;  %3068 = vst [vmem:[%s5311_s18 + $0x1b0] sm:$0xff] (%p4097_p9), %v3067_v41 }
 0x22d   : > { %v3849_v59 = vpop.eup %3848  ;;  %3874 = vrcp.f32 %v2885_v30  ;;  %v2886_v32 = vadd.f32 1.0, %v3847_v24  ;;  %3044 = vst [vmem:[%s5311_s18 + $0x90] sm:$0xff] (%p4097_p9), %v3043_v19  ;;  %3070 = vst [vmem:[%s5311_s18 + $0x1b8] sm:$0xff] (%p4097_p9), %v3069_v47  ;;  %v3073_v17 = vld [vmem:[%s5244_s12 + $0xa8] sm:$0xff] (%p4097_p9)  ;;  %v3075_v30 = vld [vmem:[%s5244_s12 + $0xb0] sm:$0xff] (%p4097_p9) }
 0x22e   : > { %v3851_v0 = vpop.eup %3850  ;;  %3876 = vrcp.f32 %v2901_v42  ;;  %v2902_v63 = vadd.f32 1.0, %v3849_v59  ;;  %v3045_v48 = vld [vmem:[%s5244_s12 + $0x38] sm:$0xff] (%p4097_p9)  ;;  %3072 = vst [vmem:[%s5311_s18 + $0x1e0] sm:$0xff] (%p4097_p9), %v3071_v53  ;;  %3074 = vst [vmem:[%s5311_s18 + $0x1e8] sm:$0xff] (%p4097_p9), %v3073_v17 }
 0x22f   : > { %v3853_v27 = vpop.eup %3852  ;;  %3878 = vrcp.f32 %v2886_v32  ;;  %v2887_v11 = vadd.f32 1.0, %v3851_v0  ;;  %3046 = vst [vmem:[%s5311_s18 + $0x98] sm:$0xff] (%p4097_p9), %v3045_v48  ;;  %v3077_v24 = vld [vmem:[%s5244_s12 + $0xb8] sm:$0xff] (%p4097_p9)  ;;  %3076 = vst [vmem:[%s5311_s18 + $0x210] sm:$0xff] (%p4097_p9), %v3075_v30 }
 0x230   : > { %v3855_v1 = vpop.eup %3854  ;;  %3880 = vrcp.f32 %v2902_v63  ;;  %v2903_v58 = vadd.f32 1.0, %v3853_v27  ;;  %3078 = vst [vmem:[%s5311_s18 + $0x218] sm:$0xff] (%p4097_p9), %v3077_v24 }
 0x231   : > { %v3857_v13 = vpop.eup %3856  ;;  %3882 = vrcp.f32 %v2887_v11  ;;  %v2888_v39 = vadd.f32 1.0, %v3855_v1 }
 0x232   : > { %v3859_v16 = vpop.eup %3858  ;;  %3884 = vrcp.f32 %v2903_v58  ;;  %v2904_v46 = vadd.f32 1.0, %v3857_v13 }
 0x233   : > { %v3861_v5 = vpop.eup %3860  ;;  %3886 = vrcp.f32 %v2888_v39  ;;  %v2889_v34 = vadd.f32 1.0, %v3859_v16 }
 0x234   : > { %v3863_v15 = vpop.eup %3862  ;;  %3888 = vrcp.f32 %v2904_v46  ;;  %v2905_v21 = vadd.f32 1.0, %v3861_v5 }
 0x235   : > { %v3865_v12 = vpop.eup %3864  ;;  %3890 = vrcp.f32 %v2889_v34  ;;  %v2890_v44 = vadd.f32 1.0, %v3863_v15 }
 0x236   : > { %v3867_v56 = vpop.eup %3866  ;;  %3892 = vrcp.f32 %v2905_v21  ;;  %v2906_v6 = vadd.f32 1.0, %v3865_v12 }
 0x237   : > { %v3869_v31 = vpop.eup %3868  ;;  %3894 = vrcp.f32 %v2890_v44  ;;  %v2891_v33 = vadd.f32 1.0, %v3867_v56 }
 0x238   : > { %v3871_v40 = vpop.eup %3870  ;;  %3896 = vrcp.f32 %v2906_v6  ;;  %v2907_v60 = vadd.f32 1.0, %v3869_v31 }
 0x239   : > { %v3873_v35 = vpop.eup %3872  ;;  %2980 = vst [vmem:[%s5244_s12 + $0x40] sm:$0xff] %v3871_v40  ;;  %3898 = vrcp.f32 %v2891_v33 }
 0x23a   : > { %v3875_v52 = vpop.eup %3874  ;;  %2996 = vst [vmem:[%s5244_s12 + $0xc0] sm:$0xff] %v3873_v35  ;;  %3900 = vrcp.f32 %v2907_v60 }
 0x23b   : > { %v3877_v50 = vpop.eup %3876  ;;  %2981 = vst [vmem:[%s5244_s12 + $0x48] sm:$0xff] %v3875_v52 }
 0x23c   : > { %v3879_v36 = vpop.eup %3878  ;;  %2997 = vst [vmem:[%s5244_s12 + $0xc8] sm:$0xff] %v3877_v50 }
 0x23d   : > { %v3881_v57 = vpop.eup %3880  ;;  %2982 = vst [vmem:[%s5244_s12 + $0x50] sm:$0xff] %v3879_v36 }
 0x23e   : > { %v3883_v25 = vpop.eup %3882  ;;  %2998 = vst [vmem:[%s5244_s12 + $0xd0] sm:$0xff] %v3881_v57 }
 0x23f   : > { %v3885_v2 = vpop.eup %3884  ;;  %2983 = vst [vmem:[%s5244_s12 + $0x58] sm:$0xff] %v3883_v25 }
 0x240   : > { %v3887_v20 = vpop.eup %3886  ;;  %2999 = vst [vmem:[%s5244_s12 + $0xd8] sm:$0xff] %v3885_v2  ;;  %v3047_v29 = vld [vmem:[%s5244_s12 + $0x40] sm:$0xff] (%p4097_p9) }
 0x241   : > { %v3889_v26 = vpop.eup %3888  ;;  %2984 = vst [vmem:[%s5244_s12 + $0x60] sm:$0xff] %v3887_v20  ;;  %3048 = vst [vmem:[%s5311_s18 + $0xc0] sm:$0xff] (%p4097_p9), %v3047_v29  ;;  %v3079_v42 = vld [vmem:[%s5244_s12 + $0xc0] sm:$0xff] (%p4097_p9) }
 0x242   : > { %v3891_v18 = vpop.eup %3890  ;;  %3000 = vst [vmem:[%s5244_s12 + $0xe0] sm:$0xff] %v3889_v26  ;;  %v3049_v45 = vld [vmem:[%s5244_s12 + $0x48] sm:$0xff] (%p4097_p9)  ;;  %3080 = vst [vmem:[%s5311_s18 + $0x240] sm:$0xff] (%p4097_p9), %v3079_v42 }
 0x243   : > { %v3893_v43 = vpop.eup %3892  ;;  %2985 = vst [vmem:[%s5244_s12 + $0x68] sm:$0xff] %v3891_v18  ;;  %3050 = vst [vmem:[%s5311_s18 + $0xc8] sm:$0xff] (%p4097_p9), %v3049_v45  ;;  %v3081_v59 = vld [vmem:[%s5244_s12 + $0xc8] sm:$0xff] (%p4097_p9) }
 0x244   : > { %v3895_v10 = vpop.eup %3894  ;;  %3001 = vst [vmem:[%s5244_s12 + $0xe8] sm:$0xff] %v3893_v43  ;;  %3010 = sbr.rel (!%p4097_p9) target bundleno = 593 (0x251), region = 74  ;;  %v3051_v51 = vld [vmem:[%s5244_s12 + $0x50] sm:$0xff] (%p4097_p9)  ;;  %3082 = vst [vmem:[%s5311_s18 + $0x248] sm:$0xff] (%p4097_p9), %v3081_v59 }
 0x245   : > { %v3897_v38 = vpop.eup %3896  ;;  %2986 = vst [vmem:[%s5244_s12 + $0x70] sm:$0xff] %v3895_v10  ;;  %3052 = vst [vmem:[%s5311_s18 + $0xf0] sm:$0xff] (%p4097_p9), %v3051_v51  ;;  %v3083_v32 = vld [vmem:[%s5244_s12 + $0xd0] sm:$0xff] (%p4097_p9) }
 0x246   : > { %v3899_v14 = vpop.eup %3898  ;;  %3002 = vst [vmem:[%s5244_s12 + $0xf0] sm:$0xff] %v3897_v38  ;;  %v3053_v28 = vld [vmem:[%s5244_s12 + $0x58] sm:$0xff] (%p4097_p9)  ;;  %3084 = vst [vmem:[%s5311_s18 + $0x270] sm:$0xff] (%p4097_p9), %v3083_v32 }
 0x247   : > { %v3901_v49 = vpop.eup %3900  ;;  %2987 = vst [vmem:[%s5244_s12 + $0x78] sm:$0xff] %v3899_v14  ;;  %3054 = vst [vmem:[%s5311_s18 + $0xf8] sm:$0xff] (%p4097_p9), %v3053_v28  ;;  %v3085_v0 = vld [vmem:[%s5244_s12 + $0xd8] sm:$0xff] (%p4097_p9) }
 0x248   : > { %3003 = vst [vmem:[%s5244_s12 + $0xf8] sm:$0xff] %v3901_v49  ;;  %v3055_v62 = vld [vmem:[%s5244_s12 + $0x60] sm:$0xff] (%p4097_p9)  ;;  %3086 = vst [vmem:[%s5311_s18 + $0x278] sm:$0xff] (%p4097_p9), %v3085_v0 }
 0x249   : > { %3056 = vst [vmem:[%s5311_s18 + $0x120] sm:$0xff] %v3055_v62  ;;  %v3087_v63 = vld [vmem:[%s5244_s12 + $0xe0] sm:$0xff] }
 0x24a   : > { %v3057_v55 = vld [vmem:[%s5244_s12 + $0x68] sm:$0xff]  ;;  %3088 = vst [vmem:[%s5311_s18 + $0x2a0] sm:$0xff] %v3087_v63 }
 0x24b   : > { %3058 = vst [vmem:[%s5311_s18 + $0x128] sm:$0xff] %v3057_v55  ;;  %v3089_v27 = vld [vmem:[%s5244_s12 + $0xe8] sm:$0xff] }
 0x24c   : > { %v3059_v9 = vld [vmem:[%s5244_s12 + $0x70] sm:$0xff]  ;;  %3090 = vst [vmem:[%s5311_s18 + $0x2a8] sm:$0xff] %v3089_v27 }
 0x24d   : > { %3060 = vst [vmem:[%s5311_s18 + $0x150] sm:$0xff] %v3059_v9  ;;  %v3091_v11 = vld [vmem:[%s5244_s12 + $0xf0] sm:$0xff] }
 0x24e   : > { %v3061_v37 = vld [vmem:[%s5244_s12 + $0x78] sm:$0xff]  ;;  %3092 = vst [vmem:[%s5311_s18 + $0x2d0] sm:$0xff] %v3091_v11 }
 0x24f   : > { %3062 = vst [vmem:[%s5311_s18 + $0x158] sm:$0xff] %v3061_v37  ;;  %v3093_v1 = vld [vmem:[%s5244_s12 + $0xf8] sm:$0xff] }
 0x250   : > { %3094 = vst [vmem:[%s5311_s18 + $0x2d8] sm:$0xff] %v3093_v1 }
 0x251 PF: > { %s13_s22 = sadd.s32 1, %s3988_s22   ;;  %s5452_s28 = sld [smem:[#allocation4_spill]] }
 0x252   : > { %p10_p3 = scmp.ge.s32.totalorder %s13_s22, 14   ;;  %s5453_s12 = smov %s3952_s13 }
 0x253   : > { %s5454_s13 = smov %s4103_s10  ;;  %s5455_s14 = smov %s3960_s15 }
 0x254   : > { %s5456_s15 = smov %s4083_s29  ;;  %s5457_s16 = smov %s3976_s19 }
 0x255   : > { %s5458_s17 = smov %s3980_s20  ;;  %s5459_s18 = smov %s3984_s21 }
 0x256   : > { %s5460_s19 = smov %s5464_s23  ;;  %s5461_s20 = smov %s5468_s24 }
 0x257   : > { %s5462_s21 = smov %s5452_s28  ;;  %12 = sbr.rel (!%p10_p3) target bundleno = 6 (0x6), region = 135 }

</bundles_post_ra>
